<compile_context>
chip_gen: v5e
topology: v5e:2x2
jax: 0.10.0
libtpu: 0.0.40
codegen_flags: <defaults>
</compile_context>

<pallas_src>
import functools
import math

import jax
import jax.numpy as jnp
from jax.experimental import pallas as pl
from jax.experimental.pallas import tpu as pltpu


V_TILE = 512       # vocab tile width (lanes); sweep 512..2048 for large vocabs
NC = 2             # vocab-loop shards (maps to v7x's 2 TensorCores via "parallel")
NEG_BIG = -1e30    # large-negative fill for padded vocab columns / seq positions


def _round_up(x, m):
    return (x + m - 1) // m * m


def decoder_attn_kernel(
    # inputs
    embed_ref, h_ref, c_ref, cs_ref,
    wx_ref, b_ref, wfc_ref, bfc_ref,
    # outputs
    logits_ref, lse_ref, hn_ref, cn_ref, attn_ref,
    # VMEM scratch (persists across the vocab grid axis)
    hbf_sc, m_sc, l_sc,
    *, true_h, true_s):
    """Fused attention + LSTMCell + tiled fc_out with per-core online logsumexp."""
    v = pl.program_id(1)                     # vocab-tile index within this shard
    Bp, Hp = h_ref.shape
    Sp = cs_ref.shape[1]

    # ---- first vocab step of each shard: attention + LSTM cell ----------------
    @pl.when(v == 0)
    def _():
        h = h_ref[...]                                    # (Bp, Hp) f32
        c = c_ref[...]                                    # (Bp, Hp) f32
        cs = cs_ref[...]                                  # (Bp, Sp, Hp) f32

        # energy = sum_h(h * cs) / sqrt(H); exact f32 softmax over the sequence.
        # TODO(synk): for large S, stream content_selection in S-tiles and lower
        # these contractions to MXU einsums ('bqh,bsh->bqs' / 'bqs,bsh->bqh').
        energy = jnp.sum(h[:, None, :] * cs, axis=2) * jnp.float32(1.0 / math.sqrt(true_h))
        if Sp > true_s:                                   # mask padded seq positions
            col = jax.lax.broadcasted_iota(jnp.int32, (Bp, Sp), 1)
            energy = jnp.where(col < true_s, energy, jnp.float32(NEG_BIG))
        m = jnp.max(energy, axis=1, keepdims=True)
        e = jnp.exp(energy - m)
        attn = e / jnp.sum(e, axis=1, keepdims=True)      # exact divide (one-shot)
        attn_vec = jnp.sum(attn[:, :, None] * cs, axis=1)           # (Bp, Hp)

        # Attention output is a grid-resident block: write it directly (lane-padded).
        attn_ref[...] = jnp.zeros(attn_ref.shape, jnp.float32)
        attn_ref[0, :, 0:Sp] = attn

        # One fused gate matmul: x = [embed | attn_vec | h] @ Wx (bf16 MXU, f32 acc).
        x = jnp.concatenate([embed_ref[...], attn_vec, h], axis=1).astype(jnp.bfloat16)
        gates = jnp.dot(x, wx_ref[...], preferred_element_type=jnp.float32) + b_ref[...]

        # Gate slices are lane-aligned: each gate occupies Hp (=128k) lanes.
        i_g = jax.nn.sigmoid(gates[:, 0 * Hp:1 * Hp])
        f_g = jax.nn.sigmoid(gates[:, 1 * Hp:2 * Hp])
        g_g = jnp.tanh(gates[:, 2 * Hp:3 * Hp])
        o_g = jax.nn.sigmoid(gates[:, 3 * Hp:4 * Hp])
        c_n = f_g * c + i_g * g_g
        h_n = o_g * jnp.tanh(c_n)

        # State outputs are grid-resident VMEM blocks: no scratch, no copy-out step.
        hn_ref[0] = h_n
        cn_ref[0] = c_n
        hbf_sc[...] = h_n.astype(jnp.bfloat16)            # cast once for fc_out loop

        # Init this shard's online-logsumexp accumulators.
        m_sc[...] = jnp.full(m_sc.shape, NEG_BIG, jnp.float32)
        l_sc[...] = jnp.zeros(l_sc.shape, jnp.float32)

    # ---- every step: one wide lane-dense vocab tile of fc_out + online LSE ----
    logits_v = (jnp.dot(hbf_sc[...], wfc_ref[...], preferred_element_type=jnp.float32)
                + bfc_ref[...])                                     # (Bp, V_TILE)
    logits_ref[...] = logits_v                                      # raw logits tile

    m_prev = m_sc[...]
    m_new = jnp.maximum(m_prev, jnp.max(logits_v, axis=1, keepdims=True))
    l_sc[...] = (l_sc[...] * jnp.exp(m_prev - m_new)
                 + jnp.sum(jnp.exp(logits_v - m_new), axis=1, keepdims=True))
    m_sc[...] = m_new

    # ---- last step of each shard: emit this shard's partial logsumexp ---------
    @pl.when(v == pl.num_programs(1) - 1)
    def _():
        lse_ref[0] = m_sc[...] + jnp.log(l_sc[...])


def prepare_params(params):
    """One-time (init-time) weight prep: transpose, stack gates, pad, cast to bf16.

    PyTorch layouts: w_ih (4H, E+H) rows = [i; f; g; o], cols = [embed | attn_vec];
                     w_hh (4H, H); w_fc (V, H).
    """
    H = params["w_hh"].shape[1]
    E = params["w_ih"].shape[1] - H
    V = params["w_fc"].shape[0]
    Ep, Hp = _round_up(E, 128), _round_up(H, 128)
    Vp = _round_up(V, NC * V_TILE)            # vocab padded to a whole tile per shard

    # Stacked LSTM weight: [embed(Ep) | attn_vec(Hp) | h(Hp)] @ Wx -> gates (4*Hp),
    # each gate padded to Hp lanes so in-kernel gate slices are lane-aligned.
    wx = jnp.zeros((Ep + 2 * Hp, 4 * Hp), jnp.float32)
    bg = jnp.zeros((1, 4 * Hp), jnp.float32)
    w_ih, w_hh = params["w_ih"], params["w_hh"]
    b_sum = params["b_ih"] + params["b_hh"]
    for g in range(4):
        rows = slice(g * H, (g + 1) * H)
        cols = slice(g * Hp, g * Hp + H)
        wx = wx.at[0:E, cols].set(w_ih[rows, 0:E].T)                 # embed block
        wx = wx.at[Ep:Ep + H, cols].set(w_ih[rows, E:E + H].T)       # attn_vec block
        wx = wx.at[Ep + Hp:Ep + Hp + H, cols].set(w_hh[rows, :].T)   # hidden block
        bg = bg.at[0, cols].set(b_sum[rows])

    w_fc = jnp.zeros((Hp, Vp), jnp.float32).at[0:H, 0:V].set(params["w_fc"].T)
    # Padded vocab columns get a huge negative bias so they vanish in the softmax.
    b_fc = jnp.full((1, Vp), NEG_BIG, jnp.float32).at[0, 0:V].set(params["b_fc"])

    emb = jnp.zeros((params["embedding"].shape[0], Ep), jnp.float32)
    emb = emb.at[:, 0:E].set(params["embedding"])

    return {
        "embedding": emb,                        # (V, Ep) f32 gather table
        "wx": wx.astype(jnp.bfloat16),           # (Ep+2Hp, 4Hp) bf16 MXU operand
        "b": bg,                                 # (1, 4Hp) f32
        "w_fc": w_fc.astype(jnp.bfloat16),       # (Hp, Vp) bf16 MXU operand
        "b_fc": b_fc,                            # (1, Vp) f32
        "dims": (E, H, V, Ep, Hp, Vp),           # plain python ints
    }


def decoder_attn_forward(decoder_input, decoder_hidden, content_selection, prepped):
    """Per-token hot path: embedding gather + activation padding + one pallas_call."""
    h, c = decoder_hidden
    B, H = h.shape
    S = content_selection.shape[1]
    E, _, V, Ep, Hp, Vp = prepped["dims"]

    Bp = _round_up(B, 16)           # 16 sublanes: bf16 MXU LHS vregs fully packed
    Sp = _round_up(S, 8)            # sublane-align content_selection
    Sout = _round_up(S, 128)        # lane-dense attention output slab
    nvpc = Vp // (NC * V_TILE)      # vocab tiles per shard (per core on v7x)

    # Per-call activation prep (weights were prepped once, not here).
    # TODO(synk): for multi-token decode, keep h/c/content_selection in this padded
    # layout across steps and gather the embedding row in-kernel via scalar prefetch
    # + DMA so none of these wrapper-side XLA ops sit on the decode hot path.
    idx = jnp.zeros((Bp,), decoder_input.dtype).at[:B].set(decoder_input)
    embed = prepped["embedding"][idx]                                # (Bp, Ep)
    # TODO(synk): dropout on embed is identity (eval mode); no RNG dropout in kernel.
    hp = jnp.zeros((Bp, Hp), jnp.float32).at[:B, :H].set(h)
    cp = jnp.zeros((Bp, Hp), jnp.float32).at[:B, :H].set(c)
    csp = jnp.zeros((Bp, Sp, Hp), jnp.float32).at[:B, :S, :H].set(content_selection)

    kernel = functools.partial(decoder_attn_kernel, true_h=H, true_s=S)

    flops = int(NC * 2 * Bp * (Ep + 2 * Hp) * 4 * Hp + 2 * Bp * Hp * Vp
                + NC * 4 * Bp * Sp * Hp)
    trans = int(NC * Bp * (5 * Hp + Sp) + Bp * Vp)
    bytes_acc = int(sum(x.size * x.dtype.itemsize for x in
                        (embed, hp, cp, csp, prepped["wx"], prepped["b"],
                         prepped["w_fc"], prepped["b_fc"]))
                    + 4 * (Bp * Vp + NC * Bp + NC * 2 * Bp * Hp + NC * Bp * Sout))

    # Explicit scoped-VMEM budget from the actual block footprint (+ headroom),
    # clamped to what every generation can grant (v5e default is only 16 MiB,
    # v7x physical per-core VMEM is 64 MiB).
    blk_bytes = (embed.size * 4 + hp.size * 4 + cp.size * 4 + csp.size * 4
                 + prepped["wx"].size * 2 + prepped["b"].size * 4
                 + 2 * (Hp * V_TILE * 2 + V_TILE * 4)      # streamed w_fc/b_fc tiles
                 + 2 * (Bp * V_TILE * 4)                   # logits out tiles
                 + Bp * 4 + 2 * Bp * Hp * 4 + Bp * Sout * 4
                 + Bp * Hp * 2 + 2 * Bp * 4)               # scratch
    vmem_limit = int(min(max(2 * blk_bytes, 16 * 1024 * 1024), 64 * 1024 * 1024))
    # TODO(synk): at realistic H/S sizes, add pipeline_mode=pl.Buffered(1) on the
    # grid-invariant in_specs below (and Buffered(3) on w_fc for v5e) to trim VMEM.

    grid_spec = pltpu.PrefetchScalarGridSpec(
        num_scalar_prefetch=0,
        grid=(NC, nvpc),                                     # (vocab shard, vocab tile)
        in_specs=[
            pl.BlockSpec((Bp, Ep), lambda s, v: (0, 0)),             # embed
            pl.BlockSpec((Bp, Hp), lambda s, v: (0, 0)),             # h
            pl.BlockSpec((Bp, Hp), lambda s, v: (0, 0)),             # c
            pl.BlockSpec((Bp, Sp, Hp), lambda s, v: (0, 0, 0)),      # content_selection
            pl.BlockSpec((Ep + 2 * Hp, 4 * Hp), lambda s, v: (0, 0)),  # stacked LSTM W
            pl.BlockSpec((1, 4 * Hp), lambda s, v: (0, 0)),          # gate bias
            pl.BlockSpec((Hp, V_TILE), lambda s, v: (0, s * nvpc + v)),  # w_fc tile
            pl.BlockSpec((1, V_TILE), lambda s, v: (0, s * nvpc + v)),   # b_fc tile
        ],
        out_specs=(
            pl.BlockSpec((Bp, V_TILE), lambda s, v: (0, s * nvpc + v)),  # raw logits
            pl.BlockSpec((1, Bp, 1), lambda s, v: (s, 0, 0)),        # per-shard LSE
            pl.BlockSpec((1, Bp, Hp), lambda s, v: (s, 0, 0)),       # h_n
            pl.BlockSpec((1, Bp, Hp), lambda s, v: (s, 0, 0)),       # c_n
            pl.BlockSpec((1, Bp, Sout), lambda s, v: (s, 0, 0)),     # attn (lane-padded)
        ),
        scratch_shapes=[
            pltpu.VMEM((Bp, Hp), jnp.bfloat16),              # h_n cast once for fc_out
            pltpu.VMEM((Bp, 1), jnp.float32),                # running max
            pltpu.VMEM((Bp, 1), jnp.float32),                # running sum-exp
        ],
    )

    out_shapes = (
        jax.ShapeDtypeStruct((Bp, Vp), jnp.float32),
        jax.ShapeDtypeStruct((NC, Bp, 1), jnp.float32),
        jax.ShapeDtypeStruct((NC, Bp, Hp), jnp.float32),
        jax.ShapeDtypeStruct((NC, Bp, Hp), jnp.float32),
        jax.ShapeDtypeStruct((NC, Bp, Sout), jnp.float32),
    )

    logits_raw, lse_nc, hn_nc, cn_nc, attn_nc = pl.pallas_call(
        kernel,
        out_shape=out_shapes,
        grid_spec=grid_spec,
        compiler_params=pltpu.CompilerParams(
            dimension_semantics=("parallel", "arbitrary"),   # shards -> v7x cores,
            vmem_limit_bytes=vmem_limit),                    # vocab axis carries LSE
        cost_estimate=pl.CostEstimate(flops=flops, transcendentals=trans,
                                      bytes_accessed=bytes_acc),
    )(embed, hp, cp, csp, prepped["wx"], prepped["b"], prepped["w_fc"], prepped["b_fc"])

    # Merge per-shard partial logsumexps (stable, O(B*NC) -- free).
    m = jnp.max(lse_nc, axis=0)                                        # (Bp, 1)
    lse = m + jnp.log(jnp.sum(jnp.exp(lse_nc - m), axis=0))            # (Bp, 1)

    # Epilogue: slice BEFORE normalizing so XLA never touches the padded slab.
    # TODO(synk): for argmax/top-k decode, return (logits_raw, lse) and skip this.
    dec_out = logits_raw[:B, :V] - lse[:B]
    return dec_out, (hn_nc[0, :B, :H], cn_nc[0, :B, :H]), attn_nc[0, :B, :S]


def reference_forward(decoder_input, decoder_hidden, content_selection, params):
    """Pure-JAX f32 reference mirroring the PyTorch semantics (eval mode)."""
    h, c = decoder_hidden
    H = h.shape[1]
    embed = params["embedding"][decoder_input]
    energy = h[:, None, :] * content_selection / math.sqrt(H)
    attn = jax.nn.softmax(jnp.sum(energy, axis=2), axis=1)
    attn_vec = jnp.sum(attn[:, :, None] * content_selection, axis=1)
    x = jnp.concatenate([embed, attn_vec], axis=1)
    gates = x @ params["w_ih"].T + params["b_ih"] + h @ params["w_hh"].T + params["b_hh"]
    i_g = jax.nn.sigmoid(gates[:, 0 * H:1 * H])
    f_g = jax.nn.sigmoid(gates[:, 1 * H:2 * H])
    g_g = jnp.tanh(gates[:, 2 * H:3 * H])
    o_g = jax.nn.sigmoid(gates[:, 3 * H:4 * H])
    c_n = f_g * c + i_g * g_g
    h_n = o_g * jnp.tanh(c_n)
    out = jax.nn.log_softmax(h_n @ params["w_fc"].T + params["b_fc"], axis=1)
    return out, (h_n, c_n), attn


if __name__ == "__main__":
    # Small shapes implied by the module; V=2500 exercises multiple vocab tiles and
    # real columns on both vocab shards (Vp = 3072, 3 tiles per shard).
    B, E, H, S, V = 2, 32, 32, 8, 2500

    key = jax.random.PRNGKey(0)
    ks = jax.random.split(key, 10)
    k_hid = 1.0 / math.sqrt(H)

    params = {
        "embedding": jax.random.normal(ks[0], (V, E), jnp.float32),
        "w_ih": jax.random.uniform(ks[1], (4 * H, E + H), jnp.float32, -k_hid, k_hid),
        "w_hh": jax.random.uniform(ks[2], (4 * H, H), jnp.float32, -k_hid, k_hid),
        "b_ih": jax.random.uniform(ks[3], (4 * H,), jnp.float32, -k_hid, k_hid),
        "b_hh": jax.random.uniform(ks[4], (4 * H,), jnp.float32, -k_hid, k_hid),
        "w_fc": jax.random.uniform(ks[5], (V, H), jnp.float32, -k_hid, k_hid),
        "b_fc": jax.random.uniform(ks[6], (V,), jnp.float32, -k_hid, k_hid),
    }

    decoder_input = jax.random.randint(ks[7], (B,), 0, V, jnp.int32)
    h0 = jax.random.normal(ks[8], (B, H), jnp.float32)
    c0 = jax.random.normal(ks[9], (B, H), jnp.float32)
    content_selection = jax.random.normal(jax.random.PRNGKey(42), (B, S, H), jnp.float32)

    prepped = prepare_params(params)   # one-time weight prep (outside decode hot path)

    dec_out, (h_n, c_n), attn_score = decoder_attn_forward(
        decoder_input, (h0, c0), content_selection, prepped)
    jax.block_until_ready((dec_out, h_n, c_n, attn_score))

    # Numerical check vs f32 reference. Attention softmax is now exact f32; the
    # remaining tolerance covers the (intentional) bf16 MXU operands (f32 accumulate)
    # in the LSTM gate and fc_out matmuls -- fine for inference.
    r_out, (r_h, r_c), r_attn = reference_forward(
        decoder_input, (h0, c0), content_selection, params)
    assert jnp.allclose(attn_score, r_attn, atol=1e-3, rtol=1e-3), "attn mismatch"
    assert jnp.allclose(h_n, r_h, atol=2e-2, rtol=2e-2), "h_n mismatch"
    assert jnp.allclose(c_n, r_c, atol=2e-2, rtol=2e-2), "c_n mismatch"
    assert jnp.allclose(dec_out, r_out, atol=5e-2, rtol=5e-2), "log-prob mismatch"

    print("KERNEL_OK")
</pallas_src>

<mosaic_0001>
module attributes {stable_mosaic.version = 11 : i64} {
  func.func @decoder_attn_kernel(%arg0: i32, %arg1: i32, %arg2: memref<16x128xf32, #tpu.memory_space<vmem>>, %arg3: memref<16x128xf32, #tpu.memory_space<vmem>>, %arg4: memref<16x128xf32, #tpu.memory_space<vmem>>, %arg5: memref<16x8x128xf32, #tpu.memory_space<vmem>>, %arg6: memref<384x512xbf16, #tpu.memory_space<vmem>>, %arg7: memref<1x512xf32, #tpu.memory_space<vmem>>, %arg8: memref<128x512xbf16, #tpu.memory_space<vmem>>, %arg9: memref<1x512xf32, #tpu.memory_space<vmem>>, %arg10: memref<16x512xf32, #tpu.memory_space<vmem>>, %arg11: memref<1x16x1xf32, #tpu.memory_space<vmem>>, %arg12: memref<1x16x128xf32, #tpu.memory_space<vmem>>, %arg13: memref<1x16x128xf32, #tpu.memory_space<vmem>>, %arg14: memref<1x16x128xf32, #tpu.memory_space<vmem>>, %arg15: memref<16x128xbf16, #tpu.memory_space<vmem>>, %arg16: memref<16x1xf32, #tpu.memory_space<vmem>>, %arg17: memref<16x1xf32, #tpu.memory_space<vmem>>) attributes {dimension_semantics = [#tpu.dimension_semantics<parallel>, #tpu.dimension_semantics<arbitrary>], iteration_bounds = array<i64: 2, 3>, scalar_prefetch = 0 : i64, scratch_operands = 3 : i64, tpu.core_type = #tpu.core_type<tc>, window_params = [{pipeline_mode = #tpu.pipeline_mode<synchronous>, transform_indices = @transform_0, window_bounds = array<i64: 16, 128>}, {pipeline_mode = #tpu.pipeline_mode<synchronous>, transform_indices = @transform_1, window_bounds = array<i64: 16, 128>}, {pipeline_mode = #tpu.pipeline_mode<synchronous>, transform_indices = @transform_2, window_bounds = array<i64: 16, 128>}, {pipeline_mode = #tpu.pipeline_mode<synchronous>, transform_indices = @transform_3, window_bounds = array<i64: 16, 8, 128>}, {pipeline_mode = #tpu.pipeline_mode<synchronous>, transform_indices = @transform_4, window_bounds = array<i64: 384, 512>}, {pipeline_mode = #tpu.pipeline_mode<synchronous>, transform_indices = @transform_5, window_bounds = array<i64: 1, 512>}, {transform_indices = @transform_6, window_bounds = array<i64: 128, 512>}, {transform_indices = @transform_7, window_bounds = array<i64: 1, 512>}, {transform_indices = @transform_8, window_bounds = array<i64: 16, 512>}, {transform_indices = @transform_9, window_bounds = array<i64: 1, 16, 1>}, {transform_indices = @transform_10, window_bounds = array<i64: 1, 16, 128>}, {transform_indices = @transform_11, window_bounds = array<i64: 1, 16, 128>}, {transform_indices = @transform_12, window_bounds = array<i64: 1, 16, 128>}]} {
    %c0_i32 = arith.constant 0 : i32
    %0 = arith.cmpi eq, %arg1, %c0_i32 : i32
    %1 = arith.extui %0 : i1 to i32
    %c0_i32_0 = arith.constant 0 : i32
    %2 = arith.cmpi ne, %1, %c0_i32_0 : i32
    scf.if %2 {
      %c0_19 = arith.constant 0 : index
      %c0_20 = arith.constant 0 : index
      %29 = vector.load %arg3[%c0_19, %c0_20] : memref<16x128xf32, #tpu.memory_space<vmem>>, vector<16x128xf32>
      %c0_21 = arith.constant 0 : index
      %c0_22 = arith.constant 0 : index
      %30 = vector.load %arg4[%c0_21, %c0_22] : memref<16x128xf32, #tpu.memory_space<vmem>>, vector<16x128xf32>
      %c0_23 = arith.constant 0 : index
      %c0_24 = arith.constant 0 : index
      %c0_25 = arith.constant 0 : index
      %31 = vector.load %arg5[%c0_23, %c0_24, %c0_25] : memref<16x8x128xf32, #tpu.memory_space<vmem>>, vector<16x8x128xf32>
      %32 = vector.shape_cast %29 : vector<16x128xf32> to vector<16x1x128xf32>
      %33 = vector.broadcast %32 : vector<16x1x128xf32> to vector<16x8x128xf32>
      %34 = arith.mulf %33, %31 : vector<16x8x128xf32>
      %cst_26 = arith.constant dense<0.000000e+00> : vector<16x8xf32>
      %35 = vector.multi_reduction <add>, %34, %cst_26 [2] : vector<16x8x128xf32> to vector<16x8xf32>
      %cst_27 = arith.constant 0.176776692 : f32
      %36 = vector.broadcast %cst_27 : f32 to vector<16x8xf32>
      %37 = arith.mulf %35, %36 : vector<16x8xf32>
      %cst_28 = arith.constant dense<0xFF800000> : vector<16xf32>
      %38 = vector.multi_reduction <maximumf>, %37, %cst_28 [1] : vector<16x8xf32> to vector<16xf32>
      %39 = vector.shape_cast %38 : vector<16xf32> to vector<16x1xf32>
      %40 = vector.broadcast %39 : vector<16x1xf32> to vector<16x8xf32>
      %41 = arith.subf %37, %40 : vector<16x8xf32>
      %42 = math.exp %41 : vector<16x8xf32>
      %cst_29 = arith.constant dense<0.000000e+00> : vector<16xf32>
      %43 = vector.multi_reduction <add>, %42, %cst_29 [1] : vector<16x8xf32> to vector<16xf32>
      %44 = vector.shape_cast %43 : vector<16xf32> to vector<16x1xf32>
      %45 = vector.broadcast %44 : vector<16x1xf32> to vector<16x8xf32>
      %46 = arith.divf %42, %45 : vector<16x8xf32>
      %47 = vector.shape_cast %46 : vector<16x8xf32> to vector<16x8x1xf32>
      %48 = vector.broadcast %47 : vector<16x8x1xf32> to vector<16x8x128xf32>
      %49 = arith.mulf %48, %31 : vector<16x8x128xf32>
      %cst_30 = arith.constant dense<0.000000e+00> : vector<16x128xf32>
      %50 = vector.multi_reduction <add>, %49, %cst_30 [1] : vector<16x8x128xf32> to vector<16x128xf32>
      %cst_31 = arith.constant 0.000000e+00 : f32
      %51 = vector.broadcast %cst_31 : f32 to vector<1x16x128xf32>
      %c0_32 = arith.constant 0 : index
      %c0_33 = arith.constant 0 : index
      %c0_34 = arith.constant 0 : index
      %52 = vector.load %arg14[%c0_32, %c0_33, %c0_34] : memref<1x16x128xf32, #tpu.memory_space<vmem>>, vector<1x16x128xf32>
      tpu.vector_store %arg14[%c0_32, %c0_33, %c0_34], %51 {strides = array<i32>} : memref<1x16x128xf32, #tpu.memory_space<vmem>>, vector<1x16x128xf32>,
      %c0_35 = arith.constant 0 : index
      %c0_36 = arith.constant 0 : index
      %c0_37 = arith.constant 0 : index
      %53 = vector.load %arg14[%c0_35, %c0_36, %c0_37] : memref<1x16x128xf32, #tpu.memory_space<vmem>>, vector<1x16x8xf32>
      %54 = vector.shape_cast %53 : vector<1x16x8xf32> to vector<16x8xf32>
      %55 = vector.shape_cast %46 : vector<16x8xf32> to vector<1x16x8xf32>
      tpu.vector_store %arg14[%c0_35, %c0_36, %c0_37], %55 {strides = array<i32>} : memref<1x16x128xf32, #tpu.memory_space<vmem>>, vector<1x16x8xf32>,
      %c0_38 = arith.constant 0 : index
      %c0_39 = arith.constant 0 : index
      %56 = vector.load %arg2[%c0_38, %c0_39] : memref<16x128xf32, #tpu.memory_space<vmem>>, vector<16x128xf32>
      %57 = tpu.concatenate %56, %50, %29 in 1 : vector<16x128xf32>, vector<16x128xf32>, vector<16x128xf32> -> vector<16x384xf32>
      %58 = arith.truncf %57 : vector<16x384xf32> to vector<16x384xbf16>
      %c0_40 = arith.constant 0 : index
      %c0_41 = arith.constant 0 : index
      %59 = vector.load %arg6[%c0_40, %c0_41] : memref<384x512xbf16, #tpu.memory_space<vmem>>, vector<384x512xbf16>
      %cst_42 = arith.constant dense<0.000000e+00> : vector<16x512xf32>
      %60 = tpu.matmul %58, %59, %cst_42 {dimension_numbers = #tpu.dot_dimension_numbers<[1], [0], [0], [1], [0, 0, 1, 1], [], []>} : vector<16x384xbf16>, vector<384x512xbf16>, vector<16x512xf32> -> vector<16x512xf32>
      %c0_43 = arith.constant 0 : index
      %c0_44 = arith.constant 0 : index
      %61 = vector.load %arg7[%c0_43, %c0_44] : memref<1x512xf32, #tpu.memory_space<vmem>>, vector<1x512xf32>
      %62 = vector.broadcast %61 : vector<1x512xf32> to vector<16x512xf32>
      %63 = arith.addf %60, %62 : vector<16x512xf32>
      %64 = vector.extract_strided_slice %63 {offsets = [0, 0], sizes = [16, 128], strides = [1, 1]} : vector<16x512xf32> to vector<16x128xf32>
      %65 = arith.negf %64 : vector<16x128xf32>
      %66 = math.exp %65 : vector<16x128xf32>
      %cst_45 = arith.constant 1.000000e+00 : f32
      %67 = vector.broadcast %cst_45 : f32 to vector<16x128xf32>
      %68 = arith.addf %67, %66 : vector<16x128xf32>
      %69 = arith.divf %67, %68 : vector<16x128xf32>
      %70 = vector.extract_strided_slice %63 {offsets = [0, 128], sizes = [16, 128], strides = [1, 1]} : vector<16x512xf32> to vector<16x128xf32>
      %71 = arith.negf %70 : vector<16x128xf32>
      %72 = math.exp %71 : vector<16x128xf32>
      %cst_46 = arith.constant 1.000000e+00 : f32
      %73 = vector.broadcast %cst_46 : f32 to vector<16x128xf32>
      %74 = arith.addf %73, %72 : vector<16x128xf32>
      %75 = arith.divf %73, %74 : vector<16x128xf32>
      %76 = vector.extract_strided_slice %63 {offsets = [0, 256], sizes = [16, 128], strides = [1, 1]} : vector<16x512xf32> to vector<16x128xf32>
      %77 = math.tanh %76 : vector<16x128xf32>
      %78 = vector.extract_strided_slice %63 {offsets = [0, 384], sizes = [16, 128], strides = [1, 1]} : vector<16x512xf32> to vector<16x128xf32>
      %79 = arith.negf %78 : vector<16x128xf32>
      %80 = math.exp %79 : vector<16x128xf32>
      %cst_47 = arith.constant 1.000000e+00 : f32
      %81 = vector.broadcast %cst_47 : f32 to vector<16x128xf32>
      %82 = arith.addf %81, %80 : vector<16x128xf32>
      %83 = arith.divf %81, %82 : vector<16x128xf32>
      %84 = arith.mulf %75, %30 : vector<16x128xf32>
      %85 = arith.mulf %69, %77 : vector<16x128xf32>
      %86 = arith.addf %84, %85 : vector<16x128xf32>
      %87 = math.tanh %86 : vector<16x128xf32>
      %88 = arith.mulf %83, %87 : vector<16x128xf32>
      %c0_48 = arith.constant 0 : index
      %c0_49 = arith.constant 0 : index
      %c0_50 = arith.constant 0 : index
      %89 = vector.load %arg12[%c0_48, %c0_49, %c0_50] : memref<1x16x128xf32, #tpu.memory_space<vmem>>, vector<1x16x128xf32>
      %90 = vector.shape_cast %89 : vector<1x16x128xf32> to vector<16x128xf32>
      %91 = vector.shape_cast %88 : vector<16x128xf32> to vector<1x16x128xf32>
      tpu.vector_store %arg12[%c0_48, %c0_49, %c0_50], %91 {strides = array<i32>} : memref<1x16x128xf32, #tpu.memory_space<vmem>>, vector<1x16x128xf32>,
      %c0_51 = arith.constant 0 : index
      %c0_52 = arith.constant 0 : index
      %c0_53 = arith.constant 0 : index
      %92 = vector.load %arg13[%c0_51, %c0_52, %c0_53] : memref<1x16x128xf32, #tpu.memory_space<vmem>>, vector<1x16x128xf32>
      %93 = vector.shape_cast %92 : vector<1x16x128xf32> to vector<16x128xf32>
      %94 = vector.shape_cast %86 : vector<16x128xf32> to vector<1x16x128xf32>
      tpu.vector_store %arg13[%c0_51, %c0_52, %c0_53], %94 {strides = array<i32>} : memref<1x16x128xf32, #tpu.memory_space<vmem>>, vector<1x16x128xf32>,
      %95 = arith.truncf %88 : vector<16x128xf32> to vector<16x128xbf16>
      %c0_54 = arith.constant 0 : index
      %c0_55 = arith.constant 0 : index
      %96 = vector.load %arg15[%c0_54, %c0_55] : memref<16x128xbf16, #tpu.memory_space<vmem>>, vector<16x128xbf16>
      tpu.vector_store %arg15[%c0_54, %c0_55], %95 {strides = array<i32>} : memref<16x128xbf16, #tpu.memory_space<vmem>>, vector<16x128xbf16>,
      %cst_56 = arith.constant -1.000000e+30 : f32
      %97 = vector.broadcast %cst_56 : f32 to vector<16x1xf32>
      %c0_57 = arith.constant 0 : index
      %c0_58 = arith.constant 0 : index
      %98 = vector.load %arg16[%c0_57, %c0_58] : memref<16x1xf32, #tpu.memory_space<vmem>>, vector<16x1xf32>
      tpu.vector_store %arg16[%c0_57, %c0_58], %97 {strides = array<i32>} : memref<16x1xf32, #tpu.memory_space<vmem>>, vector<16x1xf32>,
      %cst_59 = arith.constant 0.000000e+00 : f32
      %99 = vector.broadcast %cst_59 : f32 to vector<16x1xf32>
      %c0_60 = arith.constant 0 : index
      %c0_61 = arith.constant 0 : index
      %100 = vector.load %arg17[%c0_60, %c0_61] : memref<16x1xf32, #tpu.memory_space<vmem>>, vector<16x1xf32>
      tpu.vector_store %arg17[%c0_60, %c0_61], %99 {strides = array<i32>} : memref<16x1xf32, #tpu.memory_space<vmem>>, vector<16x1xf32>,
    } else {
    }
    %c0 = arith.constant 0 : index
    %c0_1 = arith.constant 0 : index
    %3 = vector.load %arg15[%c0, %c0_1] : memref<16x128xbf16, #tpu.memory_space<vmem>>, vector<16x128xbf16>
    %c0_2 = arith.constant 0 : index
    %c0_3 = arith.constant 0 : index
    %4 = vector.load %arg8[%c0_2, %c0_3] : memref<128x512xbf16, #tpu.memory_space<vmem>>, vector<128x512xbf16>
    %cst = arith.constant dense<0.000000e+00> : vector<16x512xf32>
    %5 = tpu.matmul %3, %4, %cst {dimension_numbers = #tpu.dot_dimension_numbers<[1], [0], [0], [1], [0, 0, 1, 1], [], []>} : vector<16x128xbf16>, vector<128x512xbf16>, vector<16x512xf32> -> vector<16x512xf32>
    %c0_4 = arith.constant 0 : index
    %c0_5 = arith.constant 0 : index
    %6 = vector.load %arg9[%c0_4, %c0_5] : memref<1x512xf32, #tpu.memory_space<vmem>>, vector<1x512xf32>
    %7 = vector.broadcast %6 : vector<1x512xf32> to vector<16x512xf32>
    %8 = arith.addf %5, %7 : vector<16x512xf32>
    %c0_6 = arith.constant 0 : index
    %c0_7 = arith.constant 0 : index
    %9 = vector.load %arg10[%c0_6, %c0_7] : memref<16x512xf32, #tpu.memory_space<vmem>>, vector<16x512xf32>
    tpu.vector_store %arg10[%c0_6, %c0_7], %8 {strides = array<i32>} : memref<16x512xf32, #tpu.memory_space<vmem>>, vector<16x512xf32>,
    %c0_8 = arith.constant 0 : index
    %c0_9 = arith.constant 0 : index
    %10 = vector.load %arg16[%c0_8, %c0_9] : memref<16x1xf32, #tpu.memory_space<vmem>>, vector<16x1xf32>
    %cst_10 = arith.constant dense<0xFF800000> : vector<16xf32>
    %11 = vector.multi_reduction <maximumf>, %8, %cst_10 [1] : vector<16x512xf32> to vector<16xf32>
    %12 = vector.shape_cast %11 : vector<16xf32> to vector<16x1xf32>
    %13 = arith.maximumf %10, %12 : vector<16x1xf32>
    %c0_11 = arith.constant 0 : index
    %c0_12 = arith.constant 0 : index
    %14 = vector.load %arg17[%c0_11, %c0_12] : memref<16x1xf32, #tpu.memory_space<vmem>>, vector<16x1xf32>
    %15 = arith.subf %10, %13 : vector<16x1xf32>
    %16 = math.exp %15 : vector<16x1xf32>
    %17 = arith.mulf %14, %16 : vector<16x1xf32>
    %18 = vector.broadcast %13 : vector<16x1xf32> to vector<16x512xf32>
    %19 = arith.subf %8, %18 : vector<16x512xf32>
    %20 = math.exp %19 : vector<16x512xf32>
    %cst_13 = arith.constant dense<0.000000e+00> : vector<16xf32>
    %21 = vector.multi_reduction <add>, %20, %cst_13 [1] : vector<16x512xf32> to vector<16xf32>
    %22 = vector.shape_cast %21 : vector<16xf32> to vector<16x1xf32>
    %23 = arith.addf %17, %22 : vector<16x1xf32>
    %c0_14 = arith.constant 0 : index
    %c0_15 = arith.constant 0 : index
    %24 = vector.load %arg17[%c0_14, %c0_15] : memref<16x1xf32, #tpu.memory_space<vmem>>, vector<16x1xf32>
    tpu.vector_store %arg17[%c0_14, %c0_15], %23 {strides = array<i32>} : memref<16x1xf32, #tpu.memory_space<vmem>>, vector<16x1xf32>,
    %c0_16 = arith.constant 0 : index
    %c0_17 = arith.constant 0 : index
    %25 = vector.load %arg16[%c0_16, %c0_17] : memref<16x1xf32, #tpu.memory_space<vmem>>, vector<16x1xf32>
    tpu.vector_store %arg16[%c0_16, %c0_17], %13 {strides = array<i32>} : memref<16x1xf32, #tpu.memory_space<vmem>>, vector<16x1xf32>,
    %c2_i32 = arith.constant 2 : i32
    %26 = arith.cmpi eq, %arg1, %c2_i32 : i32
    %27 = arith.extui %26 : i1 to i32
    %c0_i32_18 = arith.constant 0 : i32
    %28 = arith.cmpi ne, %27, %c0_i32_18 : i32
    scf.if %28 {
      %c0_19 = arith.constant 0 : index
      %c0_20 = arith.constant 0 : index
      %29 = vector.load %arg16[%c0_19, %c0_20] : memref<16x1xf32, #tpu.memory_space<vmem>>, vector<16x1xf32>
      %c0_21 = arith.constant 0 : index
      %c0_22 = arith.constant 0 : index
      %30 = vector.load %arg17[%c0_21, %c0_22] : memref<16x1xf32, #tpu.memory_space<vmem>>, vector<16x1xf32>
      %31 = math.log %30 : vector<16x1xf32>
      %32 = arith.addf %29, %31 : vector<16x1xf32>
      %c0_23 = arith.constant 0 : index
      %c0_24 = arith.constant 0 : index
      %c0_25 = arith.constant 0 : index
      %33 = vector.load %arg11[%c0_23, %c0_24, %c0_25] : memref<1x16x1xf32, #tpu.memory_space<vmem>>, vector<1x16x1xf32>
      %34 = vector.shape_cast %33 : vector<1x16x1xf32> to vector<16x1xf32>
      %35 = vector.shape_cast %32 : vector<16x1xf32> to vector<1x16x1xf32>
      tpu.vector_store %arg11[%c0_23, %c0_24, %c0_25], %35 {strides = array<i32>} : memref<1x16x1xf32, #tpu.memory_space<vmem>>, vector<1x16x1xf32>,
    } else {
    }
    return
  }
  func.func @transform_0(%arg0: i32, %arg1: i32) -> (i32, i32) {
    %c0_i32 = arith.constant 0 : i32
    %c0_i32_0 = arith.constant 0 : i32
    %c0_i32_1 = arith.constant 0 : i32
    return %c0_i32, %c0_i32_0 : i32, i32
  }
  func.func @transform_1(%arg0: i32, %arg1: i32) -> (i32, i32) {
    %c0_i32 = arith.constant 0 : i32
    %c0_i32_0 = arith.constant 0 : i32
    %c0_i32_1 = arith.constant 0 : i32
    return %c0_i32, %c0_i32_0 : i32, i32
  }
  func.func @transform_2(%arg0: i32, %arg1: i32) -> (i32, i32) {
    %c0_i32 = arith.constant 0 : i32
    %c0_i32_0 = arith.constant 0 : i32
    %c0_i32_1 = arith.constant 0 : i32
    return %c0_i32, %c0_i32_0 : i32, i32
  }
  func.func @transform_3(%arg0: i32, %arg1: i32) -> (i32, i32, i32) {
    %c0_i32 = arith.constant 0 : i32
    %c0_i32_0 = arith.constant 0 : i32
    %c0_i32_1 = arith.constant 0 : i32
    %c0_i32_2 = arith.constant 0 : i32
    return %c0_i32, %c0_i32_0, %c0_i32_1 : i32, i32, i32
  }
  func.func @transform_4(%arg0: i32, %arg1: i32) -> (i32, i32) {
    %c0_i32 = arith.constant 0 : i32
    %c0_i32_0 = arith.constant 0 : i32
    %c0_i32_1 = arith.constant 0 : i32
    return %c0_i32, %c0_i32_0 : i32, i32
  }
  func.func @transform_5(%arg0: i32, %arg1: i32) -> (i32, i32) {
    %c0_i32 = arith.constant 0 : i32
    %c0_i32_0 = arith.constant 0 : i32
    %c0_i32_1 = arith.constant 0 : i32
    return %c0_i32, %c0_i32_0 : i32, i32
  }
  func.func @transform_6(%arg0: i32, %arg1: i32) -> (i32, i32) {
    %c3_i32 = arith.constant 3 : i32
    %0 = arith.muli %arg0, %c3_i32 : i32
    %1 = arith.addi %0, %arg1 : i32
    %c0_i32 = arith.constant 0 : i32
    %c0_i32_0 = arith.constant 0 : i32
    return %c0_i32, %1 : i32, i32
  }
  func.func @transform_7(%arg0: i32, %arg1: i32) -> (i32, i32) {
    %c3_i32 = arith.constant 3 : i32
    %0 = arith.muli %arg0, %c3_i32 : i32
    %1 = arith.addi %0, %arg1 : i32
    %c0_i32 = arith.constant 0 : i32
    %c0_i32_0 = arith.constant 0 : i32
    return %c0_i32, %1 : i32, i32
  }
  func.func @transform_8(%arg0: i32, %arg1: i32) -> (i32, i32) {
    %c3_i32 = arith.constant 3 : i32
    %0 = arith.muli %arg0, %c3_i32 : i32
    %1 = arith.addi %0, %arg1 : i32
    %c0_i32 = arith.constant 0 : i32
    %c0_i32_0 = arith.constant 0 : i32
    return %c0_i32, %1 : i32, i32
  }
  func.func @transform_9(%arg0: i32, %arg1: i32) -> (i32, i32, i32) {
    %c0_i32 = arith.constant 0 : i32
    %c0_i32_0 = arith.constant 0 : i32
    %c0_i32_1 = arith.constant 0 : i32
    return %arg0, %c0_i32, %c0_i32_0 : i32, i32, i32
  }
  func.func @transform_10(%arg0: i32, %arg1: i32) -> (i32, i32, i32) {
    %c0_i32 = arith.constant 0 : i32
    %c0_i32_0 = arith.constant 0 : i32
    %c0_i32_1 = arith.constant 0 : i32
    return %arg0, %c0_i32, %c0_i32_0 : i32, i32, i32
  }
  func.func @transform_11(%arg0: i32, %arg1: i32) -> (i32, i32, i32) {
    %c0_i32 = arith.constant 0 : i32
    %c0_i32_0 = arith.constant 0 : i32
    %c0_i32_1 = arith.constant 0 : i32
    return %arg0, %c0_i32, %c0_i32_0 : i32, i32, i32
  }
  func.func @transform_12(%arg0: i32, %arg1: i32) -> (i32, i32, i32) {
    %c0_i32 = arith.constant 0 : i32
    %c0_i32_0 = arith.constant 0 : i32
    %c0_i32_1 = arith.constant 0 : i32
    return %arg0, %c0_i32, %c0_i32_0 : i32, i32, i32
  }
}

</mosaic_0001>

<bundles_post_ra>
// kernel: tpu_custom_call.1
= control target key start
LH: loop header
LB: loop body
LE: loop exit
PB: predicated region body
PF: predicated region fallthrough
CT: control target
= control target key end

     0   :  { %s5981_s0 = inlined_call_operand.hbm [shape: f32[16,128], index: 0, kind: input, shape index: {}]   ;;  %s5982_s1 = inlined_call_operand.hbm [shape: f32[16,128], index: 1, kind: input, shape index: {}]   ;;  %s5983_s2 = inlined_call_operand.hbm [shape: f32[16,128], index: 2, kind: input, shape index: {}]   ;;  %s5984_s3 = inlined_call_operand.hbm [shape: f32[16,8,128], index: 3, kind: input, shape index: {}]   ;;  %s5985_s4 = inlined_call_operand.hbm [shape: bf16[384,512], index: 4, kind: input, shape index: {}]   ;;  %s5986_s5 = inlined_call_operand.vmem [shape: f32[1,512], index: 5, kind: input, shape index: {}]   ;;  %s5987_s6 = inlined_call_operand.hbm [shape: bf16[128,3072], index: 6, kind: input, shape index: {}]   ;;  %s5988_s7 = inlined_call_operand.hbm [shape: f32[1,3072], index: 7, kind: input, shape index: {}]   ;;  %s5989_s8 = inlined_call_operand.hbm [shape: f32[16,3072], index: 8, kind: output, shape index: {0}]   ;;  %s5990_s9 = inlined_call_operand.vmem [shape: f32[2,16,1], index: 9, kind: output, shape index: {1}]   ;;  %s5991_s10 = inlined_call_operand.hbm [shape: f32[2,16,128], index: 10, kind: output, shape index: {2}]   ;;  %s5992_s11 = inlined_call_operand.hbm [shape: f32[2,16,128], index: 11, kind: output, shape index: {3}]   ;;  %s5993_s12 = inlined_call_operand.hbm [shape: f32[2,16,128], index: 12, kind: output, shape index: {4}]  }
   0x1   :  { %6030 = sst [smem:[#allocation47_spill]] %s5981_s0 }
   0x2   :  { %6031 = sst [smem:[#allocation48_spill]] %s5982_s1 }
   0x3   :  { %6032 = sst [smem:[#allocation49_spill]] %s5983_s2 }
   0x4   :  { %6033 = sst [smem:[#allocation50_spill]] %s5984_s3 }
   0x5   :  { %6034 = sst [smem:[#allocation51_spill]] %s5985_s4 }
   0x6   :  { %6035 = sst [smem:[#allocation52_spill]] %s5986_s5 }
   0x7   :  { %6036 = sst [smem:[#allocation53_spill]] %s5987_s6 }
   0x8   :  { %6037 = sst [smem:[#allocation54_spill]] %s5988_s7 }
   0x9   :  { %6038 = sst [smem:[#allocation55_spill]] %s5989_s8 }
   0xa   :  { %6039 = sst [smem:[#allocation56_spill]] %s5990_s9 }
   0xb   :  { %6040 = sst [smem:[#allocation57_spill]] %s5991_s10 }
   0xc   :  { %6041 = sst [smem:[#allocation58_spill]] %s5992_s11 }
   0xd   :  { %6042 = sst [smem:[#allocation59_spill]] %s5993_s12 }
   0xe   :  { %18 = vsyncpa [#allocation6], 0 }
   0xf   :  { %19 = vsyncpa [#allocation9], 0 }
  0x10   :  { %20 = vsyncpa [#allocation12], 0 }
  0x11   :  { %21 = vsyncpa [#allocation15], 0 }
  0x12   :  { %23 = vsyncpa [#allocation15 + $0x1], 0 }
  0x13   :  { %24 = vsyncpa [#allocation7], 0 }
  0x14   :  { %26 = vsyncpa [#allocation7 + $0x1], 0 }
  0x15   :  { %27 = vsyncpa [#allocation19], 0 }
  0x16   :  { %29 = vsyncpa [#allocation19 + $0x1], 0 }
  0x17   :  { %30 = vsyncpa [#allocation22], 0 }
  0x18   :  { %32 = vsyncpa [#allocation22 + $0x1], 0  ;;  %s4742_s21 = smov 0   ;;  %s4744_s22 = smov 0  }
  0x19   :  { %s4746_s23 = smov 0   ;;  %s4748_s24 = smov 0  }
  0x1a   :  { %s4750_s25 = smov 0   ;;  %s4752_s26 = smov 0  }
  0x1b   :  { %s4754_s27 = smov 0   ;;  %s4756_s28 = smov 0  }
  0x1c   :  { %s4758_s29 = smov 0   ;;  %s4760_s30 = smov 0  }
  0x1d   :  { %s4762_s13 = smov 0  }
  0x1e LB: > { %6043 = sst [smem:[#allocation30_spill]] %s4616_s21  ;;  %s4798_s14 = sadd.s32 4294967295, %s4656_s13   ;;  %s4656_s13 = sphi %s4762_s13, %s38_s13   ;;  %s4652_s30 = sphi %s4760_s30, %s6137_s30   ;;  %s4648_s29 = sphi %s4758_s29, %s6136_s29   ;;  %s4644_s28 = sphi %s4756_s28, %s6135_s28   ;;  %s4640_s27 = sphi %s4754_s27, %s6134_s27   ;;  %s4636_s26 = sphi %s4752_s26, %s6133_s26   ;;  %s4632_s25 = sphi %s4750_s25, %s6132_s25   ;;  %s4628_s24 = sphi %s4748_s24, %s6131_s24   ;;  %s4624_s23 = sphi %s4746_s23, %s6139_s23   ;;  %s4620_s22 = sphi %s4744_s22, %s6138_s22   ;;  %s4616_s21 = sphi %s4742_s21, %s6130_s21  }
  0x1f   : > { %6044 = sst [smem:[#allocation31_spill]] %s4620_s22  ;;  %s5994_s15 = sadd.s32 4294967294, %s4656_s13  }
  0x20   : > { %6045 = sst [smem:[#allocation32_spill]] %s4628_s24  ;;  %p200_p0 = scmp.ne.s32.totalorder %s4632_s25, %s4628_s24 }
  0x21   : > { %6046 = sst [smem:[#allocation33_spill]] %s4632_s25  ;;  %p6005_p1 = scmp.eq.s32.totalorder %s4798_s14, 0 }
  0x22   : > { %6047 = sst [smem:[#allocation34_spill]] %s4636_s26  ;;  %p258_p2 = scmp.eq.s32.totalorder %s4798_s14, 5 }
  0x23   : > { %6048 = sst [smem:[#allocation35_spill]] %s4640_s27  ;;  %p264_p3 = scmp.eq.s32.totalorder %s5994_s15, 5 }
  0x24   : > { %6049 = sst [smem:[#allocation36_spill]] %s4644_s28  ;;  %p4809_p4 = por %p6005_p1, %p200_p0 }
  0x25   : > { %6050 = sst [smem:[#allocation37_spill]] %s4648_s29  ;;  %p309_p5 = scmp.ne.s32.totalorder %s4624_s23, %s4620_s22 }
  0x26   : > { %6051 = sst [smem:[#allocation38_spill]] %s4652_s30  ;;  %p4815_p6 = por %p264_p3, %p200_p0 }
  0x27   : > { %s6052_s16 = scalar_select %p4809_p4, 1, 0 }
  0x28   : > { %s6054_s17 = scalar_select %p4815_p6, 1, 0 }
  0x29   : > { %6053 = sst [smem:[#allocation39_spill]] %s6052_s16  ;;  %p315_p7 = scmp.ne.s32.totalorder %s4620_s22, %s4616_s21 }
  0x2a   : > { %6055 = sst [smem:[#allocation40_spill]] %s6054_s17  ;;  %p4823_p8 = por %p309_p5, %p258_p2 }
  0x2b   : > { %p3186_p9 = scmp.ge.s32.totalorder %s4656_s13, 1  ;;  %p4828_p10 = por %p315_p7, %p264_p3 }
  0x2c   : > { %s6056_s18 = scalar_select %p4823_p8, 1, 0 }
  0x2d   : > { %s6058_s19 = scalar_select %p4828_p10, 1, 0 }
  0x2e   : > { %6057 = sst [smem:[#allocation41_spill]] %s6056_s18  ;;  %p375_p11 = scmp.lt.s32.totalorder %s4656_s13, 7 }
  0x2f   : > { %6059 = sst [smem:[#allocation42_spill]] %s6058_s19  ;;  %s4658_s17 = smov [#allocation8]  }
  0x30   : > { %p4833_p12 = pnand %p3186_p9, %p375_p11  ;;  %s6061_s1 = sld [smem:[#allocation48_spill]] }
  0x31   : > { %s402_s12 = sshll.u32 %s4658_s17, 4  ;;  %s6063_s3 = sld [smem:[#allocation50_spill]]  ;;  %s403_s12 = int_to_ptr.vmem [resolvable:$true] %s402_s12 }
  0x32   : > { %p3922_p13 = pneg %p4833_p12  ;;  %s6006_s11 = smov 128  }
  0x33   : > { %s6008_s17 = smov 8   ;;  %s4661_s8 = smov [#allocation11]  }
  0x34   : > { %p4844_p0 = pnand %p3922_p13, %p6005_p1  ;;  %s430_s10 = sshll.u32 %s4661_s8, 4  ;;  %s431_s10 = int_to_ptr.vmem [resolvable:$true] %s430_s10 }
  0x35   : > { %s47_s24 = sadd.s32 1, %s4648_s29  ;;  %s50_s15 = sadd.s32 1, %s4652_s30 }
  0x36   : > { %s400_s21 = sshll.u32 %s6061_s1, 4  ;;  %p48_p3 = scmp.ge.s32.totalorder %s47_s24, 3  ;;  %s401_s21 = int_to_ptr.hbm [resolvable:$true] %s400_s21 }
  0x37   : > { %s428_s1 = sshll.u32 %s6063_s3, 4  ;;  %s180_s3 = smul.u32 3, %s4652_s30  ;;  %s429_s1 = int_to_ptr.hbm [resolvable:$true] %s428_s1 }
  0x38   : > { %3928 = dma.hbm_to_vmem [thread:$0]  (!%p4844_p0), %s401_s21, 256, %s403_s12, [#allocation9], %s6006_s11, %s6006_s11, %s6008_s17  }
  0x39   : > { %3934 = dma.hbm_to_vmem [thread:$0]  (!%p4844_p0), %s429_s1, 2048, %s431_s10, [#allocation12], %s6006_s11, %s6006_s11, %s6008_s17  }
  0x3a   : > { %s187_s18 = sadd.s32 1, %s4636_s26  ;;  %p194_p5 = scmp.ne.s32.totalorder %s4636_s26, %s4632_s25 }
  0x3b   : > { %s6141_s24 = smov (%p48_p3, %s47_s24), 0  ;;  %s6143_s15 = smov (!%p48_p3, %s50_s15), %s4652_s30 }
  0x3c   : > { %6064 = sst [smem:[#allocation43_spill]] %s6141_s24  ;;  %s4871_s8 = sadd.s32 %s4648_s29, %s180_s3 }
  0x3d   : > { %p195_p7 = scmp.eq.s32.totalorder %s4656_s13, 0  ;;  %p52_p9 = scmp.ge.s32.totalorder %s6143_s15, 2 }
  0x3e   : > { %p4876_p11 = por %p258_p2, %p194_p5  ;;  %s299_s12 = sadd.s32 1, %s4624_s23 }
  0x3f   : > { %p4880_p13 = por %p195_p7, %p194_p5  ;;  %s6145_s15 = smov (%p52_p9, %s6143_s15), 0 }
  0x40   : > { %s6065_s1 = scalar_select %p4876_p11, 1, 0 }
  0x41   : > { %6068 = sst [smem:[#allocation45_spill]] %s6145_s15  ;;  %s182_s3 = smul.u32 3, %s6145_s15 }
  0x42   : > { %6066 = sst [smem:[#allocation44_spill]] %s6065_s1  ;;  %s296_s21 = ssub.s32 %s4652_s30, %s6145_s15 }
  0x43   : > { %p297_p3 = scmp.eq.s32.totalorder %s296_s21, 0  ;;  %p3963_p1 = scmp.lt.s32.totalorder %s4656_s13, 6 }
  0x44   : > { %s183_s11 = sadd.s32 %s182_s3, %s6141_s24  ;;  %s461_s17 = sand.u32 1, %s4656_s13  }
  0x45   : > { %s184_s29 = ssub.s32 %s4871_s8, %s183_s11  ;;  %s6022_s1 = sand.u32 1, %s4636_s26  }
  0x46   : > { %p185_p2 = scmp.eq.s32.totalorder %s184_s29, 0  ;;  %s3193_s9 = sshll.u32 %s6022_s1, 8 }
  0x47   : > { %s4896_s5 = scalar_select %p297_p3, %s4624_s23, %s299_s12  }
  0x48   : > { %s4899_s27 = scalar_select %p185_p2, %s4636_s26, %s187_s18  }
  0x49   : > { %s3750_s28 = sshll.u32 %s4871_s8, 4  ;;  %s6070_s6 = sld [smem:[#allocation53_spill]] }
  0x4a   : > { %6069 = sst [smem:[#allocation46_spill]] %s4899_s27  ;;  %s465_s30 = scalar_lea.vmem [#allocation14], %s3193_s9 }
  0x4b   : > { %s475_s25 = sshll.u32 %s465_s30, 4  ;;  %p4911_p5 = pnand %p3963_p1, %p4880_p13  ;;  %s476_s25 = int_to_ptr.vmem [resolvable:$true] %s475_s25 }
  0x4c   : > { %s4915_s29 = scalar_lea.sflag [#allocation15], %s461_s17  ;;  %s4662_s18 = smov 1536  }
  0x4d   : > { %s4663_s12 = smov 256   ;;  %s4664_s22 = smov 16  }
  0x4e   : > { %s6072_s0 = sld [smem:[#allocation47_spill]]  ;;  %s4665_s16 = smov [#allocation5]  }
  0x4f   : > { %s472_s15 = scalar_lea.hbm %s6070_s6, %s3750_s28  ;;  %s6073_s2 = sld [smem:[#allocation49_spill]] }
  0x50   : > { %s473_s21 = sshll.u32 %s472_s15, 4  ;;  %s388_s15 = sshll.u32 %s4665_s16, 4  ;;  %s474_s21 = int_to_ptr.hbm [resolvable:$true] %s473_s21  ;;  %s389_s15 = int_to_ptr.vmem [resolvable:$true] %s388_s15 }
  0x51   : > { %3941 = dma.hbm_to_vmem [thread:$0]  (!%p4911_p5), %s474_s21, 4096, %s476_s25, %s4915_s29, %s4662_s18, %s4663_s12, %s4664_s22  }
  0x52   : > { %s6074_s1 = smov 8   ;;  %s6075_s6 = smov 128  }
  0x53   : > { %s6076_s4 = sld [smem:[#allocation51_spill]]  ;;  %s4666_s9 = smov [#allocation10]  }
  0x54   : > { %s386_s30 = sshll.u32 %s6072_s0, 4  ;;  %s416_s28 = sshll.u32 %s4666_s9, 4  ;;  %s387_s30 = int_to_ptr.hbm [resolvable:$true] %s386_s30  ;;  %s417_s28 = int_to_ptr.vmem [resolvable:$true] %s416_s28 }
  0x55   : > { %s414_s17 = sshll.u32 %s6073_s2, 4  ;;  %s4667_s16 = smov [#allocation13]   ;;  %s415_s17 = int_to_ptr.hbm [resolvable:$true] %s414_s17 }
  0x56   : > { %3925 = dma.hbm_to_vmem [thread:$0]  (!%p4844_p0), %s387_s30, 256, %s389_s15, [#allocation6], %s6075_s6, %s6075_s6, %s6074_s1  }
  0x57   : > { %3931 = dma.hbm_to_vmem [thread:$0]  (!%p4844_p0), %s415_s17, 256, %s417_s28, [#allocation9], %s6075_s6, %s6075_s6, %s6074_s1  }
  0x58   : > { %s444_s10 = sshll.u32 %s4667_s16, 4  ;;  %s6077_s3 = sand.u32 1, %s4636_s26   ;;  %s445_s10 = int_to_ptr.vmem [resolvable:$true] %s444_s10 }
  0x59   : > { %s442_s18 = sshll.u32 %s6076_s4, 4  ;;  %s3196_s0 = sshll.u32 %s6077_s3, 2  ;;  %s443_s18 = int_to_ptr.hbm [resolvable:$true] %s442_s18 }
  0x5a   : > { %3937 = dma.hbm_to_vmem [thread:$0]  (!%p4844_p0), %s443_s18, 12288, %s445_s10, [#allocation12], %s4663_s12, %s4663_s12, %s4664_s22  }
  0x5b   : > { %s3197_s30 = sshll.u32 %s4871_s8, 2  ;;  %s489_s15 = scalar_lea.vmem [#allocation16], %s3196_s0 }
  0x5c   : > { %s499_s25 = sshll.u32 %s489_s15, 4  ;;  %s6078_s7 = sld [smem:[#allocation54_spill]]  ;;  %s500_s25 = int_to_ptr.vmem [resolvable:$true] %s499_s25 }
  0x5d   : > { %p6079_p1 = scmp.eq.s32.totalorder (!%p4833_p12), %s4798_s14, 0 }
  0x60   : > { %508 = sbr.rel (%p4833_p12) target bundleno = 1768 (0x6e8), region = 52 }
  0x62   : > { %s495_s2 = scalar_lea.hbm %s6078_s7, %s3197_s30 }
  0x63   : > { %s497_s4 = sshll.u32 %s495_s2, 4  ;;  %s498_s4 = int_to_ptr.hbm [resolvable:$true] %s497_s4 }
  0x64   : > { %3944 = dma.hbm_to_vmem [thread:$0]  (!%p4911_p5), %s498_s4, 64, %s500_s25, %s4915_s29  }
  0x65   : > { %4587 = dma.done.wait (%p6079_p1), [#allocation6], 256   ;;  %p6080_p0 = pmov %p6079_p1 }
  0x67   : > { %4589 = vsyncadd (%p6080_p0), [#allocation6], 4294967040  ;;  %p6081_p7 = pmov %p6080_p0 }
  0x68   : > { %p6082_p9 = pmov %p6080_p0 }
  0x69   : > { %4591 = dma.done.wait (%p6081_p7), [#allocation9], 512  }
  0x6a   : > { %4593 = vsyncadd (%p6082_p9), [#allocation9], 4294966784  ;;  %p6083_p13 = pmov %p6080_p0 }
  0x6b   : > { %p6084_p3 = pmov %p6080_p0 }
  0x6c   : > { %4595 = dma.done.wait (%p6083_p13), [#allocation12], 14336  }
  0x6d   : > { %4597 = vsyncadd (%p6084_p3), [#allocation12], 4294952960  ;;  %s6085_s0 = sld [smem:[#allocation33_spill]]  ;;  %s535_s4 = sand.u32 1, %s4798_s14  }
  0x6e   : > { %s536_s20 = scalar_lea.sflag [#allocation15], %s535_s4 }
  0x73   : > { %s4966_s6 = sand.u32 1, %s6085_s0  }
  0x74   : > { %s3204_s19 = sshll.u32 %s4966_s6, 8 }
  0x75   : > { %s4971_s8 = scalar_lea.vmem [#allocation14], %s3204_s19 }
  0x76   : > { %4599 = dma.done.wait (%p4809_p4), %s536_s20, 4160  }
  0x77   : > { %4601 = vsyncadd (%p4809_p4), %s536_s20, 4294963136  ;;  %s6087_s1 = sld [smem:[#allocation31_spill]]  ;;  %s3205_s29 = sshll.u32 %s4966_s6, 2 }
  0x78   : > { %s6088_s11 = sld [smem:[#allocation36_spill]]  ;;  %s3206_s12 = sshll.u32 %s4966_s6, 6 }
  0x79   : > { %s6089_s10 = sld [smem:[#allocation56_spill]]  ;;  %s4989_s30 = scalar_lea.vmem [#allocation16], %s3205_s29 }
  0x7a   : > { %s4991_s15 = scalar_lea.vmem [#allocation17], %s3206_s12  ;;  %s6090_s0 = sld [smem:[#allocation35_spill]] }
  0x7d   : > { %s6026_s22 = sand.u32 1, %s6087_s1  }
  0x7e   : > { %p625_p12 = scmp.lt.s32.totalorder %s6088_s11, 1  ;;  %s3207_s17 = sshll.u32 %s6026_s22, 4 }
  0x7f   : > { %s4993_s25 = scalar_lea.vmem [#allocation18], %s3207_s17  ;;  %s4995_s21 = scalar_lea.vmem [#allocation20], %s3207_s17 }
  0x80   : > { %s6147_s11 = smov (!%p625_p12, %s6088_s11), 1  ;;  %s4997_s9 = scalar_lea.vmem [#allocation21], %s3207_s17 }
  0x81   : > { %s3751_s18 = sshll.u32 %s6147_s11, 4  ;;  %p3212_p4 = scmp.ne.s32.totalorder %s6090_s0, 0 }
  0x82   : > { %s4987_s3 = scalar_lea.vmem %s6089_s10, %s3751_s18  ;;  %s6109_s20 = sld [smem:[#allocation52_spill]] (!%p3212_p4) }
  0x83   : > { %633 = sbr.rel (%p3212_p4) target bundleno = 1126 (0x466), region = 84 }
  0x88   : > { %v5000_v0 = vld [vmem:[#allocation8 + $0x8] sm:$0xff]  ;;  %v646_v1 = vld [vmem:[#allocation11 + $0x40] sm:$0xff]  ;;  %v640_v7 = vld [vmem:[#allocation11 + $0x10] sm:$0xff]  ;;  %vm800_vm0 = vcmask 1041409   ;;  %vm802_vm1 = vcmask 1042434   ;;  %vm804_vm2 = vcmask 1043459  }
  0x89   : > { %v5002_v2 = vld [vmem:[#allocation8] sm:$0xff]  ;;  %v678_v3 = vperm.slane %v5000_v0, 0  ;;  %v663_v8 = vrot.slane %v5000_v0, 1  ;;  %v664_v13 = vrot.slane %v5000_v0, 2  ;;  %v647_v17 = vld [vmem:[#allocation11 + $0x48] sm:$0xff]  ;;  %v648_v20 = vld [vmem:[#allocation11 + $0x50] sm:$0xff] }
  0x8a   : > { %v638_v4 = vld [vmem:[#allocation11] sm:$0xff]  ;;  %v670_v5 = vperm.slane %v5002_v2, 0  ;;  %v657_v6 = vrot.slane %v5002_v2, 2  ;;  %v656_v9 = vrot.slane %v5002_v2, 1  ;;  %v639_v18 = vld [vmem:[#allocation11 + $0x8] sm:$0xff]  ;;  %v665_v23 = vrot.slane %v5000_v0, 3 }
  0x8b   : > { %v710_v10 = vmul.f32 %v678_v3, %v646_v1  ;;  %v679_v15 = vperm.slane %v663_v8, 0  ;;  %v680_v19 = vperm.slane %v664_v13, 0  ;;  %v658_v24 = vrot.slane %v5002_v2, 3  ;;  %v649_v29 = vld [vmem:[#allocation11 + $0x58] sm:$0xff]  ;;  %v642_v32 = vld [vmem:[#allocation11 + $0x20] sm:$0xff]  ;;  %v643_v41 = vld [vmem:[#allocation11 + $0x28] sm:$0xff] }
  0x8c   : > { %v702_v11 = vmul.f32 %v670_v5, %v638_v4  ;;  %v672_v12 = vperm.slane %v657_v6, 0  ;;  %v671_v16 = vperm.slane %v656_v9, 0  ;;  %v659_v26 = vrot.slane %v5002_v2, 4  ;;  %v641_v30 = vld [vmem:[#allocation11 + $0x18] sm:$0xff]  ;;  %v650_v42 = vld [vmem:[#allocation11 + $0x60] sm:$0xff]  ;;  %v651_v44 = vld [vmem:[#allocation11 + $0x68] sm:$0xff] }
  0x8d   : > { %734 = vadd.xlane.f32.xlu1 %v710_v10  ;;  %v711_v21 = vmul.f32 %v679_v15, %v647_v17  ;;  %v712_v25 = vmul.f32 %v680_v19, %v648_v20  ;;  %v681_v27 = vperm.slane %v665_v23, 0  ;;  %v673_v28 = vperm.slane %v658_v24, 0  ;;  %v652_v53 = vld [vmem:[#allocation11 + $0x70] sm:$0xff]  ;;  %v645_v56 = vld [vmem:[#allocation11 + $0x38] sm:$0xff] }
  0x8e   : > { %718 = vadd.xlane.f32.xlu0 %v702_v11  ;;  %v704_v14 = vmul.f32 %v672_v12, %v640_v7  ;;  %v703_v22 = vmul.f32 %v671_v16, %v639_v18  ;;  %v674_v31 = vperm.slane %v659_v26, 0  ;;  %v660_v35 = vrot.slane %v5002_v2, 5  ;;  %v644_v54 = vld [vmem:[#allocation11 + $0x30] sm:$0xff]  ;;  %v653_v62 = vld [vmem:[#allocation11 + $0x78] sm:$0xff] }
  0x8f   : > { %v713_v33 = vmul.f32 %v681_v27, %v649_v29  ;;  %v705_v34 = vmul.f32 %v673_v28, %v641_v30  ;;  %v666_v36 = vrot.slane %v5000_v0, 4  ;;  %v667_v38 = vrot.slane %v5000_v0, 5 }
  0x90   : > { %722 = vadd.xlane.f32.xlu2 %v704_v14  ;;  %v706_v37 = vmul.f32 %v674_v31, %v642_v32  ;;  %v675_v39 = vperm.slane %v660_v35, 0  ;;  %v668_v47 = vrot.slane %v5000_v0, 6  ;;  %v661_v48 = vrot.slane %v5002_v2, 6 }
  0x91   : > { %v682_v40 = vperm.slane %v666_v36, 0  ;;  %v683_v43 = vperm.slane %v667_v38, 0  ;;  %v662_v50 = vrot.slane %v5002_v2, 7  ;;  %v669_v59 = vrot.slane %v5000_v0, 7 }
  0x92   : > { %v707_v45 = vmul.f32 %v675_v39, %v643_v41  ;;  %v684_v51 = vperm.slane %v668_v47, 0  ;;  %v676_v52 = vperm.slane %v661_v48, 0  ;;  %v782_v9 = vlaneseq }
  0x93   : > { %v714_v46 = vmul.f32 %v682_v40, %v650_v42  ;;  %v715_v49 = vmul.f32 %v683_v43, %v651_v44  ;;  %v677_v55 = vperm.slane %v662_v50, 0  ;;  %v685_v61 = vperm.slane %v669_v59, 0 }
  0x94   : > { %v716_v57 = vmul.f32 %v684_v51, %v652_v53  ;;  %v708_v58 = vmul.f32 %v676_v52, %v644_v54  ;;  %v5022_v0 = vand.u32 127, %v782_v9  ;;  %vm806_vm3 = vcmask 1044484  }
  0x95   : > { %736 = vadd.xlane.f32.xlu1 %v711_v21  ;;  %v709_v60 = vmul.f32 %v677_v55, %v645_v56  ;;  %v717_v63 = vmul.f32 %v685_v61, %v653_v62  ;;  %vm808_vm4 = vcmask 1045509   ;;  %vm6025_vm5 = vcmask 1046534  }
  0x96   : > { %720 = vadd.xlane.f32.xlu0 %v703_v22  ;;  %vm6024_vm6 = vcmask 1047559   ;;  %vm6023_vm7 = vcmask 64512  }
  0x98   : > { %738 = vadd.xlane.f32.xlu2 %v712_v25 }
  0x9d   : > { %740 = vadd.xlane.f32.xlu1 %v713_v33 }
  0x9e   : > { %724 = vadd.xlane.f32.xlu0 %v705_v34 }
  0xa0   : > { %726 = vadd.xlane.f32.xlu2 %v706_v37 }
  0xa5   : > { %728 = vadd.xlane.f32.xlu1 %v707_v45 }
  0xa6   : > { %742 = vadd.xlane.f32.xlu0 %v714_v46 }
  0xa8   : > { %744 = vadd.xlane.f32.xlu2 %v715_v49 }
  0xad   : > { %746 = vadd.xlane.f32.xlu1 %v716_v57 }
  0xae   : > { %730 = vadd.xlane.f32.xlu0 %v708_v58 }
  0xb0   : > { %732 = vadd.xlane.f32.xlu2 %v709_v60 }
  0xb6   : > { %748 = vadd.xlane.f32.xlu0 %v717_v63 }
 0x100   : > { %v735_v1 = vpop.xlane.xlu1 %734 }
 0x101   : > { %v719_v2 = vpop.xlane.xlu0 %718  ;;  %v5032_v18 = vmul.f32 0.17677669, %v735_v1 }
 0x102   : > { %v5024_v12 = vmul.f32 0.17677669, %v719_v2 }
 0x103   : > { %v723_v3 = vpop.xlane.xlu2 %722  ;;  %v792_v27 = vperm.slane %v5032_v18, %v5022_v0 }
 0x104   : > { %v5030_v17 = vmul.f32 0.17677669, %v723_v3  ;;  %v784_v19 = vperm.slane %v5024_v12, %v5022_v0  ;;  %v4668_v3 = vmov 0  }
 0x105   : > { %4078 = vset.pattern.permute.xlu1 %v4668_v3  ;;  %4077 = vset.pattern.permute.xlu0 %v4668_v3 }
 0x106   : > { %v786_v26 = vperm.slane %v5030_v17, %v5022_v0  ;;  %4079 = vset.pattern.permute.xlu2 %v4668_v3 }
 0x108   : > { %v737_v4 = vpop.xlane.xlu1 %736 }
 0x109   : > { %v721_v5 = vpop.xlane.xlu0 %720  ;;  %v5036_v20 = vmul.f32 0.17677669, %v737_v4 }
 0x10a   : > { %v5020_v11 = vmul.f32 0.17677669, %v721_v5 }
 0x10b   : > { %v739_v6 = vpop.xlane.xlu2 %738  ;;  %v793_v28 = vperm.slane %v5036_v20, %v5022_v0 }
 0x10c   : > { %v785_v13 = vperm.slane %v5020_v11, %v5022_v0  ;;  %v5051_v29 = vmul.f32 0.17677669, %v739_v6 }
 0x10d   : > { %v814_v39 = vsel %vm800_vm0, %v793_v28, %v792_v27 }
 0x10e   : > { %v801_v23 = vsel %vm800_vm0, %v785_v13, %v784_v19  ;;  %v794_v40 = vperm.slane %v5051_v29, %v5022_v0 }
 0x10f   : > { %v803_v31 = vsel %vm802_vm1, %v786_v26, %v801_v23 }
 0x110   : > { %v741_v7 = vpop.xlane.xlu1 %740  ;;  %v815_v52 = vsel %vm802_vm1, %v794_v40, %v814_v39 }
 0x111   : > { %v725_v8 = vpop.xlane.xlu0 %724  ;;  %v761_v30 = vmul.f32 0.17677669, %v741_v7 }
 0x112   : > { %v5028_v14 = vmul.f32 0.17677669, %v725_v8 }
 0x113   : > { %v727_v10 = vpop.xlane.xlu2 %726  ;;  %v795_v41 = vperm.slane %v761_v30, %v5022_v0 }
 0x114   : > { %v5038_v22 = vmul.f32 0.17677669, %v727_v10  ;;  %v787_v24 = vperm.slane %v5028_v14, %v5022_v0 }
 0x115   : > { %v816_v53 = vsel %vm804_vm2, %v795_v41, %v815_v52 }
 0x116   : > { %v788_v32 = vperm.slane %v5038_v22, %v5022_v0  ;;  %v805_v33 = vsel %vm804_vm2, %v787_v24, %v803_v31 }
 0x118   : > { %v729_v15 = vpop.xlane.xlu1 %728  ;;  %v807_v43 = vsel %vm806_vm3, %v788_v32, %v805_v33 }
 0x119   : > { %v743_v16 = vpop.xlane.xlu0 %742  ;;  %v5043_v25 = vmul.f32 0.17677669, %v729_v15 }
 0x11a   : > { %v5059_v35 = vmul.f32 0.17677669, %v743_v16 }
 0x11b   : > { %v745_v21 = vpop.xlane.xlu2 %744  ;;  %v789_v34 = vperm.slane %v5043_v25, %v5022_v0 }
 0x11c   : > { %v5068_v44 = vmul.f32 0.17677669, %v745_v21  ;;  %v796_v47 = vperm.slane %v5059_v35, %v5022_v0 }
 0x11d   : > { %v809_v49 = vsel %vm808_vm4, %v789_v34, %v807_v43 }
 0x11e   : > { %v797_v54 = vperm.slane %v5068_v44, %v5022_v0  ;;  %v817_v56 = vsel %vm806_vm3, %v796_v47, %v816_v53 }
 0x120   : > { %v747_v37 = vpop.xlane.xlu1 %746  ;;  %v818_v62 = vsel %vm808_vm4, %v797_v54, %v817_v56 }
 0x121   : > { %v731_v36 = vpop.xlane.xlu0 %730  ;;  %v5076_v48 = vmul.f32 0.17677669, %v747_v37 }
 0x122   : > { %v5061_v38 = vmul.f32 0.17677669, %v731_v36 }
 0x123   : > { %v733_v42 = vpop.xlane.xlu2 %732  ;;  %v798_v57 = vperm.slane %v5076_v48, %v5022_v0 }
 0x124   : > { %v790_v45 = vperm.slane %v5061_v38, %v5022_v0  ;;  %v5072_v46 = vmul.f32 0.17677669, %v733_v42 }
 0x125   : > { %v819_v63 = vsel %vm6025_vm5, %v798_v57, %v818_v62 }
 0x126   : > { %v791_v50 = vperm.slane %v5072_v46, %v5022_v0  ;;  %v811_v51 = vsel %vm6025_vm5, %v790_v45, %v809_v49 }
 0x128   : > { %v813_v55 = vsel %vm6024_vm6, %v791_v50, %v811_v51 }
 0x129   : > { %v749_v58 = vpop.xlane.xlu0 %748  ;;  %v824_v59 = vsel %vm6023_vm7, %v813_v55, -inf }
 0x12a   : > { %v5091_v60 = vmul.f32 0.17677669, %v749_v58  ;;  %825 = vmax.xlane.f32.xlu1 %v824_v59 }
 0x12c   : > { %v799_v61 = vperm.slane %v5091_v60, %v5022_v0 }
 0x12e   : > { %v820_v1 = vsel %vm6024_vm6, %v799_v61, %v819_v63 }
 0x12f   : > { %v827_v2 = vsel %vm6023_vm7, %v820_v1, -inf }
 0x130   : > { %828 = vmax.xlane.f32.xlu2 %v827_v2 }
 0x19d   : > { %v5099_v4 = vpop.xlane.xlu1 %825 }
 0x19e   : > { %v833_v5 = vperm.slane %v5099_v4, 1  ;;  %v832_v6 = vperm.slane %v5099_v4, 0  ;;  %v834_v9 = vperm.slane %v5099_v4, 2  ;;  %v835_v27 = vperm.slane %v5099_v4, 3 }
 0x19f   : > { %v837_v31 = vperm.slane %v5099_v4, 5  ;;  %v836_v49 = vperm.slane %v5099_v4, 4  ;;  %v839_v1 = vperm.slane %v5099_v4, 7 }
 0x1a0   : > { %v865_v7 = vsub.f32 %v5020_v11, %v833_v5  ;;  %v864_v8 = vsub.f32 %v5024_v12, %v832_v6  ;;  %v866_v19 = vsub.f32 %v5030_v17, %v834_v9 }
 0x1a1   : > { %v868_v54 = vsub.f32 %v5038_v22, %v836_v49 }
 0x1a2   : > { %v882_v10 = vmul.f32 1.442695, %v865_v7  ;;  %v880_v13 = vmul.f32 1.442695, %v864_v8  ;;  %v884_v26 = vmul.f32 1.442695, %v866_v19 }
 0x1a3   : > { %v5106_v15 = vpop.xlane.xlu2 %828  ;;  %v888_v55 = vmul.f32 1.442695, %v868_v54 }
 0x1a4   : > { %4080 = vpow2.f32 %v882_v10  ;;  %v840_v16 = vperm.slane %v5106_v15, 0  ;;  %v843_v21 = vperm.slane %v5106_v15, 3  ;;  %v841_v11 = vperm.slane %v5106_v15, 1 }
 0x1a5   : > { %4082 = vpow2.f32 %v880_v13  ;;  %v842_v36 = vperm.slane %v5106_v15, 2  ;;  %v846_v41 = vperm.slane %v5106_v15, 6  ;;  %v845_v56 = vperm.slane %v5106_v15, 5 }
 0x1a6   : > { %v872_v23 = vsub.f32 %v5032_v18, %v840_v16  ;;  %v875_v24 = vsub.f32 %v761_v30, %v843_v21  ;;  %v873_v17 = vsub.f32 %v5036_v20, %v841_v11  ;;  %v867_v18 = vsub.f32 %v5028_v14, %v835_v27 }
 0x1a7   : > { %v869_v30 = vsub.f32 %v5043_v25, %v837_v31  ;;  %v844_v20 = vperm.slane %v5106_v15, 4  ;;  %v874_v14 = vsub.f32 %v5051_v29, %v842_v36  ;;  %v878_v45 = vsub.f32 %v5076_v48, %v846_v41 }
 0x1a8   : > { %v896_v12 = vmul.f32 1.442695, %v872_v23  ;;  %v902_v28 = vmul.f32 1.442695, %v875_v24  ;;  %v898_v34 = vmul.f32 1.442695, %v873_v17  ;;  %v877_v61 = vsub.f32 %v5068_v44, %v845_v56 }
 0x1a9   : > { %v886_v39 = vmul.f32 1.442695, %v867_v18  ;;  %v890_v40 = vmul.f32 1.442695, %v869_v30  ;;  %v876_v25 = vsub.f32 %v5059_v35, %v844_v20  ;;  %v900_v47 = vmul.f32 1.442695, %v874_v14 }
 0x1aa   : > { %v5115_v32 = vpop.eup %4080  ;;  %4084 = vpow2.f32 %v896_v12  ;;  %v838_v29 = vperm.slane %v5099_v4, 6  ;;  %v908_v52 = vmul.f32 1.442695, %v878_v45  ;;  %v847_v59 = vperm.slane %v5106_v15, 7 }
 0x1ab   : > { %v5118_v33 = vpop.eup %4082  ;;  %932 = vperm.xlu1 %4078, %v5115_v32   ;;  %4086 = vpow2.f32 %v884_v26  ;;  %v904_v51 = vmul.f32 1.442695, %v876_v25  ;;  %v906_v63 = vmul.f32 1.442695, %v877_v61  ;;  %v871_v44 = vsub.f32 %v5072_v46, %v839_v1 }
 0x1ac   : > { %929 = vperm.xlu0 %4077, %v5118_v33   ;;  %4088 = vpow2.f32 %v902_v28  ;;  %v870_v48 = vsub.f32 %v5061_v38, %v838_v29  ;;  %v879_v38 = vsub.f32 %v5091_v60, %v847_v59 }
 0x1ad   : > { %4090 = vpow2.f32 %v898_v34  ;;  %v894_v6 = vmul.f32 1.442695, %v871_v44 }
 0x1ae   : > { %4092 = vpow2.f32 %v886_v39  ;;  %v892_v58 = vmul.f32 1.442695, %v870_v48  ;;  %v910_v3 = vmul.f32 1.442695, %v879_v38 }
 0x1af   : > { %4094 = vpow2.f32 %v890_v40 }
 0x1b0   : > { %v5125_v37 = vpop.eup %4084  ;;  %4096 = vpow2.f32 %v900_v47 }
 0x1b1   : > { %953 = vperm.xlu2 %4079, %v5125_v37   ;;  %v5130_v42 = vpop.eup %4086  ;;  %4098 = vpow2.f32 %v904_v51 }
 0x1b2   : > { %v5133_v43 = vpop.eup %4088  ;;  %4100 = vpow2.f32 %v908_v52 }
 0x1b3   : > { %935 = vperm.xlu1 %4078, %v5130_v42   ;;  %v5140_v50 = vpop.eup %4090  ;;  %4102 = vpow2.f32 %v888_v55 }
 0x1b4   : > { %962 = vperm.xlu0 %4077, %v5133_v43   ;;  %v5144_v53 = vpop.eup %4092  ;;  %4104 = vpow2.f32 %v892_v58 }
 0x1b5   : > { %v5147_v35 = vpop.eup %4094  ;;  %4106 = vpow2.f32 %v906_v63 }
 0x1b6   : > { %v5153_v57 = vpop.eup %4096  ;;  %4108 = vpow2.f32 %v910_v3 }
 0x1b7   : > { %v5157_v22 = vpop.eup %4098  ;;  %4110 = vpow2.f32 %v894_v6 }
 0x1b8   : > { %v5160_v62 = vpop.eup %4100 }
 0x1b9   : > { %956 = vperm.xlu2 %4079, %v5140_v50   ;;  %v5166_v2 = vpop.eup %4102 }
 0x1ba   : > { %v5169_v5 = vpop.eup %4104 }
 0x1bb   : > { %938 = vperm.xlu1 %4078, %v5144_v53   ;;  %v5173_v7 = vpop.eup %4106 }
 0x1bc   : > { %944 = vperm.xlu0 %4077, %v5147_v35   ;;  %v5176_v60 = vpop.eup %4108 }
 0x1bd   : > { %v5179_v4 = vpop.eup %4110 }
 0x1c1   : > { %959 = vperm.xlu2 %4079, %v5153_v57  }
 0x1c3   : > { %965 = vperm.xlu1 %4078, %v5157_v22  }
 0x1c4   : > { %971 = vperm.xlu0 %4077, %v5160_v62  }
 0x1c9   : > { %941 = vperm.xlu2 %4079, %v5166_v2  }
 0x1cb   : > { %947 = vperm.xlu1 %4078, %v5169_v5  }
 0x1d1   : > { %968 = vperm.xlu2 %4079, %v5173_v7  }
 0x1d3   : > { %974 = vperm.xlu1 %4078, %v5176_v60  }
 0x1d9   : > { %950 = vperm.xlu2 %4079, %v5179_v4  }
 0x20b   : > { %v954_v8 = vpop.permute.xlu2 %953 }
 0x20c   : > { %v984_v39 = vperm.slane %v954_v8, %v5022_v0 }
 0x213   : > { %v957_v9 = vpop.permute.xlu2 %956 }
 0x214   : > { %v985_v30 = vperm.slane %v957_v9, %v5022_v0 }
 0x216   : > { %v999_v47 = vsel %vm800_vm0, %v985_v30, %v984_v39 }
 0x21b   : > { %v960_v10 = vpop.permute.xlu2 %959 }
 0x21c   : > { %v986_v36 = vperm.slane %v960_v10, %v5022_v0 }
 0x21d   : > { %v933_v46 = vpop.permute.xlu1 %932 }
 0x21e   : > { %v930_v13 = vpop.permute.xlu0 %929  ;;  %v977_v24 = vperm.slane %v933_v46, %v5022_v0  ;;  %v1000_v51 = vsel %vm802_vm1, %v986_v36, %v999_v47 }
 0x21f   : > { %v976_v11 = vperm.slane %v930_v13, %v5022_v0 }
 0x221   : > { %v992_v28 = vsel %vm800_vm0, %v977_v24, %v976_v11 }
 0x223   : > { %v942_v16 = vpop.permute.xlu2 %941 }
 0x224   : > { %v980_v34 = vperm.slane %v942_v16, %v5022_v0 }
 0x225   : > { %v936_v15 = vpop.permute.xlu1 %935 }
 0x226   : > { %v963_v21 = vpop.permute.xlu0 %962  ;;  %v978_v12 = vperm.slane %v936_v15, %v5022_v0 }
 0x227   : > { %v987_v20 = vperm.slane %v963_v21, %v5022_v0 }
 0x228   : > { %v993_v31 = vsel %vm802_vm1, %v978_v12, %v992_v28 }
 0x229   : > { %v1001_v54 = vsel %vm804_vm2, %v987_v20, %v1000_v51 }
 0x22b   : > { %v969_v23 = vpop.permute.xlu2 %968 }
 0x22c   : > { %v989_v58 = vperm.slane %v969_v23, %v5022_v0 }
 0x22d   : > { %v939_v19 = vpop.permute.xlu1 %938 }
 0x22e   : > { %v979_v26 = vperm.slane %v939_v19, %v5022_v0  ;;  %v945_v17 = vpop.permute.xlu0 %944 }
 0x22f   : > { %v981_v14 = vperm.slane %v945_v17, %v5022_v0 }
 0x230   : > { %v994_v18 = vsel %vm804_vm2, %v979_v26, %v993_v31 }
 0x231   : > { %v995_v40 = vsel %vm806_vm3, %v980_v34, %v994_v18 }
 0x232   : > { %v996_v29 = vsel %vm808_vm4, %v981_v14, %v995_v40 }
 0x233   : > { %v951_v41 = vpop.permute.xlu2 %950 }
 0x234   : > { %v983_v52 = vperm.slane %v951_v41, %v5022_v0 }
 0x235   : > { %v966_v27 = vpop.permute.xlu1 %965 }
 0x236   : > { %v988_v25 = vperm.slane %v966_v27, %v5022_v0  ;;  %v972_v59 = vpop.permute.xlu0 %971 }
 0x237   : > { %v990_v63 = vperm.slane %v972_v59, %v5022_v0 }
 0x238   : > { %v1002_v55 = vsel %vm806_vm3, %v988_v25, %v1001_v54 }
 0x239   : > { %v1003_v38 = vsel %vm808_vm4, %v989_v58, %v1002_v55 }
 0x23a   : > { %v1004_v44 = vsel %vm6025_vm5, %v990_v63, %v1003_v38 }
 0x23d   : > { %v948_v45 = vpop.permute.xlu1 %947 }
 0x23e   : > { %v982_v49 = vperm.slane %v948_v45, %v5022_v0 }
 0x240   : > { %v997_v48 = vsel %vm6025_vm5, %v982_v49, %v996_v29 }
 0x241   : > { %v998_v56 = vsel %vm6024_vm6, %v983_v52, %v997_v48 }
 0x242   : > { %v1008_v61 = vsel %vm6023_vm7, %v998_v56, 0.0 }
 0x243   : > { %1009 = vadd.xlane.f32.xlu0 %v1008_v61 }
 0x245   : > { %v975_v1 = vpop.permute.xlu1 %974 }
 0x246   : > { %v991_v3 = vperm.slane %v975_v1, %v5022_v0 }
 0x248   : > { %v1005_v6 = vsel %vm6024_vm6, %v991_v3, %v1004_v44 }
 0x249   : > { %v1011_v8 = vsel %vm6023_vm7, %v1005_v6, 0.0 }
 0x24a   : > { %1012 = vadd.xlane.f32.xlu2 %v1011_v8 }
 0x2b6   : > { %v5214_v9 = vpop.xlane.xlu0 %1009 }
 0x2b7   : > { %v1016_v46 = vperm.slane %v5214_v9, 0  ;;  %v5218_v10 = vperm.slane %v5214_v9, 1  ;;  %v5221_v13 = vperm.slane %v5214_v9, 3  ;;  %v5224_v15 = vperm.slane %v5214_v9, 2 }
 0x2b8   : > { %v5227_v16 = vperm.slane %v5214_v9, 6  ;;  %v5231_v19 = vperm.slane %v5214_v9, 5  ;;  %v5239_v26 = vperm.slane %v5214_v9, 4 }
 0x2b9   : > { %4112 = vrcp.f32 %v1016_v46  ;;  %v1104_v23 = vand.u32 2147483648, %v5221_v13  ;;  %v1057_v24 = vand.u32 2147483647, %v1016_v46  ;;  %v1059_v11 = vand.u32 2147483648, %v1016_v46 }
 0x2ba   : > { %4114 = vrcp.f32 %v5218_v10  ;;  %v1102_v28 = vand.u32 2147483647, %v5221_v13  ;;  %vm1053_vm8 = vweird.f32 %v1016_v46  ;;  %vm1098_vm9 = vweird.f32 %v5221_v13 }
 0x2bb   : > { %4116 = vrcp.f32 %v5221_v13  ;;  %v1105_v34 = vor.u32 1.1754944e-38, %v1104_v23  ;;  %vm5256_vm10 = vcmp.eq.f32.partialorder %v1057_v24, 8.507059e+37  ;;  %v1060_v39 = vor.u32 1.1754944e-38, %v1059_v11 }
 0x2bc   : > { %4118 = vrcp.f32 %v5224_v15  ;;  %v1147_v41 = vand.u32 2147483647, %v5227_v16  ;;  %v1149_v14 = vand.u32 2147483648, %v5227_v16  ;;  %v1072_v25 = vand.u32 2147483647, %v5218_v10 }
 0x2bd   : > { %v5234_v21 = vpop.xlane.xlu2 %1012  ;;  %4120 = vrcp.f32 %v5227_v16  ;;  %vm5271_vm11 = vcmp.eq.f32.partialorder %v1102_v28, 8.507059e+37  ;;  %vm1068_vm12 = vweird.f32 %v5218_v10  ;;  %vm1143_vm14 = vweird.f32 %v5227_v16 }
 0x2be   : > { %v5243_v27 = vperm.slane %v5234_v21, 0  ;;  %4122 = vrcp.f32 %v5231_v19  ;;  %v5248_v31 = vperm.slane %v5234_v21, 3  ;;  %v5253_v30 = vperm.slane %v5234_v21, 1 }
 0x2bf   : > { %v4113_v12 = vpop.eup %4112  ;;  %v5264_v45 = vperm.slane %v5234_v21, 2  ;;  %v5267_v47 = vperm.slane %v5234_v21, 6  ;;  %v5279_v52 = vperm.slane %v5234_v21, 7  ;;  %v1150_v3 = vor.u32 1.1754944e-38, %v1149_v14 }
 0x2c0   : > { %v1049_v17 = vmul.f32 %v4113_v12, %v1016_v46  ;;  %v5250_v18 = vpop.eup %4114  ;;  %4124 = vrcp.f32 %v5243_v27  ;;  %vm1054_vm13 = vweird.f32 %v4113_v12  ;;  %v1222_v56 = vand.u32 2147483647, %v5248_v31 }
 0x2c1   : > { %v4117_v20 = vpop.eup %4116  ;;  %4126 = vrcp.f32 %v5248_v31  ;;  %v1064_v58 = vmul.f32 %v5250_v18, %v5218_v10  ;;  %v1224_v38 = vand.u32 2147483648, %v5248_v31  ;;  %vm1055_vm7 = vmor %vm1053_vm8, %vm1054_vm13  ;;  %vm1069_vm6 = vweird.f32 %v5250_v18 }
 0x2c2   : > { %v1050_v40 = vsub.f32 1.0, %v1049_v17  ;;  %v1094_v49 = vmul.f32 %v4117_v20, %v5221_v13  ;;  %v5276_v29 = vpop.eup %4118  ;;  %4128 = vrcp.f32 %v5253_v30  ;;  %vm1099_vm15 = vweird.f32 %v4117_v20 }
 0x2c3   : > { %v4121_v48 = vpop.eup %4120  ;;  %v1065_v44 = vsub.f32 1.0, %v1064_v58  ;;  %4130 = vrcp.f32 %v5279_v52  ;;  %v1074_v23 = vand.u32 2147483648, %v5218_v10  ;;  %vm1218_vm5 = vweird.f32 %v5248_v31 }
 0x2c4   : > { %v1051_v54 = vmul.f32 %v4113_v12, %v1050_v40  ;;  %v1095_v55 = vsub.f32 1.0, %v1094_v49  ;;  %v5287_v59 = vpop.eup %4122  ;;  %v1139_v63 = vmul.f32 %v4121_v48, %v5227_v16  ;;  %4132 = vrcp.f32 %v5267_v47 }
 0x2c5   : > { %v1066_v46 = vmul.f32 %v5250_v18, %v1065_v44  ;;  %v1124_v17 = vmul.f32 %v5287_v59, %v5231_v19  ;;  %vm1144_vm8 = vweird.f32 %v4121_v48  ;;  %v1132_v10 = vand.u32 2147483647, %v5231_v19 }
 0x2c6   : > { %v1052_v61 = vadd.f32 %v4113_v12, %v1051_v54  ;;  %v1096_v1 = vmul.f32 %v4117_v20, %v1095_v55  ;;  %v1140_v8 = vsub.f32 1.0, %v1139_v63  ;;  %v5295_v24 = vpop.eup %4124  ;;  %vm1145_vm13 = vmor %vm1143_vm14, %vm1144_vm8  ;;  %vm1223_vm14 = vcmp.eq.f32.partialorder %v1222_v56, 8.507059e+37 }
 0x2c7   : > { %v4127_v40 = vpop.eup %4126  ;;  %v1067_v54 = vadd.f32 %v5250_v18, %v1066_v46  ;;  %v1125_v13 = vsub.f32 1.0, %v1124_v17  ;;  %v1169_v56 = vmul.f32 %v5295_v24, %v5243_v27  ;;  %v1282_v46 = vand.u32 2147483647, %v5279_v52 }
 0x2c8   : > { %v1056_v6 = vsel %vm1055_vm7, %v4113_v12, %v1052_v61  ;;  %v1097_v11 = vadd.f32 %v4117_v20, %v1096_v1  ;;  %vm1100_vm7 = vmor %vm1098_vm9, %vm1099_vm15  ;;  %v1141_v14 = vmul.f32 %v4121_v48, %v1140_v8  ;;  %v5308_v36 = vpop.eup %4128  ;;  %v1214_v49 = vmul.f32 %v4127_v40, %v5248_v31 }
 0x2c9   : > { %v1061_v28 = vsel %vm5256_vm10, %v1060_v39, %v1056_v6  ;;  %vm1073_vm10 = vcmp.eq.f32.partialorder %v1072_v25, 8.507059e+37  ;;  %vm1070_vm9 = vmor %vm1068_vm12, %vm1069_vm6  ;;  %vm1129_vm15 = vweird.f32 %v5287_v59  ;;  %v1126_v1 = vmul.f32 %v5287_v59, %v1125_v13 }
 0x2ca   : > { %v1062_v12 = vmul.f32 %v5118_v33, %v1061_v28  ;;  %v1101_v39 = vsel %vm1100_vm7, %v4117_v20, %v1097_v11  ;;  %v1142_v58 = vadd.f32 %v4121_v48, %v1141_v14  ;;  %v1075_v33 = vor.u32 1.1754944e-38, %v1074_v23 }
 0x2cb   : > { %v1106_v55 = vsel %vm5271_vm11, %v1105_v34, %v1101_v39  ;;  %v1215_v20 = vsub.f32 1.0, %v1214_v49  ;;  %v1071_v25 = vsel %vm1070_vm9, %v5250_v18, %v1067_v54  ;;  %v4131_v34 = vpop.eup %4130  ;;  %vm1219_vm6 = vweird.f32 %v4127_v40 }
 0x2cc   : > { %1290 = vperm.xlu1 %4078, %v1062_v12   ;;  %v1107_v61 = vmul.f32 %v5144_v53, %v1106_v55  ;;  %v1146_v51 = vsel %vm1145_vm13, %v4121_v48, %v1142_v58  ;;  %v1076_v63 = vsel %vm1073_vm10, %v1075_v33, %v1071_v25  ;;  %vm1148_vm11 = vcmp.eq.f32.partialorder %v1147_v41, 8.507059e+37  ;;  %v5328_v6 = vpop.eup %4132  ;;  %vm1220_vm8 = vmor %vm1218_vm5, %vm1219_vm6 }
 0x2cd   : > { %v1216_v44 = vmul.f32 %v4127_v40, %v1215_v20  ;;  %v1134_v53 = vand.u32 2147483648, %v5231_v19  ;;  %v1151_v18 = vsel %vm1148_vm11, %v1150_v3, %v1146_v51  ;;  %v1127_v8 = vadd.f32 %v5287_v59, %v1126_v1 }
 0x2ce   : > { %1305 = vperm.xlu2 %4079, %v1107_v61   ;;  %vm1128_vm12 = vweird.f32 %v5231_v19  ;;  %v1274_v48 = vmul.f32 %v4131_v34, %v5279_v52  ;;  %v1225_v11 = vor.u32 1.1754944e-38, %v1224_v38  ;;  %v1077_v28 = vmul.f32 %v5115_v32, %v1076_v63 }
 0x2cf   : > { %v1217_v23 = vadd.f32 %v4127_v40, %v1216_v44  ;;  %vm5336_vm7 = vmor %vm1128_vm12, %vm1129_vm15  ;;  %vm1133_vm10 = vcmp.eq.f32.partialorder %v1132_v10, 8.507059e+37  ;;  %v1152_v32 = vmul.f32 %v5169_v5, %v1151_v18  ;;  %v1135_v3 = vor.u32 1.1754944e-38, %v1134_v53 }
 0x2d0   : > { %v1131_v19 = vsel %vm5336_vm7, %v5287_v59, %v1127_v8  ;;  %v1275_v41 = vsub.f32 1.0, %v1274_v48  ;;  %vm1279_vm9 = vweird.f32 %v4131_v34  ;;  %v1284_v31 = vand.u32 2147483648, %v5279_v52 }
 0x2d1   : > { %v1221_v38 = vsel %vm1220_vm8, %v4127_v40, %v1217_v23  ;;  %v1136_v59 = vsel %vm1133_vm10, %v1135_v3, %v1131_v19  ;;  %vm1278_vm5 = vweird.f32 %v5279_v52  ;;  %v1170_v39 = vsub.f32 1.0, %v1169_v56 }
 0x2d2   : > { %v1226_v17 = vsel %vm1223_vm14, %v1225_v11, %v1221_v38  ;;  %v1276_v12 = vmul.f32 %v4131_v34, %v1275_v41  ;;  %v1177_v40 = vand.u32 2147483647, %v5243_v27  ;;  %v1179_v5 = vand.u32 2147483648, %v5243_v27  ;;  %vm1280_vm13 = vmor %vm1278_vm5, %vm1279_vm9 }
 0x2d3   : > { %v1227_v14 = vmul.f32 %v5133_v43, %v1226_v17  ;;  %v1259_v54 = vmul.f32 %v5328_v6, %v5267_v47  ;;  %4134 = vrcp.f32 %v5264_v45  ;;  %vm1283_vm15 = vcmp.eq.f32.partialorder %v1282_v46, 8.507059e+37 }
 0x2d4   : > { %1295 = vperm.xlu1 %4078, %v1077_v28   ;;  %v1277_v49 = vadd.f32 %v4131_v34, %v1276_v12  ;;  %v1171_v43 = vmul.f32 %v5295_v24, %v1170_v39  ;;  %vm1174_vm6 = vweird.f32 %v5295_v24  ;;  %v1285_v55 = vor.u32 1.1754944e-38, %v1284_v31 }
 0x2d5   : > { %1345 = vperm.xlu0 %4077, %v1227_v14   ;;  %vm1173_vm11 = vweird.f32 %v5243_v27  ;;  %v1260_v58 = vsub.f32 1.0, %v1259_v54  ;;  %v1137_v33 = vmul.f32 %v5147_v35, %v1136_v59  ;;  %vm1263_vm12 = vweird.f32 %v5267_v47 }
 0x2d6   : > { %1320 = vperm.xlu2 %4079, %v1152_v32   ;;  %v1281_v52 = vsel %vm1280_vm13, %v4131_v34, %v1277_v49  ;;  %v1172_v13 = vadd.f32 %v5295_v24, %v1171_v43  ;;  %v1184_v61 = vmul.f32 %v5308_v36, %v5253_v30  ;;  %vm1175_vm14 = vmor %vm1173_vm11, %vm1174_vm6  ;;  %vm1178_vm7 = vcmp.eq.f32.partialorder %v1177_v40, 8.507059e+37 }
 0x2d7   : > { %v1286_v20 = vsel %vm1283_vm15, %v1285_v55, %v1281_v52  ;;  %v1180_v25 = vor.u32 1.1754944e-38, %v1179_v5  ;;  %v1261_v51 = vmul.f32 %v5328_v6, %v1260_v58  ;;  %vm1264_vm8 = vweird.f32 %v5328_v6 }
 0x2d8   : > { %v1176_v34 = vsel %vm1175_vm14, %v5295_v24, %v1172_v13  ;;  %v1267_v27 = vand.u32 2147483647, %v5267_v47  ;;  %v1185_v35 = vsub.f32 1.0, %v1184_v61  ;;  %v1269_v10 = vand.u32 2147483648, %v5267_v47  ;;  %vm5382_vm9 = vmor %vm1263_vm12, %vm1264_vm8 }
 0x2d9   : > { %v1181_v63 = vsel %vm1178_vm7, %v1180_v25, %v1176_v34  ;;  %v1262_v1 = vadd.f32 %v5328_v6, %v1261_v51  ;;  %v1079_v44 = vmul.f32 %v5276_v29, %v5224_v15  ;;  %v5373_v53 = vpop.eup %4134  ;;  %v1287_v18 = vmul.f32 %v5176_v60, %v1286_v20 }
 0x2da   : > { %v1186_v8 = vmul.f32 %v5308_v36, %v1185_v35  ;;  %vm1189_vm10 = vweird.f32 %v5308_v36  ;;  %v1194_v24 = vand.u32 2147483648, %v5253_v30  ;;  %v1182_v48 = vmul.f32 %v5125_v37, %v1181_v63 }
 0x2db   : > { %v1192_v11 = vand.u32 2147483647, %v5253_v30  ;;  %v1080_v28 = vsub.f32 1.0, %v1079_v44  ;;  %4136 = vrcp.f32 %v5239_v26  ;;  %v1266_v60 = vsel %vm5382_vm9, %v5328_v6, %v1262_v1 }
 0x2dc   : > { %v1187_v16 = vadd.f32 %v5308_v36, %v1186_v8  ;;  %vm1188_vm5 = vweird.f32 %v5253_v30  ;;  %1330 = vperm.xlu1 %4078, %v1182_v48   ;;  %v1270_v37 = vor.u32 1.1754944e-38, %v1269_v10  ;;  %v1199_v19 = vmul.f32 %v5373_v53, %v5264_v45 }
 0x2dd   : > { %1315 = vperm.xlu0 %4077, %v1137_v33   ;;  %vm1190_vm13 = vmor %vm1188_vm5, %vm1189_vm10  ;;  %v1081_v47 = vmul.f32 %v5276_v29, %v1080_v28  ;;  %vm1268_vm15 = vcmp.eq.f32.partialorder %v1267_v27, 8.507059e+37  ;;  %v1195_v56 = vor.u32 1.1754944e-38, %v1194_v24  ;;  %vm1193_vm6 = vcmp.eq.f32.partialorder %v1192_v11, 8.507059e+37 }
 0x2de   : > { %1365 = vperm.xlu2 %4079, %v1287_v18   ;;  %v1191_v41 = vsel %vm1190_vm13, %v5308_v36, %v1187_v16  ;;  %v1271_v38 = vsel %vm1268_vm15, %v1270_v37, %v1266_v60  ;;  %v5398_v6 = vperm.slane %v5234_v21, 4  ;;  %vm1084_vm11 = vweird.f32 %v5276_v29 }
 0x2df   : > { %v1196_v32 = vsel %vm1193_vm6, %v1195_v56, %v1191_v41  ;;  %v1082_v30 = vadd.f32 %v5276_v29, %v1081_v47  ;;  %v1200_v3 = vsub.f32 1.0, %v1199_v19  ;;  %v1272_v17 = vmul.f32 %v5160_v62, %v1271_v38 }
 0x2e0   : > { %v1089_v12 = vand.u32 2147483648, %v5224_v15  ;;  %v1197_v31 = vmul.f32 %v5140_v50, %v1196_v32  ;;  %vm1083_vm12 = vweird.f32 %v5224_v15  ;;  %v1087_v36 = vand.u32 2147483647, %v5224_v15 }
 0x2e1   : > { %v4137_v46 = vpop.eup %4136  ;;  %4138 = vrcp.f32 %v5398_v6  ;;  %vm1085_vm14 = vmor %vm1083_vm12, %vm1084_vm11  ;;  %v1201_v59 = vmul.f32 %v5373_v53, %v1200_v3  ;;  %v5412_v49 = vperm.slane %v5234_v21, 5  ;;  %vm1204_vm8 = vweird.f32 %v5373_v53 }
 0x2e2   : > { %v1086_v14 = vsel %vm1085_vm14, %v5276_v29, %v1082_v30  ;;  %v1109_v39 = vmul.f32 %v4137_v46, %v5239_v26  ;;  %v1090_v62 = vor.u32 1.1754944e-38, %v1089_v12  ;;  %vm1088_vm7 = vcmp.eq.f32.partialorder %v1087_v36, 8.507059e+37  ;;  %v3846_v12 = vld [vmem:[#allocation13 + $0x2ec] sm:$0xf0] }
 0x2e3   : > { %v1202_v40 = vadd.f32 %v5373_v53, %v1201_v59  ;;  %v1209_v54 = vand.u32 2147483648, %v5264_v45  ;;  %vm1203_vm10 = vweird.f32 %v5264_v45  ;;  %v1207_v43 = vand.u32 2147483647, %v5264_v45 }
 0x2e4   : > { %1335 = vperm.xlu1 %4078, %v1197_v31   ;;  %v1091_v50 = vsel %vm1088_vm7, %v1090_v62, %v1086_v14  ;;  %v1110_v15 = vsub.f32 1.0, %v1109_v39  ;;  %4140 = vrcp.f32 %v5412_v49  ;;  %vm1205_vm9 = vmor %vm1203_vm10, %vm1204_vm8  ;;  %v1023_v33 = vperm.slane %v5214_v9, 7  ;;  %v3567_v31 = vld [vmem:[#allocation13 + $0x2c0] sm:$0xf]  ;;  %v3842_v14 = vld [vmem:[#allocation13 + $0x2cc] sm:$0xf0] }
 0x2e5   : > { %1360 = vperm.xlu0 %4077, %v1272_v17   ;;  %v1092_v29 = vmul.f32 %v5130_v42, %v1091_v50  ;;  %v1206_v21 = vsel %vm1205_vm9, %v5373_v53, %v1202_v40  ;;  %v1210_v58 = vor.u32 1.1754944e-38, %v1209_v54  ;;  %vm1208_vm5 = vcmp.eq.f32.partialorder %v1207_v43, 8.507059e+37  ;;  %v3583_v17 = vld [vmem:[#allocation13 + $0x2e0] sm:$0xf]  ;;  %v3838_v39 = vld [vmem:[#allocation13 + $0x2ac] sm:$0xf0] }
 0x2e6   : > { %v1111_v52 = vmul.f32 %v4137_v46, %v1110_v15  ;;  %vm1114_vm13 = vweird.f32 %v4137_v46  ;;  %v1119_v45 = vand.u32 2147483648, %v5239_v26  ;;  %vm1113_vm15 = vweird.f32 %v5239_v26  ;;  %v3535_v62 = vld [vmem:[#allocation13 + $0x280] sm:$0xf]  ;;  %v3834_v50 = vld [vmem:[#allocation13 + $0x28c] sm:$0xf0] }
 0x2e7   : > { %v4139_v5 = vpop.eup %4138  ;;  %v1211_v13 = vsel %vm1208_vm5, %v1210_v58, %v1206_v21  ;;  %v1117_v51 = vand.u32 2147483647, %v5239_v26  ;;  %4142 = vrcp.f32 %v1023_v33  ;;  %vm1115_vm6 = vmor %vm1113_vm15, %vm1114_vm13  ;;  %vm1233_vm14 = vweird.f32 %v5398_v6  ;;  %v3782_v54 = vld [vmem:[#allocation13 + $0xec] sm:$0xf0] }
 0x2e8   : > { %v1229_v55 = vmul.f32 %v4139_v5, %v5398_v6  ;;  %v1112_v61 = vadd.f32 %v4137_v46, %v1111_v52  ;;  %v1212_v25 = vmul.f32 %v5153_v57, %v1211_v13  ;;  %v1120_v35 = vor.u32 1.1754944e-38, %v1119_v45  ;;  %v3830_v21 = vld [vmem:[#allocation13 + $0x26c] sm:$0xf0]  ;;  %v3311_v52 = vld [vmem:[#allocation13 + $0xc0] sm:$0xf]  ;;  %v4176_v45 = vld [vmem:[#allocation11 + $0x18] sm:$0xff] }
 0x2e9   : > { %vm1118_vm11 = vcmp.eq.f32.partialorder %v1117_v51, 8.507059e+37  ;;  %vm1234_vm12 = vweird.f32 %v4139_v5  ;;  %v1239_v57 = vand.u32 2147483648, %v5398_v6  ;;  %v1237_v26 = vand.u32 2147483647, %v5398_v6  ;;  %v3778_v58 = vld [vmem:[#allocation13 + $0xcc] sm:$0xf0] }
 0x2ea   : > { %v1230_v42 = vsub.f32 1.0, %v1229_v55  ;;  %v4141_v20 = vpop.eup %4140  ;;  %v1116_v34 = vsel %vm1115_vm6, %v4137_v46, %v1112_v61  ;;  %vm1235_vm7 = vmor %vm1233_vm14, %vm1234_vm12  ;;  %v1254_v60 = vand.u32 2147483648, %v5412_v49  ;;  %vm1248_vm9 = vweird.f32 %v5412_v49  ;;  %v3826_v61 = vld [vmem:[#allocation13 + $0x24c] sm:$0xf0] }
 0x2eb   : > { %v1244_v9 = vmul.f32 %v4141_v20, %v5412_v49  ;;  %v1121_v63 = vsel %vm1118_vm11, %v1120_v35, %v1116_v34  ;;  %v1240_v48 = vor.u32 1.1754944e-38, %v1239_v57  ;;  %vm1238_vm8 = vcmp.eq.f32.partialorder %v1237_v26, 8.507059e+37  ;;  %v3822_v57 = vld [vmem:[#allocation13 + $0x22c] sm:$0xf0] }
 0x2ec   : > { %1300 = vperm.xlu1 %4078, %v1092_v29   ;;  %v1231_v27 = vmul.f32 %v4139_v5, %v1230_v42  ;;  %v1122_v53 = vmul.f32 %v5166_v2, %v1121_v63  ;;  %vm1249_vm10 = vweird.f32 %v4141_v20  ;;  %v1252_v2 = vand.u32 2147483647, %v5412_v49  ;;  %v3519_v29 = vld [vmem:[#allocation13 + $0x260] sm:$0xf]  ;;  %v3780_v42 = vld [vmem:[#allocation13 + $0xe4] sm:$0xf] }
 0x2ed   : > { %v1245_v10 = vsub.f32 1.0, %v1244_v9  ;;  %v4143_v44 = vpop.eup %4142  ;;  %vm1250_vm5 = vmor %vm1248_vm9, %vm1249_vm10  ;;  %v1255_v19 = vor.u32 1.1754944e-38, %v1254_v60  ;;  %v1164_v38 = vand.u32 2147483648, %v1023_v33  ;;  %vm1158_vm6 = vweird.f32 %v1023_v33  ;;  %v3295_v63 = vld [vmem:[#allocation13 + $0xa0] sm:$0xf] }
 0x2ee   : > { %v1232_v1 = vadd.f32 %v4139_v5, %v1231_v27  ;;  %v1154_v24 = vmul.f32 %v4143_v44, %v1023_v33  ;;  %vm1253_vm13 = vcmp.eq.f32.partialorder %v1252_v2, 8.507059e+37  ;;  %vm1159_vm15 = vweird.f32 %v4143_v44  ;;  %v3818_v2 = vld [vmem:[#allocation13 + $0x20c] sm:$0xf0] }
 0x2ef   : > { %v1246_v8 = vmul.f32 %v4141_v20, %v1245_v10  ;;  %v1162_v32 = vand.u32 2147483647, %v1023_v33  ;;  %vm1160_vm11 = vmor %vm1158_vm6, %vm1159_vm15  ;;  %v1165_v30 = vor.u32 1.1754944e-38, %v1164_v38  ;;  %v3584_v36 = vor.u32 %v3846_v12, %v3583_v17  ;;  %v3503_v33 = vld [vmem:[#allocation13 + $0x240] sm:$0xf]  ;;  %v4179_v12 = vld [vmem:[#allocation11 + $0x8] sm:$0xff] }
 0x2f0   : > { %v1236_v18 = vsel %vm1235_vm7, %v4139_v5, %v1232_v1  ;;  %v1155_v28 = vsub.f32 1.0, %v1154_v24  ;;  %v3568_v59 = vor.u32 %v3842_v14, %v3567_v31  ;;  %v3536_v40 = vor.u32 %v3834_v50, %v3535_v62  ;;  %v3327_v5 = vld [vmem:[#allocation13 + $0xe0] sm:$0xf]  ;;  %v3774_v1 = vld [vmem:[#allocation13 + $0xac] sm:$0xf0] }
 0x2f1   : > { %v1241_v23 = vsel %vm1238_vm8, %v1240_v48, %v1236_v18  ;;  %v1247_v11 = vadd.f32 %v4141_v20, %v1246_v8  ;;  %vm1163_vm12 = vcmp.eq.f32.partialorder %v1162_v32, 8.507059e+37  ;;  %2167 = vmatpush.bf16.msra.mxu2 %v3584_v36  ;;  %v3328_v43 = vor.u32 %v3782_v54, %v3327_v5  ;;  %v3313_v8 = vld [vmem:[#allocation13 + $0xd0] sm:$0xf0]  ;;  %v3279_v24 = vld [vmem:[#allocation13 + $0x80] sm:$0xf] }
 0x2f2   : > { %v1242_v16 = vmul.f32 %v5157_v22, %v1241_v23  ;;  %v1156_v47 = vmul.f32 %v4143_v44, %v1155_v28  ;;  %v3520_v55 = vor.u32 %v3830_v21, %v3519_v29  ;;  %v3312_v13 = vor.u32 %v3778_v58, %v3311_v52  ;;  %v3770_v48 = vld [vmem:[#allocation13 + $0x8c] sm:$0xf0]  ;;  %v4177_v23 = vld [vmem:[#allocation11] sm:$0xff]  ;;  %v3319_v62 = vld [vmem:[#allocation13 + $0xc8] sm:$0xf] }
 0x2f3   : > { %v1251_v37 = vsel %vm1250_vm5, %v4141_v20, %v1247_v11  ;;  %2139 = vmatpush.bf16.msra.mxu0 %v3328_v43  ;;  %v3329_v20 = vld [vmem:[#allocation13 + $0xf0] sm:$0xf0]  ;;  %v3504_v51 = vor.u32 %v3826_v61, %v3503_v33  ;;  %v3296_v10 = vor.u32 %v3774_v1, %v3295_v63  ;;  %v3280_v60 = vor.u32 %v3770_v48, %v3279_v24  ;;  %v3772_v38 = vld [vmem:[#allocation13 + $0xa4] sm:$0xf]  ;;  %v3263_v36 = vld [vmem:[#allocation13 + $0x60] sm:$0xf] }
 0x2f4   : > { %1340 = vperm.xlu1 %4078, %v1212_v25   ;;  %v1256_v41 = vsel %vm1253_vm13, %v1255_v19, %v1251_v37  ;;  %v1157_v56 = vadd.f32 %v4143_v44, %v1156_v47  ;;  %v3332_v34 = vor.u32 %v3780_v42, %v3329_v20  ;;  %v3335_v47 = vld [vmem:[#allocation13 + $0xe8] sm:$0xf]  ;;  %v3783_v19 = vld [vmem:[#allocation13 + $0xf4] sm:$0xf0]  ;;  %v3766_v14 = vld [vmem:[#allocation13 + $0x6c] sm:$0xf0] }
 0x2f5   : > { %v1257_v6 = vmul.f32 %v5173_v7, %v1256_v41  ;;  %2168 = vmatpush.bf16.msra.mxu2 %v3568_v59  ;;  %v3551_v7 = vld [vmem:[#allocation13 + $0x2a0] sm:$0xf]  ;;  %v4180_v50 = vld [vmem:[#allocation11 + $0x30] sm:$0xff]  ;;  %v3264_v5 = vor.u32 %v3766_v14, %v3263_v36  ;;  %v3779_v54 = vld [vmem:[#allocation13 + $0xd4] sm:$0xf0]  ;;  %vm2441_vm14 = vcmask 7168  }
 0x2f6   : > { %v1161_v22 = vsel %vm1160_vm11, %v4143_v44, %v1157_v56  ;;  %v3552_v49 = vor.u32 %v3838_v39, %v3551_v7  ;;  %2181 = vmatpush.bf16.msra.mxu3 %v3332_v34  ;;  %v3487_v44 = vld [vmem:[#allocation13 + $0x220] sm:$0xf]  ;;  %v3336_v56 = vor.u32 %v3783_v19, %v3335_v47  ;;  %v3814_v39 = vld [vmem:[#allocation13 + $0x1ec] sm:$0xf0]  ;;  %v3768_v29 = vld [vmem:[#allocation13 + $0x84] sm:$0xf]  ;;  %v3320_v33 = vor.u32 %v3779_v54, %v3319_v62 }
 0x2f7   : > { %v1166_v3 = vsel %vm1163_vm12, %v1165_v30, %v1161_v22  ;;  %2140 = vmatpush.bf16.msra.mxu0 %v3312_v13  ;;  %v3488_v18 = vor.u32 %v3822_v57, %v3487_v44  ;;  %v3455_v7 = vld [vmem:[#allocation13 + $0x1e0] sm:$0xf]  ;;  %v3281_v43 = vld [vmem:[#allocation13 + $0x90] sm:$0xf0]  ;;  %v4181_v21 = vld [vmem:[#allocation11 + $0x78] sm:$0xff]  ;;  %vm6099_vm7 = vcmask 1046534  }
 0x2f8   : > { %v1167_v46 = vmul.f32 %v5179_v4, %v1166_v3  ;;  %v3456_v58 = vor.u32 %v3814_v39, %v3455_v7  ;;  %v3247_v13 = vld [vmem:[#allocation13 + $0x40] sm:$0xf]  ;;  %v3762_v61 = vld [vmem:[#allocation13 + $0x4c] sm:$0xf0]  ;;  %v3303_v63 = vld [vmem:[#allocation13 + $0xa8] sm:$0xf] }
 0x2f9   : > { %2169 = vmatpush.bf16.msra.mxu2 %v3552_v49  ;;  %v3810_v34 = vld [vmem:[#allocation13 + $0x1cc] sm:$0xf0]  ;;  %v3775_v1 = vld [vmem:[#allocation13 + $0xb4] sm:$0xf0]  ;;  %v3407_v62 = vld [vmem:[#allocation13 + $0x180] sm:$0xf] }
 0x2fa   : > { %2153 = vmatpush.bf16.msra.mxu1 %v3456_v58  ;;  %v3304_v57 = vor.u32 %v3775_v1, %v3303_v63  ;;  %v3457_v54 = vld [vmem:[#allocation13 + $0x1f0] sm:$0xf0]  ;;  %v3756_v58 = vld [vmem:[#allocation13 + $0x24] sm:$0xf]  ;;  %v3798_v63 = vld [vmem:[#allocation13 + $0x16c] sm:$0xf0] }
 0x2fb   : > { %2141 = vmatpush.bf16.msra.mxu0 %v3296_v10  ;;  %v3764_v10 = vld [vmem:[#allocation13 + $0x64] sm:$0xf]  ;;  %vm6100_vm8 = vcmask 1047559   ;;  %vm6101_vm10 = vcmask 64512   ;;  %vm6102_vm9 = vmmov %vm6099_vm7 }
 0x2fc   : > { %1310 = vperm.xlu1 %4078, %v1122_v53   ;;  %v3776_v53 = vld [vmem:[#allocation13 + $0xc4] sm:$0xf]  ;;  %vm6103_vm5 = vmmov %vm6100_vm8 }
 0x2fd   : > { %2170 = vmatpush.bf16.msra.mxu2 %v3536_v40  ;;  %v3316_v28 = vor.u32 %v3776_v53, %v3313_v8  ;;  %v3265_v53 = vld [vmem:[#allocation13 + $0x70] sm:$0xf0] }
 0x2ff   : > { %2182 = vmatpush.bf16.msra.mxu3 %v3316_v28  ;;  %2142 = vmatpush.bf16.msra.mxu0 %v3280_v60  ;;  %v3758_v28 = vld [vmem:[#allocation13 + $0x2c] sm:$0xf0] }
 0x301   : > { %2171 = vmatpush.bf16.msra.mxu2 %v3520_v55 }
 0x303   : > { %2143 = vmatpush.bf16.msra.mxu0 %v3264_v5  ;;  %v3812_v5 = vld [vmem:[#allocation13 + $0x1e4] sm:$0xf] }
 0x304   : > { %1350 = vperm.xlu1 %4078, %v1242_v16   ;;  %v3471_v16 = vld [vmem:[#allocation13 + $0x200] sm:$0xf] }
 0x305   : > { %2172 = vmatpush.bf16.msra.mxu2 %v3504_v51  ;;  %v3472_v37 = vor.u32 %v3818_v2, %v3471_v16  ;;  %v3439_v51 = vld [vmem:[#allocation13 + $0x1c0] sm:$0xf]  ;;  %v3806_v2 = vld [vmem:[#allocation13 + $0x1ac] sm:$0xf0] }
 0x306   : > { %v3423_v16 = vld [vmem:[#allocation13 + $0x1a0] sm:$0xf] }
 0x309   : > { %2173 = vmatpush.bf16.msra.mxu2 %v3488_v18  ;;  %v3268_v18 = vor.u32 %v3764_v10, %v3265_v53  ;;  %v3255_v53 = vld [vmem:[#allocation13 + $0x48] sm:$0xf] }
 0x30c   : > { %1355 = vperm.xlu1 %4078, %v1257_v6   ;;  %v3297_v6 = vld [vmem:[#allocation13 + $0xb0] sm:$0xf0] }
 0x30d   : > { %v3300_v22 = vor.u32 %v3772_v38, %v3297_v6  ;;  %2174 = vmatpush.bf16.msra.mxu2 %v3472_v37  ;;  %v3287_v37 = vld [vmem:[#allocation13 + $0x88] sm:$0xf]  ;;  %v3760_v38 = vld [vmem:[#allocation13 + $0x44] sm:$0xf]  ;;  %v3249_v6 = vld [vmem:[#allocation13 + $0x50] sm:$0xf0] }
 0x30e   : > { %v3252_v39 = vor.u32 %v3760_v38, %v3249_v6 }
 0x30f   : > { %2183 = vmatpush.bf16.msra.mxu3 %v3300_v22  ;;  %v4182_v22 = vld [vmem:[#allocation11 + $0x40] sm:$0xff] }
 0x311   : > { %2223 = vmatpush.bf16.msrb.mxu2 %v3336_v56  ;;  %v3771_v56 = vld [vmem:[#allocation13 + $0x94] sm:$0xf0] }
 0x314   : > { %1325 = vperm.xlu1 %4078, %v1167_v46   ;;  %v4178_v46 = vld [vmem:[#allocation11 + $0x58] sm:$0xff] }
 0x315   : > { %2224 = vmatpush.bf16.msrb.mxu2 %v3320_v33  ;;  %v3233_v33 = vld [vmem:[#allocation13 + $0x30] sm:$0xf0] }
 0x319   : > { %2225 = vmatpush.bf16.msrb.mxu2 %v3304_v57  ;;  %v3441_v57 = vld [vmem:[#allocation13 + $0x1d0] sm:$0xf0] }
 0x328   : > { %v5439_v15 = vpop.permute.xlu2 %1305 }
 0x329   : > { %v1371_v25 = vmul.f32 %v4176_v45, %v5439_v15  ;;  %v3284_v45 = vor.u32 %v3768_v29, %v3281_v43  ;;  %v3271_v29 = vld [vmem:[#allocation13 + $0x68] sm:$0xf] }
 0x32b   : > { %v1402_v27 = vrot.slane %v1371_v25, 4  ;;  %2184 = vmatpush.bf16.msra.mxu3 %v3284_v45 }
 0x32d   : > { %v1403_v26 = vadd.f32 %v1402_v27, %v1371_v25  ;;  %v3248_v25 = vor.u32 %v3762_v61, %v3247_v13  ;;  %v3440_v27 = vor.u32 %v3810_v34, %v3439_v51 }
 0x32f   : > { %v1404_v32 = vrot.slane %v1403_v26, 2  ;;  %2144 = vmatpush.bf16.msra.mxu0 %v3248_v25  ;;  %2154 = vmatpush.bf16.msra.mxu1 %v3440_v27  ;;  %v3391_v27 = vld [vmem:[#allocation13 + $0x160] sm:$0xf] }
 0x330   : > { %v5444_v9 = vpop.permute.xlu2 %1320  ;;  %2185 = vmatpush.bf16.msra.mxu3 %v3268_v18  ;;  %v3392_v10 = vor.u32 %v3798_v63, %v3391_v27 }
 0x331   : > { %v5457_v49 = vadd.f32 %v1404_v32, %v1403_v26  ;;  %v1374_v40 = vmul.f32 %v4180_v50, %v5444_v9  ;;  %v3802_v50 = vld [vmem:[#allocation13 + $0x18c] sm:$0xf0] }
 0x332   : > { %v3408_v43 = vor.u32 %v3802_v50, %v3407_v62  ;;  %v3811_v62 = vld [vmem:[#allocation13 + $0x1d4] sm:$0xf0] }
 0x333   : > { %v1420_v44 = vrot.slane %v1374_v40, 4  ;;  %v1406_v8 = vrot.slane %v5457_v49, 1 }
 0x334   : > { %2186 = vmatpush.bf16.msra.mxu3 %v3252_v39  ;;  %v3447_v39 = vld [vmem:[#allocation13 + $0x1c8] sm:$0xf] }
 0x335   : > { %v5464_v47 = vadd.f32 %v1420_v44, %v1374_v40  ;;  %v3808_v44 = vld [vmem:[#allocation13 + $0x1c4] sm:$0xf] }
 0x338   : > { %v5451_v3 = vpop.permute.xlu2 %1365 }
 0x339   : > { %v1383_v52 = vmul.f32 %v4181_v21, %v5451_v3  ;;  %v3460_v21 = vor.u32 %v3812_v5, %v3457_v54  ;;  %v3448_v54 = vor.u32 %v3811_v62, %v3447_v39 }
 0x33b   : > { %v1474_v26 = vrot.slane %v1383_v52, 4 }
 0x33d   : > { %v5466_v32 = vadd.f32 %v1474_v26, %v1383_v52  ;;  %v3767_v52 = vld [vmem:[#allocation13 + $0x74] sm:$0xf0]  ;;  %v4183_v26 = vld [vmem:[#allocation11 + $0x28] sm:$0xff] }
 0x33e   : > { %v5441_v4 = vpop.permute.xlu1 %1290 }
 0x33f   : > { %v1368_v11 = vmul.f32 %v4177_v23, %v5441_v4  ;;  %v1476_v45 = vrot.slane %v5466_v32, 2 }
 0x341   : > { %v1384_v30 = vrot.slane %v1368_v11, 4 }
 0x343   : > { %v1385_v55 = vadd.f32 %v1384_v30, %v1368_v11  ;;  %v3231_v11 = vld [vmem:[#allocation13 + $0x20] sm:$0xf] }
 0x344   : > { %v3232_v19 = vor.u32 %v3758_v28, %v3231_v11  ;;  %v3444_v28 = vor.u32 %v3808_v44, %v3441_v57  ;;  %v3409_v44 = vld [vmem:[#allocation13 + $0x190] sm:$0xf0]  ;;  %v3223_v57 = vld [vmem:[#allocation13 + $0x8] sm:$0xf] }
 0x345   : > { %v1386_v24 = vrot.slane %v1385_v55, 2 }
 0x346   : > { %v5446_v35 = vpop.permute.xlu1 %1295  ;;  %2145 = vmatpush.bf16.msra.mxu0 %v3232_v19  ;;  %v3815_v19 = vld [vmem:[#allocation13 + $0x1f4] sm:$0xf0] }
 0x347   : > { %v5449_v41 = vpop.permute.xlu0 %1345  ;;  %v1369_v31 = vmul.f32 %v4179_v12, %v5446_v35  ;;  %v3215_v12 = vld [vmem:[#allocation13] sm:$0xf]  ;;  %v5469_v36 = vadd.f32 %v1386_v24, %v1385_v55  ;;  %v1422_v55 = vrot.slane %v5464_v47, 2  ;;  %v3763_v24 = vld [vmem:[#allocation13 + $0x54] sm:$0xf0] }
 0x348   : > { %v1379_v17 = vmul.f32 %v4178_v46, %v5449_v41  ;;  %v3424_v46 = vor.u32 %v3806_v2, %v3423_v16  ;;  %v3256_v16 = vor.u32 %v3763_v24, %v3255_v53  ;;  %v4669_v53 = vmov 0.0  }
 0x349   : > { %v1390_v20 = vrot.slane %v1369_v31, 4  ;;  %v1388_v25 = vrot.slane %v5469_v36, 1  ;;  %1480 = vst [vmem:[%s4997_s9] sm:$0xff] %v4669_v53  ;;  %v1488_v24 = vperm.slane %v5444_v9, %v5022_v0  ;;  %v5521_v39 = vadd.f32 %v1422_v55, %v5464_v47  ;;  %v3529_v9 = vld [vmem:[#allocation13 + $0x278] sm:$0xf0] }
 0x34a   : > { %v1450_v42 = vrot.slane %v1379_v17, 4  ;;  %2155 = vmatpush.bf16.msra.mxu1 %v3424_v46  ;;  %v3794_v46 = vld [vmem:[#allocation13 + $0x14c] sm:$0xf0]  ;;  %1481 = vst [vmem:[%s4997_s9 + $0x8] sm:$0xff] %v4669_v53 }
 0x34b   : > { %v1391_v23 = vadd.f32 %v1390_v20, %v1369_v31  ;;  %v3754_v31 = vld [vmem:[#allocation13 + $0xc] sm:$0xf0]  ;;  %v3236_v20 = vor.u32 %v3756_v58, %v3233_v33  ;;  %v3359_v58 = vld [vmem:[#allocation13 + $0x120] sm:$0xf]  ;;  %2444 = vst.msk [vmem:[#allocation4] sm:$0xff] %vm2441_vm14, %v4669_v53 }
 0x34c   : > { %v1451_v48 = vadd.f32 %v1450_v42, %v1379_v17  ;;  %v3288_v17 = vor.u32 %v3771_v56, %v3287_v37  ;;  %v3216_v40 = vor.u32 %v3754_v31, %v3215_v12  ;;  %v3272_v42 = vor.u32 %v3767_v52, %v3271_v29  ;;  %v3463_v37 = vld [vmem:[#allocation13 + $0x1e8] sm:$0xf]  ;;  %v3804_v12 = vld [vmem:[#allocation13 + $0x1a4] sm:$0xf]  ;;  %v3425_v31 = vld [vmem:[#allocation13 + $0x1b0] sm:$0xf0] }
 0x34d   : > { %v1392_v7 = vrot.slane %v1391_v23, 2  ;;  %2187 = vmatpush.bf16.msra.mxu3 %v3236_v20  ;;  %v3464_v6 = vor.u32 %v3815_v19, %v3463_v37  ;;  %v4184_v29 = vld [vmem:[#allocation11 + $0x48] sm:$0xff]  ;;  %v3790_v33 = vld [vmem:[#allocation13 + $0x12c] sm:$0xf0]  ;;  %2445 = vst.msk [vmem:[#allocation4 + $0x8] sm:$0xff] %vm2441_vm14, %v4669_v53 }
 0x34e   : > { %v5455_v59 = vpop.permute.xlu1 %1330  ;;  %v1452_v14 = vrot.slane %v1451_v48, 2  ;;  %2226 = vmatpush.bf16.msrb.mxu2 %v3288_v17  ;;  %2146 = vmatpush.bf16.msra.mxu0 %v3216_v40  ;;  %v3360_v63 = vor.u32 %v3790_v33, %v3359_v58  ;;  %v1497_v58 = vperm.slane %v5451_v3, %v5022_v0  ;;  %v4189_v33 = vld [vmem:[#allocation11 + $0x70] sm:$0xff] }
 0x34f   : > { %v1376_v30 = vmul.f32 %v4182_v22, %v5455_v59  ;;  %v5472_v13 = vpop.permute.xlu0 %1315  ;;  %v5478_v34 = vadd.f32 %v1392_v7, %v1391_v23  ;;  %2156 = vmatpush.bf16.msra.mxu1 %v3408_v43  ;;  %v3217_v23 = vld [vmem:[#allocation13 + $0x10] sm:$0xf0]  ;;  %v3375_v22 = vld [vmem:[#allocation13 + $0x140] sm:$0xf]  ;;  %v3759_v7 = vld [vmem:[#allocation13 + $0x34] sm:$0xf0] }
 0x350   : > { %v5476_v51 = vadd.f32 %v1452_v14, %v1451_v48  ;;  %v5483_v18 = vmul.f32 %v4183_v26, %v5472_v13  ;;  %v3752_v48 = vld [vmem:[#allocation13 + $0x4] sm:$0xf]  ;;  %v3376_v17 = vor.u32 %v3794_v46, %v3375_v22  ;;  %v3239_v14 = vld [vmem:[#allocation13 + $0x28] sm:$0xf]  ;;  %v1485_v26 = vperm.slane %v5439_v15, %v5022_v0  ;;  %v3807_v46 = vld [vmem:[#allocation13 + $0x1b4] sm:$0xf0] }
 0x351   : > { %v1432_v61 = vrot.slane %v1376_v30, 4  ;;  %v3220_v2 = vor.u32 %v3752_v48, %v3217_v23  ;;  %v1394_v38 = vrot.slane %v5478_v34, 1  ;;  %v3240_v5 = vor.u32 %v3759_v7, %v3239_v14  ;;  %v3755_v23 = vld [vmem:[#allocation13 + $0x14] sm:$0xf0]  ;;  %v3431_v22 = vld [vmem:[#allocation13 + $0x1a8] sm:$0xf] }
 0x352   : > { %2195 = vmatpush.bf16.msrb.mxu0 %v3460_v21  ;;  %2227 = vmatpush.bf16.msrb.mxu2 %v3272_v42  ;;  %v1454_v56 = vrot.slane %v5476_v51, 1  ;;  %v1414_v50 = vrot.slane %v5483_v18, 4  ;;  %v4185_v21 = vld [vmem:[#allocation11 + $0x10] sm:$0xff]  ;;  %v4187_v42 = vld [vmem:[#allocation8] sm:$0xff]  ;;  %v3224_v19 = vor.u32 %v3755_v23, %v3223_v57  ;;  %v3432_v7 = vor.u32 %v3807_v46, %v3431_v22 }
 0x353   : > { %v5485_v11 = vadd.f32 %v1432_v61, %v1376_v30  ;;  %2157 = vmatpush.bf16.msra.mxu1 %v3392_v10  ;;  %2188 = vmatpush.bf16.msra.mxu3 %v3220_v2  ;;  %v3428_v30 = vor.u32 %v3804_v12, %v3425_v31  ;;  %v4186_v61 = vld [vmem:[#allocation8 + $0x8] sm:$0xff]  ;;  %v3800_v10 = vld [vmem:[#allocation13 + $0x184] sm:$0xf]  ;;  %v5510_v2 = vadd.f32 %v1406_v8, %v5457_v49  ;;  %v4188_v14 = vld [vmem:[#allocation11 + $0x50] sm:$0xff] }
 0x354   : > { %v5497_v20 = vpack.c.bf16 %v4186_v61, %v4187_v42  ;;  %v3412_v48 = vor.u32 %v3800_v10, %v3409_v44  ;;  %v3786_v49 = vld [vmem:[#allocation13 + $0x10c] sm:$0xf0]  ;;  %v3796_v8 = vld [vmem:[#allocation13 + $0x164] sm:$0xf]  ;;  %v5524_v62 = vadd.f32 %v1414_v50, %v5483_v18  ;;  %v3809_v42 = vld [vmem:[#allocation13 + $0x1cc] sm:$0xf]  ;;  %v5538_v57 = vadd.f32 %v1476_v45, %v5466_v32 }
 0x355   : > { %v1434_v40 = vrot.slane %v5485_v11, 2  ;;  %v3449_v18 = vld [vmem:[#allocation13 + $0x1d8] sm:$0xf0]  ;;  %v3415_v50 = vld [vmem:[#allocation13 + $0x188] sm:$0xf]  ;;  %v1487_v53 = vperm.slane %v5472_v13, %v5022_v0  ;;  %v1455_v13 = vadd.f32 %v1454_v56, %v5476_v51 }
 0x356   : > { %v5462_v60 = vpop.permute.xlu1 %1335  ;;  %2196 = vmatpush.bf16.msrb.mxu0 %v3444_v28  ;;  %2228 = vmatpush.bf16.msrb.mxu2 %v3256_v16  ;;  %v3813_v28 = vld [vmem:[#allocation13 + $0x1ec] sm:$0xf]  ;;  %v3465_v16 = vld [vmem:[#allocation13 + $0x1f8] sm:$0xf0]  ;;  %v3452_v10 = vor.u32 %v3809_v42, %v3449_v18  ;;  %v3803_v44 = vld [vmem:[#allocation13 + $0x194] sm:$0xf0] }
 0x357   : > { %2237 = vmatpush.bf16.msrb.mxu3 %v3464_v6  ;;  %v5492_v43 = vmul.f32 %v4184_v29, %v5462_v60  ;;  %2158 = vmatpush.bf16.msra.mxu1 %v3376_v17  ;;  %v5512_v37 = vpop.permute.xlu0 %1360  ;;  %v3468_v6 = vor.u32 %v3813_v28, %v3465_v16  ;;  %v3343_v17 = vld [vmem:[#allocation13 + $0x100] sm:$0xf]  ;;  %v3844_v29 = vld [vmem:[#allocation13 + $0x2e4] sm:$0xf]  ;;  %v3416_v28 = vor.u32 %v3803_v44, %v3415_v50  ;;  %v1416_v22 = vrot.slane %v5524_v62, 2 }
 0x358   : > { %2175 = vmatmul.bf16.vlgmr.msra.gmra.mxu2 %v5497_v20  ;;  %v5529_v61 = vmul.f32 %v4189_v33, %v5512_v37  ;;  %v3792_v16 = vld [vmem:[#allocation13 + $0x144] sm:$0xf]  ;;  %v3801_v42 = vld [vmem:[#allocation13 + $0x18c] sm:$0xf]  ;;  %v1490_v50 = vperm.slane %v5455_v59, %v5022_v0  ;;  %v3417_v44 = vld [vmem:[#allocation13 + $0x198] sm:$0xf0] }
 0x359   : > { %v1438_v12 = vrot.slane %v5492_v43, 4  ;;  %v3840_v45 = vld [vmem:[#allocation13 + $0x2c4] sm:$0xf]  ;;  %v5590_v59 = vadd.f32 %v1416_v22, %v5524_v62  ;;  %v3537_v22 = vld [vmem:[#allocation13 + $0x290] sm:$0xf0] }
 0x35a   : > { %2197 = vmatpush.bf16.msrb.mxu0 %v3428_v30  ;;  %2229 = vmatpush.bf16.msrb.mxu2 %v3240_v5  ;;  %v3344_v5 = vor.u32 %v3786_v49, %v3343_v17  ;;  %v1395_v17 = vadd.f32 %v1394_v38, %v5478_v34  ;;  %v3433_v49 = vld [vmem:[#allocation13 + $0x1b8] sm:$0xf0]  ;;  %v3399_v34 = vld [vmem:[#allocation13 + $0x168] sm:$0xf]  ;;  %v3799_v38 = vld [vmem:[#allocation13 + $0x174] sm:$0xf0] }
 0x35b   : > { %2238 = vmatpush.bf16.msrb.mxu3 %v3448_v54  ;;  %2159 = vmatpush.bf16.msra.mxu1 %v3360_v63  ;;  %v3393_v54 = vld [vmem:[#allocation13 + $0x170] sm:$0xf0]  ;;  %v1482_v63 = vperm.slane %v5441_v4, %v5022_v0  ;;  %v4670_v4 = vmov -1e+30  }
 0x35c   : > { %v3396_v47 = vor.u32 %v3796_v8, %v3393_v54  ;;  %2442 = vst.msk [vmem:[#allocation3] sm:$0xff] %vm2441_vm14, %v4670_v4 }
 0x35d   : > { %2443 = vst.msk [vmem:[#allocation3 + $0x8] sm:$0xff] %vm2441_vm14, %v4670_v4 }
 0x35e   : > { %v5480_v1 = vpop.permute.xlu1 %1300  ;;  %2198 = vmatpush.bf16.msrb.mxu0 %v3412_v48  ;;  %2230 = vmatpush.bf16.msrb.mxu2 %v3224_v19  ;;  %v5543_v48 = vadd.f32 %v1434_v40, %v5485_v11  ;;  %v3377_v19 = vld [vmem:[#allocation13 + $0x150] sm:$0xf0]  ;;  %v1389_v40 = vadd.f32 %v1388_v25, %v5469_v36 }
 0x35f   : > { %v5495_v52 = vmul.f32 %v4185_v21, %v5480_v1  ;;  %v3585_v21 = vld [vmem:[#allocation13 + $0x2f0] sm:$0xf0]  ;;  %2239 = vmatpush.bf16.msrb.mxu3 %v3432_v7  ;;  %2160 = vmatpush.bf16.msra.mxu1 %v3344_v5  ;;  %v3380_v32 = vor.u32 %v3792_v16, %v3377_v19  ;;  %v3805_v7 = vld [vmem:[#allocation13 + $0x1ac] sm:$0xf]  ;;  %v4190_v5 = vld [vmem:[#allocation11 + $0x20] sm:$0xff]  ;;  %v3420_v19 = vor.u32 %v3801_v42, %v3417_v44 }
 0x360   : > { %v3588_v55 = vor.u32 %v3844_v29, %v3585_v21  ;;  %v3569_v11 = vld [vmem:[#allocation13 + $0x2d0] sm:$0xf0]  ;;  %v3436_v25 = vor.u32 %v3805_v7, %v3433_v49  ;;  %v3400_v29 = vor.u32 %v3799_v38, %v3399_v34  ;;  %v3788_v21 = vld [vmem:[#allocation13 + $0x124] sm:$0xf]  ;;  %v5581_v18 = vsel %vm800_vm0, %v1395_v17, %v1389_v40  ;;  %v3367_v42 = vld [vmem:[#allocation13 + $0x128] sm:$0xf] }
 0x361   : > { %v1396_v31 = vrot.slane %v5495_v52, 4  ;;  %v3572_v36 = vor.u32 %v3840_v45, %v3569_v11  ;;  %v1517_v45 = vld [vmem:[#allocation5 + $0x8] sm:$0xff]  ;;  %v3784_v11 = vld [vmem:[#allocation13 + $0x104] sm:$0xf]  ;;  %v3345_v7 = vld [vmem:[#allocation13 + $0x110] sm:$0xf0] }
 0x362   : > { %2279 = vmatpush.bf16.msra.mxu2 %v3468_v6  ;;  %v1483_v6 = vperm.slane %v5446_v35, %v5022_v0  ;;  %2199 = vmatpush.bf16.msrb.mxu0 %v3396_v47  ;;  %v1468_v35 = vrot.slane %v5529_v61, 4  ;;  %v3832_v49 = vld [vmem:[#allocation13 + $0x284] sm:$0xf]  ;;  %v3348_v62 = vor.u32 %v3784_v11, %v3345_v7 }
 0x363   : > { %2209 = vmatpush.bf16.msrb.mxu1 %v3588_v55  ;;  %v5565_v8 = vadd.f32 %v1396_v31, %v5495_v52  ;;  %2240 = vmatpush.bf16.msrb.mxu3 %v3416_v28  ;;  %v3361_v52 = vld [vmem:[#allocation13 + $0x130] sm:$0xf0]  ;;  %v1493_v31 = vperm.slane %v5449_v41, %v5022_v0  ;;  %v3836_v55 = vld [vmem:[#allocation13 + $0x2a4] sm:$0xf]  ;;  %v3795_v28 = vld [vmem:[#allocation13 + $0x154] sm:$0xf0] }
 0x364   : > { %v5576_v33 = vsel %vm800_vm0, %v1483_v6, %v1482_v63  ;;  %v3364_v47 = vor.u32 %v3788_v21, %v3361_v52  ;;  %v5604_v21 = vadd.f32 %v1468_v35, %v5529_v61  ;;  %v3521_v61 = vld [vmem:[#allocation13 + $0x270] sm:$0xf0] }
 0x365   : > { %v1398_v16 = vrot.slane %v5565_v8, 2 }
 0x366   : > { %v5499_v27 = vpop.permute.xlu1 %1340  ;;  %2280 = vmatpush.bf16.msra.mxu2 %v3452_v10  ;;  %2200 = vmatpush.bf16.msrb.mxu0 %v3380_v32  ;;  %v1491_v10 = vperm.slane %v5462_v60, %v5022_v0  ;;  %v1516_v32 = vld [vmem:[#allocation5] sm:$0xff] }
 0x367   : > { %v1378_v30 = vmul.f32 %v4188_v14, %v5499_v27  ;;  %v5560_v14 = vadd.f32 %v1438_v12, %v5492_v43  ;;  %v1436_v43 = vrot.slane %v5543_v48, 1  ;;  %2210 = vmatpush.bf16.msrb.mxu1 %v3572_v36  ;;  %2241 = vmatpush.bf16.msrb.mxu3 %v3400_v29  ;;  %v5593_v17 = vpack.c.bf16 %v1517_v45, %v1516_v32  ;;  %v3847_v29 = vld [vmem:[#allocation13 + $0x2f4] sm:$0xf0]  ;;  %v3828_v32 = vld [vmem:[#allocation13 + $0x264] sm:$0xf] }
 0x368   : > { %v1496_v36 = vperm.slane %v5512_v37, %v5022_v0  ;;  %v1492_v34 = vperm.slane %v5499_v27, %v5022_v0  ;;  %v1505_v52 = vsel %vm800_vm0, %v1491_v10, %v1490_v50  ;;  %v3401_v27 = vld [vmem:[#allocation13 + $0x178] sm:$0xf0]  ;;  %v3575_v45 = vld [vmem:[#allocation13 + $0x2c8] sm:$0xf]  ;;  %v1470_v37 = vrot.slane %v5604_v21, 2 }
 0x369   : > { %v1444_v23 = vrot.slane %v1378_v30, 4  ;;  %v1440_v4 = vrot.slane %v5560_v14, 2  ;;  %2147 = vmatmul.bf16.vlgmr.msra.gmra.mxu0 %v5593_v17  ;;  %2189 = vmatmul.bf16.vlgmr.msra.gmra.mxu3 %v5593_v17 }
 0x36a   : > { %2281 = vmatpush.bf16.msra.mxu2 %v3436_v25  ;;  %v1484_v25 = vperm.slane %v5480_v1, %v5022_v0  ;;  %2201 = vmatpush.bf16.msrb.mxu0 %v3364_v47  ;;  %v3797_v1 = vld [vmem:[#allocation13 + $0x16c] sm:$0xf]  ;;  %v3540_v47 = vor.u32 %v3832_v49, %v3537_v22  ;;  %v3524_v22 = vor.u32 %v3828_v32, %v3521_v61  ;;  %v3577_v61 = vld [vmem:[#allocation13 + $0x2d8] sm:$0xf0] }
 0x36b   : > { %v5570_v12 = vadd.f32 %v1444_v23, %v1378_v30  ;;  %v3553_v30 = vld [vmem:[#allocation13 + $0x2b0] sm:$0xf0]  ;;  %v3383_v23 = vld [vmem:[#allocation13 + $0x148] sm:$0xf]  ;;  %v5610_v35 = vadd.f32 %v1440_v4, %v5560_v14  ;;  %2231 = vmatmul.bf16.vlgmr.msrb.gmra.mxu2 %v5593_v17  ;;  %v1506_v14 = vsel %vm802_vm1, %v1492_v34, %v1505_v52  ;;  %v3385_v4 = vld [vmem:[#allocation13 + $0x158] sm:$0xf0] }
 0x36c   : > { %v3556_v63 = vor.u32 %v3836_v55, %v3553_v30  ;;  %v3384_v6 = vor.u32 %v3795_v28, %v3383_v23  ;;  %v4191_v55 = vld [vmem:[#allocation11 + $0x60] sm:$0xff]  ;;  %v3404_v23 = vor.u32 %v3797_v1, %v3401_v27  ;;  %v3791_v28 = vld [vmem:[#allocation13 + $0x134] sm:$0xf0]  ;;  %v1499_v11 = vsel %vm802_vm1, %v1484_v25, %v5576_v33  ;;  %v3505_v34 = vld [vmem:[#allocation13 + $0x250] sm:$0xf0] }
 0x36d   : > { %v1446_v60 = vrot.slane %v5570_v12, 2  ;;  %v3824_v25 = vld [vmem:[#allocation13 + $0x244] sm:$0xf]  ;;  %v3839_v27 = vld [vmem:[#allocation13 + $0x2b4] sm:$0xf0] }
 0x36e   : > { %v5549_v46 = vpop.permute.xlu1 %1310  ;;  %2211 = vmatpush.bf16.msrb.mxu1 %v3556_v63  ;;  %2282 = vmatpush.bf16.msra.mxu2 %v3420_v19  ;;  %v3368_v63 = vor.u32 %v3791_v28, %v3367_v42  ;;  %v3843_v19 = vld [vmem:[#allocation13 + $0x2d4] sm:$0xf0]  ;;  %v3789_v42 = vld [vmem:[#allocation13 + $0x12c] sm:$0xf]  ;;  %v3369_v28 = vld [vmem:[#allocation13 + $0x138] sm:$0xf0] }
 0x36f   : > { %v1372_v54 = vmul.f32 %v4190_v5, %v5549_v46  ;;  %v3591_v5 = vld [vmem:[#allocation13 + $0x2e8] sm:$0xf]  ;;  %2242 = vmatpush.bf16.msrb.mxu3 %v3384_v6  ;;  %v5617_v6 = vadd.f32 %v1398_v16, %v5565_v8  ;;  %v5622_v7 = vadd.f32 %v1446_v60, %v5570_v12  ;;  %2202 = vmatpush.bf16.msrb.mxu0 %v3348_v62  ;;  %v3845_v8 = vld [vmem:[#allocation13 + $0x2ec] sm:$0xf]  ;;  %v3593_v16 = vld [vmem:[#allocation13 + $0x2f8] sm:$0xf0] }
 0x370   : > { %v3592_v44 = vor.u32 %v3847_v29, %v3591_v5  ;;  %v3576_v5 = vor.u32 %v3843_v19, %v3575_v45  ;;  %v3787_v29 = vld [vmem:[#allocation13 + $0x114] sm:$0xf0]  ;;  %v3559_v62 = vld [vmem:[#allocation13 + $0x2a8] sm:$0xf]  ;;  %v3596_v1 = vor.u32 %v3845_v8, %v3593_v16  ;;  %v3841_v32 = vld [vmem:[#allocation13 + $0x2cc] sm:$0xf] }
 0x371   : > { %v1408_v40 = vrot.slane %v1372_v54, 4  ;;  %v3560_v15 = vor.u32 %v3839_v27, %v3559_v62  ;;  %v3489_v45 = vld [vmem:[#allocation13 + $0x230] sm:$0xf0]  ;;  %v1400_v41 = vrot.slane %v5617_v6, 1  ;;  %v3353_v8 = vld [vmem:[#allocation13 + $0x118] sm:$0xf0] }
 0x372   : > { %2212 = vmatpush.bf16.msrb.mxu1 %v3540_v47  ;;  %2283 = vmatpush.bf16.msra.mxu2 %v3404_v23  ;;  %v1500_v47 = vsel %vm804_vm2, %v1485_v26, %v1499_v11  ;;  %v3508_v23 = vor.u32 %v3824_v25, %v3505_v34  ;;  %v3820_v26 = vld [vmem:[#allocation13 + $0x224] sm:$0xf]  ;;  %v3372_v11 = vor.u32 %v3789_v42, %v3369_v28  ;;  %v3561_v34 = vld [vmem:[#allocation13 + $0x2b8] sm:$0xf0] }
 0x373   : > { %v5612_v50 = vadd.f32 %v1408_v40, %v1372_v54  ;;  %v3793_v54 = vld [vmem:[#allocation13 + $0x14c] sm:$0xf]  ;;  %v3351_v40 = vld [vmem:[#allocation13 + $0x108] sm:$0xf]  ;;  %2251 = vmatpush.bf16.msra.mxu0 %v3592_v44  ;;  %2243 = vmatpush.bf16.msrb.mxu3 %v3368_v63  ;;  %v1507_v44 = vsel %vm804_vm2, %v1493_v31, %v1506_v14  ;;  %v1448_v31 = vrot.slane %v5622_v7, 1  ;;  %v1401_v27 = vadd.f32 %v1400_v41, %v5617_v6 }
 0x374   : > { %v3388_v12 = vor.u32 %v3793_v54, %v3385_v4  ;;  %v3352_v60 = vor.u32 %v3787_v29, %v3351_v40  ;;  %v4192_v63 = vld [vmem:[#allocation11 + $0x68] sm:$0xff]  ;;  %v3835_v54 = vld [vmem:[#allocation13 + $0x294] sm:$0xf0]  ;;  %v3816_v62 = vld [vmem:[#allocation13 + $0x204] sm:$0xf] }
 0x375   : > { %v1410_v52 = vrot.slane %v5612_v50, 2  ;;  %v3543_v14 = vld [vmem:[#allocation13 + $0x288] sm:$0xf]  ;;  %v3785_v29 = vld [vmem:[#allocation13 + $0x10c] sm:$0xf]  ;;  %v1449_v3 = vadd.f32 %v1448_v31, %v5622_v7  ;;  %v1535_v56 = vsel %vm802_vm1, %v1401_v27, %v5581_v18 }
 0x376   : > { %v5601_v38 = vpop.permute.xlu1 %1350  ;;  %2213 = vmatpush.bf16.msrb.mxu1 %v3524_v22  ;;  %2284 = vmatpush.bf16.msra.mxu2 %v3388_v12  ;;  %v3492_v12 = vor.u32 %v3820_v26, %v3489_v45  ;;  %v3356_v42 = vor.u32 %v3785_v29, %v3353_v8  ;;  %v3833_v6 = vld [vmem:[#allocation13 + $0x28c] sm:$0xf]  ;;  %v3511_v26 = vld [vmem:[#allocation13 + $0x248] sm:$0xf]  ;;  %v3827_v45 = vld [vmem:[#allocation13 + $0x254] sm:$0xf0]  ;;  %v1536_v18 = vsel %vm804_vm2, %v5510_v2, %v1535_v56 }
 0x377   : > { %v1380_v30 = vmul.f32 %v4191_v55, %v5601_v38  ;;  %v1494_v33 = vperm.slane %v5601_v38, %v5022_v0  ;;  %v1486_v55 = vperm.slane %v5549_v46, %v5022_v0  ;;  %v5633_v38 = vadd.f32 %v1436_v43, %v5543_v48  ;;  %2252 = vmatpush.bf16.msra.mxu0 %v3576_v5 }
 0x378   : > { %2244 = vmatpush.bf16.msrb.mxu3 %v3352_v60  ;;  %v3580_v5 = vor.u32 %v3841_v32, %v3577_v61  ;;  %v1411_v16 = vadd.f32 %v1410_v52, %v5612_v50  ;;  %v3837_v60 = vld [vmem:[#allocation13 + $0x2ac] sm:$0xf]  ;;  %v3544_v50 = vor.u32 %v3835_v54, %v3543_v14  ;;  %v3527_v52 = vld [vmem:[#allocation13 + $0x268] sm:$0xf]  ;;  %v3545_v61 = vld [vmem:[#allocation13 + $0x298] sm:$0xf0] }
 0x379   : > { %v1456_v10 = vrot.slane %v1380_v30, 4  ;;  %v1508_v19 = vsel %vm806_vm3, %v1494_v33, %v1507_v44  ;;  %v1501_v4 = vsel %vm806_vm3, %v1486_v55, %v1500_v47  ;;  %v3564_v44 = vor.u32 %v3837_v60, %v3561_v34  ;;  %v3825_v34 = vld [vmem:[#allocation13 + $0x24c] sm:$0xf] }
 0x37a   : > { %2214 = vmatpush.bf16.msrb.mxu1 %v3508_v23  ;;  %2285 = vmatpush.bf16.msra.mxu2 %v3372_v11  ;;  %v3548_v51 = vor.u32 %v3833_v6, %v3545_v61 }
 0x37b   : > { %v1457_v49 = vadd.f32 %v1456_v10, %v1380_v30  ;;  %v1442_v10 = vrot.slane %v5610_v35, 1  ;;  %2253 = vmatpush.bf16.msra.mxu0 %v3560_v15 }
 0x37c   : > { %2293 = vmatpush.bf16.msra.mxu3 %v3596_v1 }
 0x37d   : > { %v1458_v30 = vrot.slane %v1457_v49, 2 }
 0x37e   : > { %v1356_v46 = vpop.permute.xlu1 %1355  ;;  %2215 = vmatpush.bf16.msrb.mxu1 %v3492_v12  ;;  %2286 = vmatpush.bf16.msra.mxu2 %v3356_v42 }
 0x37f   : > { %v1381_v48 = vmul.f32 %v4192_v63, %v1356_v46  ;;  %v1495_v43 = vperm.slane %v1356_v46, %v5022_v0  ;;  %v1459_v25 = vadd.f32 %v1458_v30, %v1457_v49  ;;  %v3473_v49 = vld [vmem:[#allocation13 + $0x210] sm:$0xf0]  ;;  %v3831_v30 = vld [vmem:[#allocation13 + $0x274] sm:$0xf0]  ;;  %v1412_v46 = vrot.slane %v1411_v16, 1  ;;  %2254 = vmatpush.bf16.msra.mxu0 %v3544_v50 }
 0x380   : > { %2294 = vmatpush.bf16.msra.mxu3 %v3580_v5  ;;  %v3528_v32 = vor.u32 %v3831_v30, %v3527_v52  ;;  %v4193_v63 = vld [vmem:[#allocation11 + $0x38] sm:$0xff]  ;;  %v3479_v52 = vld [vmem:[#allocation13 + $0x208] sm:$0xf] }
 0x381   : > { %v1462_v40 = vrot.slane %v1381_v48, 4  ;;  %v1509_v22 = vsel %vm808_vm4, %v1495_v43, %v1508_v19  ;;  %v1460_v23 = vrot.slane %v1459_v25, 1  ;;  %v3823_v5 = vld [vmem:[#allocation13 + $0x234] sm:$0xf0] }
 0x382   : > { %v1510_v33 = vsel %vm6099_vm7, %v1496_v36, %v1509_v22  ;;  %v1443_v36 = vadd.f32 %v1442_v10, %v5610_v35  ;;  %v3476_v35 = vor.u32 %v3816_v62, %v3473_v49  ;;  %v3495_v22 = vld [vmem:[#allocation13 + $0x228] sm:$0xf]  ;;  %v3513_v62 = vld [vmem:[#allocation13 + $0x258] sm:$0xf0]  ;;  %v3819_v30 = vld [vmem:[#allocation13 + $0x214] sm:$0xf0] }
 0x383   : > { %v1463_v55 = vadd.f32 %v1462_v40, %v1381_v48  ;;  %v1511_v1 = vsel %vm6100_vm8, %v1497_v58, %v1510_v33  ;;  %v1502_v58 = vsel %vm808_vm4, %v1487_v53, %v1501_v4  ;;  %v1471_v53 = vadd.f32 %v1470_v37, %v5604_v21  ;;  %2255 = vmatpush.bf16.msra.mxu0 %v3528_v32 }
 0x384   : > { %1515 = vst.msk [vmem:[%s4997_s9 + $0x8] sm:$0xff] %vm6101_vm10, %v1511_v1  ;;  %v1541_v43 = vsel %vm800_vm0, %v1443_v36, %v5633_v38  ;;  %v1503_v15 = vsel %vm6102_vm9, %v1488_v24, %v1502_v58  ;;  %2295 = vmatpush.bf16.msra.mxu3 %v3564_v44  ;;  %v1413_v38 = vadd.f32 %v1412_v46, %v1411_v16  ;;  %vm6104_vm0 = vmmov %vm6101_vm10  ;;  %v1418_v24 = vrot.slane %v5590_v59, 1  ;;  %v3781_v58 = vld [vmem:[#allocation13 + $0xec] sm:$0xf]  ;;  %v3337_v44 = vld [vmem:[#allocation13 + $0xf8] sm:$0xf0] }
 0x385   : > { %v1464_v47 = vrot.slane %v1463_v55, 2  ;;  %v1542_v21 = vsel %vm802_vm1, %v1449_v3, %v1541_v43  ;;  %v1461_v11 = vadd.f32 %v1460_v23, %v1459_v25  ;;  %2216 = vmatpush.bf16.msrb.mxu1 %v3476_v35  ;;  %v3512_v4 = vor.u32 %v3827_v45, %v3511_v26  ;;  %vm6105_vm1 = vmmov %vm6099_vm7  ;;  %v3821_v23 = vld [vmem:[#allocation13 + $0x22c] sm:$0xf] }
 0x386   : > { %v1326_v28 = vpop.permute.xlu1 %1325  ;;  %v1472_v40 = vrot.slane %v1471_v53, 1  ;;  %v1543_v29 = vsel %vm804_vm2, %v1455_v13, %v1542_v21  ;;  %v1424_v25 = vrot.slane %v5521_v39, 1  ;;  %v1478_v33 = vrot.slane %v5538_v57, 1  ;;  %vm6106_vm2 = vmmov %vm6105_vm1  ;;  %v3773_v43 = vld [vmem:[#allocation13 + $0xac] sm:$0xf] }
 0x387   : > { %v1465_v10 = vadd.f32 %v1464_v47, %v1463_v55  ;;  %v1375_v48 = vmul.f32 %v4193_v63, %v1326_v28  ;;  %v1489_v7 = vperm.slane %v1326_v28, %v5022_v0  ;;  %v3829_v0 = vld [vmem:[#allocation13 + $0x26c] sm:$0xf]  ;;  %v1537_v12 = vsel %vm806_vm3, %v1413_v38, %v1536_v18  ;;  %2256 = vmatpush.bf16.msra.mxu0 %v3512_v4  ;;  %v3497_v28 = vld [vmem:[#allocation13 + $0x238] sm:$0xf0] }
 0x388   : > { %2296 = vmatpush.bf16.msra.mxu3 %v3548_v51  ;;  %v3532_v16 = vor.u32 %v3829_v0, %v3529_v9  ;;  %v1544_v60 = vsel %vm806_vm3, %v1461_v11, %v1543_v29  ;;  %v1419_v55 = vadd.f32 %v1418_v24, %v5590_v59  ;;  %v3496_v50 = vor.u32 %v3823_v5, %v3495_v22  ;;  %vm6107_vm3 = vmmov %vm6103_vm5  ;;  %v3769_v45 = vld [vmem:[#allocation13 + $0x8c] sm:$0xf]  ;;  %v3273_v51 = vld [vmem:[#allocation13 + $0x78] sm:$0xf0] }
 0x389   : > { %v1466_v41 = vrot.slane %v1465_v10, 1  ;;  %v1426_v31 = vrot.slane %v1375_v48, 4  ;;  %v1504_v19 = vsel %vm6103_vm5, %v1489_v7, %v1503_v15  ;;  %v1473_v49 = vadd.f32 %v1472_v40, %v1471_v53  ;;  %v3481_v7 = vld [vmem:[#allocation13 + $0x218] sm:$0xf0]  ;;  %v3761_v21 = vld [vmem:[#allocation13 + $0x4c] sm:$0xf] }
 0x38a   : > { %1514 = vst.msk [vmem:[%s4997_s9] sm:$0xff] %vm6104_vm0, %v1504_v19  ;;  %v1538_v36 = vsel %vm808_vm4, %v1419_v55, %v1537_v12  ;;  %v3516_v27 = vor.u32 %v3825_v34, %v3513_v62  ;;  %v1425_v42 = vadd.f32 %v1424_v25, %v5521_v39  ;;  %v1479_v59 = vadd.f32 %v1478_v33, %v5538_v57  ;;  %v3817_v57 = vld [vmem:[#allocation13 + $0x20c] sm:$0xf]  ;;  %v3305_v15 = vld [vmem:[#allocation13 + $0xb8] sm:$0xf0] }
 0x38b   : > { %v1467_v14 = vadd.f32 %v1466_v41, %v1465_v10  ;;  %v1427_v54 = vadd.f32 %v1426_v31, %v1375_v48  ;;  %2257 = vmatpush.bf16.msra.mxu0 %v3496_v50  ;;  %v3480_v46 = vor.u32 %v3819_v30, %v3479_v52  ;;  %v3340_v39 = vor.u32 %v3781_v58, %v3337_v44  ;;  %v3777_v10 = vld [vmem:[#allocation13 + $0xcc] sm:$0xf]  ;;  %v3321_v48 = vld [vmem:[#allocation13 + $0xd8] sm:$0xf0]  ;;  %v5710_v40 = vld [vmem:[%s6109_s20] sm:$0xf] }
 0x38c   : > { %2297 = vmatpush.bf16.msra.mxu3 %v3532_v16  ;;  %v1539_v35 = vsel %vm6106_vm2, %v1425_v42, %v1538_v36  ;;  %v3500_v63 = vor.u32 %v3821_v23, %v3497_v28  ;;  %v3324_v13 = vor.u32 %v3777_v10, %v3321_v48  ;;  %v3484_v53 = vor.u32 %v3817_v57, %v3481_v7  ;;  %v3289_v41 = vld [vmem:[#allocation13 + $0x98] sm:$0xf0]  ;;  %v3765_v19 = vld [vmem:[#allocation13 + $0x6c] sm:$0xf] }
 0x38d   : > { %v1428_v8 = vrot.slane %v1427_v54, 2  ;;  %v1545_v1 = vsel %vm808_vm4, %v1467_v14, %v1544_v60  ;;  %vm6108_vm4 = vmmov %vm6107_vm3  ;;  %v3308_v26 = vor.u32 %v3773_v43, %v3305_v15  ;;  %v3292_v31 = vor.u32 %v3769_v45, %v3289_v41  ;;  %v3257_v38 = vld [vmem:[#allocation13 + $0x58] sm:$0xf0]  ;;  %v3757_v0 = vld [vmem:[#allocation13 + $0x2c] sm:$0xf] }
 0x38e   : > { %v1546_v3 = vsel %vm6105_vm1, %v1473_v49, %v1545_v1  ;;  %v3276_v56 = vor.u32 %v3765_v19, %v3273_v51  ;;  %v3260_v11 = vor.u32 %v3761_v21, %v3257_v38  ;;  %v3241_v9 = vld [vmem:[#allocation13 + $0x38] sm:$0xf0]  ;;  %v3753_v14 = vld [vmem:[#allocation13 + $0xc] sm:$0xf]  ;;  %v1651_v5 = vperm.slane %v5710_v40, 0 }
 0x38f   : > { %v1429_v2 = vadd.f32 %v1428_v8, %v1427_v54  ;;  %v1547_v6 = vsel %vm6108_vm4, %v1479_v59, %v1546_v3  ;;  %2258 = vmatpush.bf16.msra.mxu0 %v3480_v46  ;;  %v3244_v24 = vor.u32 %v3757_v0, %v3241_v9  ;;  %v3225_v54 = vld [vmem:[#allocation13 + $0x18] sm:$0xf0] }
 0x390   : > { %2298 = vmatpush.bf16.msra.mxu3 %v3516_v27  ;;  %v3228_v4 = vor.u32 %v3753_v14, %v3225_v54 }
 0x391   : > { %v1430_v37 = vrot.slane %v1429_v2, 1 }
 0x393   : > { %v1431_v47 = vadd.f32 %v1430_v37, %v1429_v2 }
 0x394   : > { %2299 = vmatpush.bf16.msra.mxu3 %v3500_v63 }
 0x395   : > { %v1540_v32 = vsel %vm6107_vm3, %v1431_v47, %v1539_v35 }
 0x396   : > { %v1551_v61 = vpack.c.bf16 %v1547_v6, %v1540_v32 }
 0x398   : > { %2161 = vmatmul.bf16.vlgmr.msra.gmra.mxu1 %v1551_v61  ;;  %2203 = vmatmul.bf16.vlgmr.msrb.gmra.mxu0 %v1551_v61 }
 0x399   : > { %2245 = vmatmul.bf16.vlgmr.msrb.gmra.mxu3 %v1551_v61  ;;  %2287 = vmatmul.bf16.vlgmr.msra.gmra.mxu2 %v1551_v61 }
 0x39a   : > { %2265 = vmatpush.bf16.msra.mxu1 %v3340_v39  ;;  %2300 = vmatpush.bf16.msra.mxu3 %v3484_v53  ;;  %v1653_v39 = vperm.slane %v5710_v40, 2 }
 0x39e   : > { %2266 = vmatpush.bf16.msra.mxu1 %v3324_v13 }
 0x3a2   : > { %2267 = vmatpush.bf16.msra.mxu1 %v3308_v26  ;;  %v1654_v26 = vperm.slane %v5710_v40, 3 }
 0x3a6   : > { %2268 = vmatpush.bf16.msra.mxu1 %v3292_v31 }
 0x3a8   : > { %2217 = vmatmul.bf16.vlgmr.msrb.gmra.mxu1 %v5497_v20  ;;  %2259 = vmatmul.bf16.vlgmr.msra.gmra.mxu0 %v5497_v20 }
 0x3a9   : > { %2301 = vmatmul.bf16.vlgmr.msra.gmra.mxu3 %v5497_v20 }
 0x3aa   : > { %2269 = vmatpush.bf16.msra.mxu1 %v3276_v56 }
 0x3ae   : > { %2270 = vmatpush.bf16.msra.mxu1 %v3260_v11 }
 0x3b2   : > { %2271 = vmatpush.bf16.msra.mxu1 %v3244_v24 }
 0x3b6   : > { %2272 = vmatpush.bf16.msra.mxu1 %v3228_v4 }
 0x3b9   : > { %2273 = vmatmul.bf16.vlgmr.msra.gmra.mxu1 %v5593_v17  ;;  %v1652_v17 = vperm.slane %v5710_v40, 1 }
 0x3db   : > { %v2176_v20 = vpop.f32.mrf.mxu2 }
 0x3e3   : > { %v2178_v33 = vpop.f32.mrf.mxu2 }
 0x3e6   : > { %v2148_v22 = vpop.f32.mrf.mxu0 }
 0x3e7   : > { %v2149_v18 = vadd.f32 %v2148_v22, %v1651_v5 }
 0x3ec   : > { %v2190_v29 = vpop.f32.mrf.mxu3 }
 0x3ed   : > { %v2191_v50 = vadd.f32 %v2190_v29, %v1652_v17 }
 0x3ee   : > { %v2150_v8 = vpop.f32.mrf.mxu0  ;;  %v2232_v30 = vpop.f32.mrf.mxu2 }
 0x3ef   : > { %v2151_v60 = vadd.f32 %v2150_v8, %v1651_v5  ;;  %v2233_v53 = vadd.f32 %v2232_v30, %v1653_v39 }
 0x3f4   : > { %v2192_v62 = vpop.f32.mrf.mxu3 }
 0x3f5   : > { %v2193_v46 = vadd.f32 %v2192_v62, %v1652_v17 }
 0x3f6   : > { %v2234_v35 = vpop.f32.mrf.mxu2 }
 0x3f7   : > { %v2235_v38 = vadd.f32 %v2234_v35, %v1653_v39 }
 0x415   : > { %v2162_v16 = vpop.f32.mrf.mxu1  ;;  %v2204_v2 = vpop.f32.mrf.mxu0 }
 0x416   : > { %v2163_v25 = vadd.f32 %v2162_v16, %v2149_v18  ;;  %v2205_v27 = vadd.f32 %v2204_v2, %v2191_v50 }
 0x418   : > { %v2177_v12 = vadd.f32 %v2176_v20, %v2163_v25 }
 0x41a   : > { %v3597_v34 = vmul.f32 -1.442695, %v2177_v12 }
 0x41c   : > { %4144 = vpow2.f32 %v3597_v34  ;;  %v2246_v3 = vpop.f32.mrf.mxu3  ;;  %v2288_v31 = vpop.f32.mrf.mxu2 }
 0x41d   : > { %v2164_v55 = vpop.f32.mrf.mxu1  ;;  %v2206_v47 = vpop.f32.mrf.mxu0  ;;  %v2247_v41 = vadd.f32 %v2246_v3, %v2233_v53 }
 0x41e   : > { %v2165_v1 = vadd.f32 %v2164_v55, %v2151_v60  ;;  %v2207_v32 = vadd.f32 %v2206_v47, %v2193_v46 }
 0x420   : > { %v2179_v49 = vadd.f32 %v2178_v33, %v2165_v1 }
 0x422   : > { %v4145_v52 = vpop.eup %4144  ;;  %v3598_v37 = vmul.f32 -1.442695, %v2179_v49 }
 0x423   : > { %v5714_v36 = vadd.f32 1.0, %v4145_v52 }
 0x424   : > { %4146 = vpow2.f32 %v3598_v37  ;;  %v2248_v48 = vpop.f32.mrf.mxu3  ;;  %v2290_v2 = vpop.f32.mrf.mxu2  ;;  %v636_v37 = vld [vmem:[#allocation10] sm:$0xff] }
 0x425   : > { %4148 = vrcp.f32 %v5714_v36  ;;  %v2218_v42 = vpop.f32.mrf.mxu1  ;;  %v2260_v15 = vpop.f32.mrf.mxu0  ;;  %vm2320_vm15 = vweird.f32 %v5714_v36  ;;  %v2324_v22 = vand.u32 2147483647, %v5714_v36  ;;  %v2326_v20 = vand.u32 2147483648, %v5714_v36 }
 0x426   : > { %v2219_v58 = vadd.f32 %v2218_v42, %v2205_v27  ;;  %v2261_v11 = vadd.f32 %v2260_v15, %v2247_v41  ;;  %v2249_v5 = vadd.f32 %v2248_v48, %v2235_v38  ;;  %v637_v41 = vld [vmem:[#allocation10 + $0x8] sm:$0xff] }
 0x427   : > { %vm2325_vm12 = vcmp.eq.f32.partialorder %v2324_v22, 8.507059e+37  ;;  %v2327_v55 = vor.u32 1.1754944e-38, %v2326_v20 }
 0x428   : > { %v3599_v59 = vmul.f32 -1.442695, %v2219_v58 }
 0x42a   : > { %v4147_v44 = vpop.eup %4146  ;;  %4150 = vpow2.f32 %v3599_v59 }
 0x42b   : > { %v5717_v23 = vpop.eup %4148  ;;  %v5719_v28 = vadd.f32 1.0, %v4147_v44 }
 0x42c   : > { %v2316_v6 = vmul.f32 %v5717_v23, %v5714_v36  ;;  %v2302_v0 = vpop.f32.mrf.mxu3  ;;  %vm2321_vm13 = vweird.f32 %v5717_v23 }
 0x42d   : > { %4152 = vrcp.f32 %v5719_v28  ;;  %v2220_v61 = vpop.f32.mrf.mxu1  ;;  %vm5739_vm6 = vmor %vm2320_vm15, %vm2321_vm13  ;;  %v2262_v12 = vpop.f32.mrf.mxu0  ;;  %vm2335_vm9 = vweird.f32 %v5719_v28  ;;  %v2341_v46 = vand.u32 2147483648, %v5719_v28 }
 0x42e   : > { %v2221_v10 = vadd.f32 %v2220_v61, %v2207_v32  ;;  %v2317_v7 = vsub.f32 1.0, %v2316_v6  ;;  %v2263_v49 = vadd.f32 %v2262_v12, %v2249_v5  ;;  %v2339_v61 = vand.u32 2147483647, %v5719_v28 }
 0x42f   : > { %v2342_v53 = vor.u32 1.1754944e-38, %v2341_v46 }
 0x430   : > { %v4151_v63 = vpop.eup %4150  ;;  %v3600_v57 = vmul.f32 -1.442695, %v2221_v10  ;;  %v2318_v45 = vmul.f32 %v5717_v23, %v2317_v7  ;;  %vm2340_vm2 = vcmp.eq.f32.partialorder %v2339_v61, 8.507059e+37 }
 0x431   : > { %v2351_v13 = vadd.f32 1.0, %v4151_v63 }
 0x432   : > { %4154 = vpow2.f32 %v3600_v57  ;;  %v2319_v24 = vadd.f32 %v5717_v23, %v2318_v45 }
 0x433   : > { %v5725_v43 = vpop.eup %4152  ;;  %4156 = vrcp.f32 %v2351_v13  ;;  %v2364_v16 = vand.u32 2147483648, %v2351_v13  ;;  %v2362_v33 = vand.u32 2147483647, %v2351_v13  ;;  %vm2358_vm14 = vweird.f32 %v2351_v13 }
 0x434   : > { %v2331_v19 = vmul.f32 %v5725_v43, %v5719_v28  ;;  %v2323_v25 = vsel %vm5739_vm6, %v5717_v23, %v2319_v24  ;;  %vm2336_vm8 = vweird.f32 %v5725_v43  ;;  %v2304_v59 = vpop.f32.mrf.mxu3 }
 0x435   : > { %v2365_v30 = vor.u32 1.1754944e-38, %v2364_v16  ;;  %v2328_v36 = vsel %vm2325_vm12, %v2327_v55, %v2323_v25  ;;  %vm2363_vm10 = vcmp.eq.f32.partialorder %v2362_v33, 8.507059e+37  ;;  %vm5756_vm5 = vmor %vm2335_vm9, %vm2336_vm8 }
 0x436   : > { %v2274_v51 = vpop.f32.mrf.mxu1  ;;  %v2332_v4 = vsub.f32 1.0, %v2331_v19 }
 0x437   : > { %v2275_v56 = vadd.f32 %v2274_v51, %v1654_v26 }
 0x438   : > { %v4155_v21 = vpop.eup %4154  ;;  %v2333_v34 = vmul.f32 %v5725_v43, %v2332_v4 }
 0x439   : > { %v4157_v9 = vpop.eup %4156  ;;  %v5733_v14 = vadd.f32 1.0, %v4155_v21  ;;  %v2289_v54 = vadd.f32 %v2288_v31, %v2275_v56 }
 0x43a   : > { %v2354_v40 = vmul.f32 %v4157_v9, %v2351_v13  ;;  %vm2359_vm11 = vweird.f32 %v4157_v9  ;;  %v2334_v58 = vadd.f32 %v5725_v43, %v2333_v34 }
 0x43b   : > { %4158 = vrcp.f32 %v5733_v14  ;;  %v2303_v8 = vadd.f32 %v2302_v0, %v2289_v54  ;;  %vm2360_vm7 = vmor %vm2358_vm14, %vm2359_vm11  ;;  %v2379_v39 = vand.u32 2147483648, %v5733_v14  ;;  %v2377_v63 = vand.u32 2147483647, %v5733_v14 }
 0x43c   : > { %v2355_v18 = vsub.f32 1.0, %v2354_v40  ;;  %4160 = vtanh.f32 %v2261_v11  ;;  %v2338_v28 = vsel %vm5756_vm5, %v5725_v43, %v2334_v58  ;;  %vm2373_vm1 = vweird.f32 %v5733_v14 }
 0x43d   : > { %v3601_v17 = vmul.f32 -1.442695, %v2303_v8  ;;  %v2380_v45 = vor.u32 1.1754944e-38, %v2379_v39  ;;  %v2343_v31 = vsel %vm2340_vm2, %v2342_v53, %v2338_v28  ;;  %vm2378_vm4 = vcmp.eq.f32.partialorder %v2377_v63, 8.507059e+37 }
 0x43e   : > { %v2356_v60 = vmul.f32 %v4157_v9, %v2355_v18  ;;  %v2276_v62 = vpop.f32.mrf.mxu1 }
 0x43f   : > { %v2277_v1 = vadd.f32 %v2276_v62, %v1654_v26  ;;  %4162 = vpow2.f32 %v3601_v17 }
 0x440   : > { %v2357_v50 = vadd.f32 %v4157_v9, %v2356_v60  ;;  %4164 = vtanh.f32 %v2263_v49 }
 0x441   : > { %v4159_v52 = vpop.eup %4158  ;;  %v2291_v27 = vadd.f32 %v2290_v2, %v2277_v1 }
 0x442   : > { %v2361_v42 = vsel %vm2360_vm7, %v4157_v9, %v2357_v50  ;;  %v2369_v3 = vmul.f32 %v4159_v52, %v5733_v14  ;;  %v4161_v47 = vpop.eup %4160  ;;  %vm2374_vm0 = vweird.f32 %v4159_v52 }
 0x443   : > { %v2366_v44 = vsel %vm2363_vm10, %v2365_v30, %v2361_v42  ;;  %v2305_v23 = vadd.f32 %v2304_v59, %v2291_v27  ;;  %v2425_v32 = vmul.f32 %v4161_v47, %v2328_v36  ;;  %vm2375_vm3 = vmor %vm2373_vm1, %vm2374_vm0 }
 0x444   : > { %v2423_v35 = vmul.f32 %v2366_v44, %v636_v37  ;;  %v2370_v6 = vsub.f32 1.0, %v2369_v3 }
 0x445   : > { %v3602_v48 = vmul.f32 -1.442695, %v2305_v23  ;;  %v4163_v57 = vpop.eup %4162 }
 0x446   : > { %v2427_v7 = vadd.f32 %v2425_v32, %v2423_v35  ;;  %v2371_v13 = vmul.f32 %v4159_v52, %v2370_v6  ;;  %v2391_v15 = vadd.f32 1.0, %v4163_v57  ;;  %v4165_v51 = vpop.eup %4164 }
 0x447   : > { %4166 = vpow2.f32 %v3602_v48  ;;  %v2426_v43 = vmul.f32 %v4165_v51, %v2343_v31 }
 0x448   : > { %2435 = vst [vmem:[%s4995_s21] sm:$0xff] %v2427_v7  ;;  %v2372_v26 = vadd.f32 %v4159_v52, %v2371_v13  ;;  %4168 = vrcp.f32 %v2391_v15  ;;  %v2404_v54 = vand.u32 2147483648, %v2391_v15  ;;  %v2402_v40 = vand.u32 2147483647, %v2391_v15 }
 0x449   : > { %vm2398_vm15 = vweird.f32 %v2391_v15 }
 0x44a   : > { %v2376_v19 = vsel %vm2375_vm3, %v4159_v52, %v2372_v26  ;;  %v2405_v5 = vor.u32 1.1754944e-38, %v2404_v54  ;;  %vm2403_vm11 = vcmp.eq.f32.partialorder %v2402_v40, 8.507059e+37 }
 0x44b   : > { %v2381_v56 = vsel %vm2378_vm4, %v2380_v45, %v2376_v19 }
 0x44c   : > { %v2424_v21 = vmul.f32 %v2381_v56, %v637_v41 }
 0x44d   : > { %v4167_v38 = vpop.eup %4166 }
 0x44e   : > { %v2428_v11 = vadd.f32 %v2426_v43, %v2424_v21  ;;  %v2392_v0 = vadd.f32 1.0, %v4167_v38  ;;  %v4169_v9 = vpop.eup %4168 }
 0x44f   : > { %v2394_v24 = vmul.f32 %v4169_v9, %v2391_v15  ;;  %vm2399_vm13 = vweird.f32 %v4169_v9 }
 0x450   : > { %2436 = vst [vmem:[%s4995_s21 + $0x8] sm:$0xff] %v2428_v11  ;;  %4170 = vrcp.f32 %v2392_v0  ;;  %vm2400_vm6 = vmor %vm2398_vm15, %vm2399_vm13  ;;  %v2419_v12 = vand.u32 2147483648, %v2392_v0  ;;  %v2417_v34 = vand.u32 2147483647, %v2392_v0  ;;  %vm2413_vm14 = vweird.f32 %v2392_v0 }
 0x451   : > { %v2395_v14 = vsub.f32 1.0, %v2394_v24  ;;  %4172 = vtanh.f32 %v2427_v7 }
 0x452   : > { %4174 = vtanh.f32 %v2428_v11  ;;  %v2420_v62 = vor.u32 1.1754944e-38, %v2419_v12  ;;  %vm2418_vm8 = vcmp.eq.f32.partialorder %v2417_v34, 8.507059e+37 }
 0x453   : > { %v2396_v4 = vmul.f32 %v4169_v9, %v2395_v14 }
 0x455   : > { %v2397_v22 = vadd.f32 %v4169_v9, %v2396_v4 }
 0x456   : > { %v4171_v20 = vpop.eup %4170 }
 0x457   : > { %v2401_v18 = vsel %vm2400_vm6, %v4169_v9, %v2397_v22  ;;  %v2409_v29 = vmul.f32 %v4171_v20, %v2392_v0  ;;  %v4173_v8 = vpop.eup %4172  ;;  %vm2414_vm12 = vweird.f32 %v4171_v20 }
 0x458   : > { %v2406_v16 = vsel %vm2403_vm11, %v2405_v5, %v2401_v18  ;;  %vm2415_vm7 = vmor %vm2413_vm14, %vm2414_vm12  ;;  %v4175_v1 = vpop.eup %4174 }
 0x459   : > { %v2431_v25 = vmul.f32 %v4173_v8, %v2406_v16  ;;  %v2410_v33 = vsub.f32 1.0, %v2409_v29 }
 0x45b   : > { %2433 = vst [vmem:[%s4993_s25] sm:$0xff] %v2431_v25  ;;  %v2411_v60 = vmul.f32 %v4171_v20, %v2410_v33 }
 0x45d   : > { %v2412_v17 = vadd.f32 %v4171_v20, %v2411_v60 }
 0x45f   : > { %v2416_v55 = vsel %vm2415_vm7, %v4171_v20, %v2412_v17 }
 0x460   : > { %v2421_v2 = vsel %vm2418_vm8, %v2420_v62, %v2416_v55 }
 0x461   : > { %v2432_v50 = vmul.f32 %v4175_v1, %v2421_v2 }
 0x463   : > { %2434 = vst [vmem:[%s4993_s25 + $0x8] sm:$0xff] %v2432_v50  ;;  %v3888_v49 = vpack.c.bf16 %v2432_v50, %v2431_v25 }
 0x465   : > { %3889 = vst [vmem:[#allocation2] sm:$0xff] %v3888_v49  }
 0x466 PF: > { %v3721_v52 = vld [vmem:[%s4971_s8 + $0xe0] sm:$0xf]  ;;  %v3879_v30 = vld [vmem:[%s4971_s8 + $0xec] sm:$0xf0]  ;;  %v3877_v37 = vld [vmem:[%s4971_s8 + $0xe4] sm:$0xf] }
 0x467   : > { %v3722_v36 = vor.u32 %v3879_v30, %v3721_v52  ;;  %v3723_v27 = vld [vmem:[%s4971_s8 + $0xf0] sm:$0xf0]  ;;  %v3729_v42 = vld [vmem:[%s4971_s8 + $0xe8] sm:$0xf]  ;;  %v3880_v3 = vld [vmem:[%s4971_s8 + $0xf4] sm:$0xf0] }
 0x468   : > { %v3726_v58 = vor.u32 %v3877_v37, %v3723_v27  ;;  %v3730_v59 = vor.u32 %v3880_v3, %v3729_v42  ;;  %v3878_v47 = vld [vmem:[%s4971_s8 + $0xec] sm:$0xf]  ;;  %v3731_v44 = vld [vmem:[%s4971_s8 + $0xf8] sm:$0xf0]  ;;  %v3705_v46 = vld [vmem:[%s4971_s8 + $0xc0] sm:$0xf] }
 0x469   : > { %2656 = vmatpush.bf16.msra.mxu0 %v3722_v36  ;;  %v3734_v23 = vor.u32 %v3878_v47, %v3731_v44  ;;  %v3875_v35 = vld [vmem:[%s4971_s8 + $0xcc] sm:$0xf0]  ;;  %v3873_v32 = vld [vmem:[%s4971_s8 + $0xc4] sm:$0xf]  ;;  %v3707_v6 = vld [vmem:[%s4971_s8 + $0xd0] sm:$0xf0] }
 0x46a   : > { %2670 = vmatpush.bf16.msra.mxu1 %v3726_v58  ;;  %2684 = vmatpush.bf16.msra.mxu2 %v3730_v59  ;;  %v3706_v61 = vor.u32 %v3875_v35, %v3705_v46  ;;  %v3710_v39 = vor.u32 %v3873_v32, %v3707_v6  ;;  %v3713_v10 = vld [vmem:[%s4971_s8 + $0xc8] sm:$0xf]  ;;  %v3876_v63 = vld [vmem:[%s4971_s8 + $0xd4] sm:$0xf0]  ;;  %v3874_v48 = vld [vmem:[%s4971_s8 + $0xcc] sm:$0xf] }
 0x46b   : > { %2698 = vmatpush.bf16.msra.mxu3 %v3734_v23  ;;  %v3714_v57 = vor.u32 %v3876_v63, %v3713_v10  ;;  %v3715_v7 = vld [vmem:[%s4971_s8 + $0xd8] sm:$0xf0]  ;;  %v3689_v13 = vld [vmem:[%s4971_s8 + $0xa0] sm:$0xf]  ;;  %v3871_v28 = vld [vmem:[%s4971_s8 + $0xac] sm:$0xf0] }
 0x46c   : > { %v3718_v53 = vor.u32 %v3874_v48, %v3715_v7  ;;  %v3869_v15 = vld [vmem:[%s4971_s8 + $0xa4] sm:$0xf]  ;;  %v3691_v26 = vld [vmem:[%s4971_s8 + $0xb0] sm:$0xf0]  ;;  %v3697_v45 = vld [vmem:[%s4971_s8 + $0xa8] sm:$0xf]  ;;  %v3690_v41 = vor.u32 %v3871_v28, %v3689_v13 }
 0x46d   : > { %2657 = vmatpush.bf16.msra.mxu0 %v3706_v61  ;;  %v3872_v31 = vld [vmem:[%s4971_s8 + $0xb4] sm:$0xf0]  ;;  %v3870_v19 = vld [vmem:[%s4971_s8 + $0xac] sm:$0xf]  ;;  %v3699_v51 = vld [vmem:[%s4971_s8 + $0xb8] sm:$0xf0]  ;;  %v3694_v56 = vor.u32 %v3869_v15, %v3691_v26 }
 0x46e   : > { %2671 = vmatpush.bf16.msra.mxu1 %v3710_v39  ;;  %2685 = vmatpush.bf16.msra.mxu2 %v3714_v57  ;;  %v3698_v21 = vor.u32 %v3872_v31, %v3697_v45  ;;  %v3673_v43 = vld [vmem:[%s4971_s8 + $0x80] sm:$0xf]  ;;  %v3867_v38 = vld [vmem:[%s4971_s8 + $0x8c] sm:$0xf0]  ;;  %v3865_v11 = vld [vmem:[%s4971_s8 + $0x84] sm:$0xf]  ;;  %v3702_v0 = vor.u32 %v3870_v19, %v3699_v51 }
 0x46f   : > { %2699 = vmatpush.bf16.msra.mxu3 %v3718_v53  ;;  %v3675_v9 = vld [vmem:[%s4971_s8 + $0x90] sm:$0xf0]  ;;  %v3681_v24 = vld [vmem:[%s4971_s8 + $0x88] sm:$0xf]  ;;  %v3868_v14 = vld [vmem:[%s4971_s8 + $0x94] sm:$0xf0]  ;;  %v3674_v40 = vor.u32 %v3867_v38, %v3673_v43 }
 0x470   : > { %v3866_v54 = vld [vmem:[%s4971_s8 + $0x8c] sm:$0xf]  ;;  %v3683_v4 = vld [vmem:[%s4971_s8 + $0x98] sm:$0xf0]  ;;  %v3678_v22 = vor.u32 %v3865_v11, %v3675_v9  ;;  %v3682_v20 = vor.u32 %v3868_v14, %v3681_v24  ;;  %v3657_v5 = vld [vmem:[%s4971_s8 + $0x60] sm:$0xf] }
 0x471   : > { %2658 = vmatpush.bf16.msra.mxu0 %v3690_v41  ;;  %v3863_v18 = vld [vmem:[%s4971_s8 + $0x6c] sm:$0xf0]  ;;  %v3861_v29 = vld [vmem:[%s4971_s8 + $0x64] sm:$0xf]  ;;  %v3686_v8 = vor.u32 %v3866_v54, %v3683_v4  ;;  %v3659_v16 = vld [vmem:[%s4971_s8 + $0x70] sm:$0xf0] }
 0x472   : > { %2672 = vmatpush.bf16.msra.mxu1 %v3694_v56  ;;  %2686 = vmatpush.bf16.msra.mxu2 %v3698_v21  ;;  %v3665_v25 = vld [vmem:[%s4971_s8 + $0x68] sm:$0xf]  ;;  %v3864_v33 = vld [vmem:[%s4971_s8 + $0x74] sm:$0xf0]  ;;  %v3862_v12 = vld [vmem:[%s4971_s8 + $0x6c] sm:$0xf]  ;;  %v3658_v34 = vor.u32 %v3863_v18, %v3657_v5  ;;  %v3662_v17 = vor.u32 %v3861_v29, %v3659_v16 }
 0x473   : > { %2700 = vmatpush.bf16.msra.mxu3 %v3702_v0  ;;  %v3667_v60 = vld [vmem:[%s4971_s8 + $0x78] sm:$0xf0]  ;;  %v3666_v62 = vor.u32 %v3864_v33, %v3665_v25  ;;  %v3641_v55 = vld [vmem:[%s4971_s8 + $0x40] sm:$0xf]  ;;  %v3859_v1 = vld [vmem:[%s4971_s8 + $0x4c] sm:$0xf0] }
 0x474   : > { %v3857_v2 = vld [vmem:[%s4971_s8 + $0x44] sm:$0xf]  ;;  %v3670_v50 = vor.u32 %v3862_v12, %v3667_v60  ;;  %v3643_v49 = vld [vmem:[%s4971_s8 + $0x50] sm:$0xf0]  ;;  %v3649_v52 = vld [vmem:[%s4971_s8 + $0x48] sm:$0xf]  ;;  %v3642_v27 = vor.u32 %v3859_v1, %v3641_v55 }
 0x475   : > { %2659 = vmatpush.bf16.msra.mxu0 %v3674_v40  ;;  %v3860_v30 = vld [vmem:[%s4971_s8 + $0x54] sm:$0xf0]  ;;  %v3858_v37 = vld [vmem:[%s4971_s8 + $0x4c] sm:$0xf]  ;;  %v3651_v36 = vld [vmem:[%s4971_s8 + $0x58] sm:$0xf0]  ;;  %v3646_v42 = vor.u32 %v3857_v2, %v3643_v49 }
 0x476   : > { %2673 = vmatpush.bf16.msra.mxu1 %v3678_v22  ;;  %2687 = vmatpush.bf16.msra.mxu2 %v3682_v20  ;;  %v3650_v3 = vor.u32 %v3860_v30, %v3649_v52  ;;  %v3625_v58 = vld [vmem:[%s4971_s8 + $0x20] sm:$0xf]  ;;  %v3855_v59 = vld [vmem:[%s4971_s8 + $0x2c] sm:$0xf0]  ;;  %v3853_v47 = vld [vmem:[%s4971_s8 + $0x24] sm:$0xf]  ;;  %v3654_v44 = vor.u32 %v3858_v37, %v3651_v36 }
 0x477   : > { %2701 = vmatpush.bf16.msra.mxu3 %v3686_v8  ;;  %v3627_v46 = vld [vmem:[%s4971_s8 + $0x30] sm:$0xf0]  ;;  %v3633_v23 = vld [vmem:[%s4971_s8 + $0x28] sm:$0xf]  ;;  %v3856_v35 = vld [vmem:[%s4971_s8 + $0x34] sm:$0xf0]  ;;  %v3626_v61 = vor.u32 %v3855_v59, %v3625_v58 }
 0x478   : > { %v3854_v32 = vld [vmem:[%s4971_s8 + $0x2c] sm:$0xf]  ;;  %v3635_v6 = vld [vmem:[%s4971_s8 + $0x38] sm:$0xf0]  ;;  %v3630_v39 = vor.u32 %v3853_v47, %v3627_v46  ;;  %v3634_v10 = vor.u32 %v3856_v35, %v3633_v23  ;;  %v3609_v63 = vld [vmem:[%s4971_s8] sm:$0xf] }
 0x479   : > { %2660 = vmatpush.bf16.msra.mxu0 %v3658_v34  ;;  %v3851_v48 = vld [vmem:[%s4971_s8 + $0xc] sm:$0xf0]  ;;  %v3849_v57 = vld [vmem:[%s4971_s8 + $0x4] sm:$0xf]  ;;  %v3638_v7 = vor.u32 %v3854_v32, %v3635_v6  ;;  %v3611_v13 = vld [vmem:[%s4971_s8 + $0x10] sm:$0xf0] }
 0x47a   : > { %2674 = vmatpush.bf16.msra.mxu1 %v3662_v17  ;;  %2688 = vmatpush.bf16.msra.mxu2 %v3666_v62  ;;  %v3617_v28 = vld [vmem:[%s4971_s8 + $0x8] sm:$0xf]  ;;  %v3852_v53 = vld [vmem:[%s4971_s8 + $0x14] sm:$0xf0]  ;;  %v3850_v15 = vld [vmem:[%s4971_s8 + $0xc] sm:$0xf]  ;;  %v3610_v45 = vor.u32 %v3851_v48, %v3609_v63  ;;  %v3614_v41 = vor.u32 %v3849_v57, %v3611_v13 }
 0x47b   : > { %2702 = vmatpush.bf16.msra.mxu3 %v3670_v50  ;;  %v3619_v26 = vld [vmem:[%s4971_s8 + $0x18] sm:$0xf0]  ;;  %v3618_v31 = vor.u32 %v3852_v53, %v3617_v28  ;;  %v3848_v51 = vld [vmem:[#allocation2] sm:$0xff]  ;;  %v2480_v56 = vld [vmem:[%s4989_s30] sm:$0xf]  ;;  %v4671_v1 = vmov 0  }
 0x47c   : > { %v3622_v19 = vor.u32 %v3850_v15, %v3619_v26  ;;  %v2482_v21 = vperm.slane %v2480_v56, 0  ;;  %v2483_v43 = vperm.slane %v2480_v56, 1  ;;  %v2484_v24 = vperm.slane %v2480_v56, 2  ;;  %4194 = vset.pattern.permute.xlu1 %v4671_v1  ;;  %4195 = vset.pattern.permute.xlu0 %v4671_v1  ;;  %v2720_v2 = vld [vmem:[#allocation3] sm:$0xff]  ;;  %v2721_v30 = vld [vmem:[#allocation3 + $0x8] sm:$0xff]  ;;  %s6114_s8 = sld [smem:[#allocation35_spill]] }
 0x47d   : > { %2661 = vmatpush.bf16.msra.mxu0 %v3642_v27  ;;  %v2485_v14 = vperm.slane %v2480_v56, 3  ;;  %vm2790_vm10 = vcmask 7168  }
 0x47e   : > { %2675 = vmatpush.bf16.msra.mxu1 %v3646_v42  ;;  %2689 = vmatpush.bf16.msra.mxu2 %v3650_v3 }
 0x47f   : > { %2703 = vmatpush.bf16.msra.mxu3 %v3654_v44 }
 0x481   : > { %2662 = vmatpush.bf16.msra.mxu0 %v3626_v61 }
 0x482   : > { %2676 = vmatpush.bf16.msra.mxu1 %v3630_v39  ;;  %2690 = vmatpush.bf16.msra.mxu2 %v3634_v10  ;;  %p3735_p2 = scmp.ne.s32.totalorder %s6114_s8, 2 }
 0x483   : > { %2704 = vmatpush.bf16.msra.mxu3 %v3638_v7 }
 0x485   : > { %2663 = vmatpush.bf16.msra.mxu0 %v3610_v45 }
 0x486   : > { %2677 = vmatpush.bf16.msra.mxu1 %v3614_v41  ;;  %2691 = vmatpush.bf16.msra.mxu2 %v3618_v31 }
 0x487   : > { %2705 = vmatpush.bf16.msra.mxu3 %v3622_v19 }
 0x488   : > { %2664 = vmatmul.bf16.vlgmr.msra.gmra.mxu0 %v3848_v51 }
 0x489   : > { %2678 = vmatmul.bf16.vlgmr.msra.gmra.mxu1 %v3848_v51  ;;  %2692 = vmatmul.bf16.vlgmr.msra.gmra.mxu2 %v3848_v51 }
 0x48a   : > { %2706 = vmatmul.bf16.vlgmr.msra.gmra.mxu3 %v3848_v51 }
 0x505   : > { %v2665_v38 = vpop.f32.mrf.mxu0 }
 0x506   : > { %v2666_v11 = vadd.f32 %v2665_v38, %v2482_v21  ;;  %v2679_v0 = vpop.f32.mrf.mxu1 }
 0x507   : > { %v2680_v9 = vadd.f32 %v2679_v0, %v2483_v43 }
 0x508   : > { %2712 = vst [vmem:[%s4991_s15] sm:$0xff] %v2666_v11 }
 0x509   : > { %2713 = vst [vmem:[%s4991_s15 + $0x8] sm:$0xff] %v2680_v9 }
 0x50c   : > { %v2693_v54 = vpop.f32.mrf.mxu2 }
 0x50d   : > { %v2694_v4 = vadd.f32 %v2693_v54, %v2484_v24  ;;  %v2707_v40 = vpop.f32.mrf.mxu3  ;;  %v2667_v22 = vpop.f32.mrf.mxu0 }
 0x50e   : > { %v2708_v20 = vadd.f32 %v2707_v40, %v2485_v14  ;;  %v2668_v5 = vadd.f32 %v2667_v22, %v2482_v21  ;;  %v2681_v18 = vpop.f32.mrf.mxu1  ;;  %v2735_v22 = vld [vmem:[#allocation4 + $0x8] sm:$0xff] }
 0x50f   : > { %2714 = vst [vmem:[%s4991_s15 + $0x10] sm:$0xff] %v2694_v4  ;;  %v2682_v29 = vadd.f32 %v2681_v18, %v2483_v43  ;;  %v2722_v8 = vmax.f32 %v2666_v11, %v2694_v4 }
 0x510   : > { %2715 = vst [vmem:[%s4991_s15 + $0x18] sm:$0xff] %v2708_v20  ;;  %v2723_v16 = vmax.f32 %v2680_v9, %v2708_v20 }
 0x511   : > { %2716 = vst [vmem:[%s4991_s15 + $0x20] sm:$0xff] %v2668_v5 }
 0x512   : > { %2717 = vst [vmem:[%s4991_s15 + $0x28] sm:$0xff] %v2682_v29  ;;  %v2724_v25 = vmax.f32 %v2722_v8, %v2723_v16 }
 0x514   : > { %2725 = vmax.xlane.f32.xlu0 %v2724_v25  ;;  %v2695_v33 = vpop.f32.mrf.mxu2 }
 0x515   : > { %v2696_v12 = vadd.f32 %v2695_v33, %v2484_v24  ;;  %v2709_v60 = vpop.f32.mrf.mxu3  ;;  %v2734_v24 = vld [vmem:[#allocation4] sm:$0xff] }
 0x516   : > { %v2710_v34 = vadd.f32 %v2709_v60, %v2485_v14 }
 0x517   : > { %2718 = vst [vmem:[%s4991_s15 + $0x30] sm:$0xff] %v2696_v12  ;;  %v2727_v17 = vmax.f32 %v2668_v5, %v2696_v12 }
 0x518   : > { %2719 = vst [vmem:[%s4991_s15 + $0x38] sm:$0xff] %v2710_v34  ;;  %v2728_v62 = vmax.f32 %v2682_v29, %v2710_v34 }
 0x51a   : > { %v2729_v55 = vmax.f32 %v2727_v17, %v2728_v62 }
 0x51c   : > { %2730 = vmax.xlane.f32.xlu0 %v2729_v55 }
 0x587   : > { %v2726_v50 = vpop.xlane.xlu0 %2725 }
 0x588   : > { %v2732_v49 = vmax.f32 %v2720_v2, %v2726_v50 }
 0x58a   : > { %v2736_v52 = vsub.f32 %v2720_v2, %v2732_v49  ;;  %2793 = vst.msk [vmem:[#allocation3] sm:$0xff] %vm2790_vm10, %v2732_v49  ;;  %2746 = vperm.xlu1 %4194, %v2732_v49  }
 0x58f   : > { %v2731_v37 = vpop.xlane.xlu0 %2730 }
 0x590   : > { %v2733_v36 = vmax.f32 %v2721_v30, %v2731_v37 }
 0x592   : > { %v2737_v27 = vsub.f32 %v2721_v30, %v2733_v36  ;;  %2794 = vst.msk [vmem:[#allocation3 + $0x8] sm:$0xff] %vm2790_vm10, %v2733_v36  ;;  %2751 = vperm.xlu1 %4194, %v2733_v36  }
 0x594   : > { %v2740_v0 = vmul.f32 1.442695, %v2737_v27 }
 0x5fc   : > { %v2747_v42 = vpop.permute.xlu1 %2746 }
 0x5fd   : > { %v2754_v3 = vsub.f32 %v2666_v11, %v2747_v42  ;;  %v2755_v58 = vsub.f32 %v2680_v9, %v2747_v42  ;;  %v2756_v59 = vsub.f32 %v2694_v4, %v2747_v42  ;;  %v2757_v47 = vsub.f32 %v2708_v20, %v2747_v42 }
 0x5fe   : > { %v2738_v11 = vmul.f32 1.442695, %v2736_v52 }
 0x5ff   : > { %v2762_v44 = vmul.f32 1.442695, %v2754_v3  ;;  %v2764_v46 = vmul.f32 1.442695, %v2755_v58  ;;  %v2766_v23 = vmul.f32 1.442695, %v2756_v59 }
 0x600   : > { %v2768_v35 = vmul.f32 1.442695, %v2757_v47 }
 0x601   : > { %4196 = vpow2.f32 %v2762_v44 }
 0x602   : > { %4198 = vpow2.f32 %v2764_v46 }
 0x603   : > { %4200 = vpow2.f32 %v2766_v23 }
 0x604   : > { %v2752_v32 = vpop.permute.xlu1 %2751  ;;  %4202 = vpow2.f32 %v2768_v35 }
 0x605   : > { %v2758_v6 = vsub.f32 %v2668_v5, %v2752_v32  ;;  %v2759_v61 = vsub.f32 %v2682_v29, %v2752_v32  ;;  %v2760_v39 = vsub.f32 %v2696_v12, %v2752_v32  ;;  %v2761_v10 = vsub.f32 %v2710_v34, %v2752_v32 }
 0x607   : > { %v4197_v63 = vpop.eup %4196  ;;  %v2770_v48 = vmul.f32 1.442695, %v2758_v6  ;;  %v2772_v57 = vmul.f32 1.442695, %v2759_v61  ;;  %v2774_v13 = vmul.f32 1.442695, %v2760_v39 }
 0x608   : > { %v4199_v7 = vpop.eup %4198  ;;  %v2776_v15 = vmul.f32 1.442695, %v2761_v10 }
 0x609   : > { %4204 = vpow2.f32 %v2770_v48  ;;  %v2778_v28 = vadd.f32 %v4199_v7, %v4197_v63  ;;  %v4201_v53 = vpop.eup %4200 }
 0x60a   : > { %4206 = vpow2.f32 %v2772_v57  ;;  %v4203_v45 = vpop.eup %4202 }
 0x60b   : > { %v2779_v26 = vadd.f32 %v4201_v53, %v2778_v28  ;;  %4208 = vpow2.f32 %v2774_v13 }
 0x60c   : > { %4210 = vpow2.f32 %v2776_v15 }
 0x60d   : > { %v2780_v41 = vadd.f32 %v4203_v45, %v2779_v26  ;;  %4212 = vpow2.f32 %v2738_v11 }
 0x60e   : > { %4214 = vpow2.f32 %v2740_v0 }
 0x60f   : > { %v4205_v31 = vpop.eup %4204  ;;  %2781 = vadd.xlane.f32.xlu2 %v2780_v41 }
 0x610   : > { %v4207_v19 = vpop.eup %4206 }
 0x611   : > { %v2783_v51 = vadd.f32 %v4207_v19, %v4205_v31  ;;  %v4209_v56 = vpop.eup %4208 }
 0x612   : > { %v4211_v43 = vpop.eup %4210 }
 0x613   : > { %v2784_v21 = vadd.f32 %v4209_v56, %v2783_v51  ;;  %v4213_v9 = vpop.eup %4212 }
 0x614   : > { %v2742_v14 = vmul.f32 %v4213_v9, %v2734_v24  ;;  %v4215_v40 = vpop.eup %4214 }
 0x615   : > { %v2785_v38 = vadd.f32 %v4211_v43, %v2784_v21  ;;  %v2743_v20 = vmul.f32 %v4215_v40, %v2735_v22 }
 0x617   : > { %2786 = vadd.xlane.f32.xlu2 %v2785_v38 }
 0x682   : > { %v2782_v54 = vpop.xlane.xlu2 %2781 }
 0x683   : > { %v2788_v4 = vadd.f32 %v2782_v54, %v2742_v14 }
 0x685   : > { %2791 = vst.msk [vmem:[#allocation4] sm:$0xff] %vm2790_vm10, %v2788_v4 }
 0x689   : > { %2798 = sbr.rel (%p3735_p2) target bundleno = 1697 (0x6a1), region = 88 }
 0x68a   : > { %v2787_v5 = vpop.xlane.xlu2 %2786 }
 0x68b   : > { %v2789_v18 = vadd.f32 %v2787_v5, %v2743_v20 }
 0x68d   : > { %2792 = vst.msk [vmem:[#allocation4 + $0x8] sm:$0xff] %vm2790_vm10, %v2789_v18 }
 0x68e   : > { %v2801_v29 = vld [vmem:[#allocation4] sm:$0xff]  ;;  %v2799_v25 = vld [vmem:[#allocation3] sm:$0xff]  ;;  %v2800_v60 = vld [vmem:[#allocation3 + $0x8] sm:$0xff] }
 0x68f   : > { %4216 = vlog2.f32 %v2801_v29 }
 0x694   : > { %v2802_v8 = vld [vmem:[#allocation4 + $0x8] sm:$0xff] }
 0x695   : > { %4218 = vlog2.f32 %v2802_v8  ;;  %v4217_v16 = vpop.eup %4216 }
 0x696   : > { %v2804_v12 = vmul.f32 0.6931472, %v4217_v16 }
 0x698   : > { %v2807_v17 = vadd.f32 %v2804_v12, %v2799_v25 }
 0x69a   : > { %2809 = vst.msk [vmem:[%s4987_s3] sm:$0xff] %vm2790_vm10, %v2807_v17 }
 0x69b   : > { %v4219_v33 = vpop.eup %4218 }
 0x69c   : > { %v2806_v34 = vmul.f32 0.6931472, %v4219_v33 }
 0x69e   : > { %v2808_v62 = vadd.f32 %v2806_v34, %v2800_v60 }
 0x6a0   : > { %2810 = vst.msk [vmem:[%s4987_s3 + $0x8] sm:$0xff] %vm2790_vm10, %v2808_v62 }
 0x6a1 PF: > { %s6115_s1 = sld [smem:[#allocation36_spill]]  ;;  %s2866_s16 = sshll.u32 %s4993_s25, 4  ;;  %s2867_s16 = int_to_ptr.vmem [resolvable:$true] %s2866_s16 }
 0x6a2   : > { %s6117_s18 = sld [smem:[#allocation57_spill]]  ;;  %s5861_s30 = scalar_lea.sflag [#allocation19], %s535_s4 }
 0x6a7   : > { %s5852_s29 = sshll.u32 %s6115_s1, 4 }
 0x6a8   : > { %s2865_s28 = scalar_lea.hbm %s6117_s18, %s5852_s29  ;;  %s4450_s20 = scalar_lea.hbm %s6117_s18, 32 }
 0x6a9   : > { %s2868_s10 = sshll.u32 %s2865_s28, 4  ;;  %s2869_s10 = int_to_ptr.hbm [resolvable:$true] %s2868_s10 }
 0x6aa   : > { %s4444_s3 = sshra.s32 %s2869_s10, 4  ;;  %s4445_s3 = int_to_ptr.hbm [resolvable:$true] %s4444_s3 }
 0x6ab   : > { %s4446_s0 = scalar_lea.hbm %s4445_s3, 16  ;;  %p4451_p7 = scmp.lt.s32.totalorder %s4445_s3, %s6117_s18 }
 0x6ac   : > { %p4447_p5 = scmp.ne.s32.totalorder %s4445_s3, %s4446_s0  ;;  %p4452_p9 = scmp.lt.s32.totalorder %s4450_s20, %s4446_s0 }
 0x6ae   : > { %p4448_p1 = pnand %p4447_p5, %p4823_p8  ;;  %p4453_p13 = por %p4452_p9, %p4451_p7 }
 0x6b0   : > { %p4449_p0 = pneg %p4448_p1 }
 0x6b2   : > { %p4454_p3 = pnand %p4453_p13, %p4449_p0 }
 0x6b4   : > { %4457 = shalt.err (!%p4454_p3)
}
 0x6b5   : > { %s4672_s14 = smov 128   ;;  %s6118_s4 = sld [smem:[#allocation35_spill]] }
 0x6b6   : > { %s4673_s25 = smov 8   ;;  %s2839_s17 = smul.u32 3, %s6115_s1 }
 0x6b7   : > { %3915 = dma.vmem_to_hbm [thread:$0]  (%p4823_p8), %s2867_s16, 256, %s2869_s10, %s5861_s30, %s4672_s14, %s4672_s14, %s4673_s25  }
 0x6b8   : > { %s2846_s3 = sshll.u32 %s4991_s15, 4  ;;  %s6120_s8 = sld [smem:[#allocation55_spill]]  ;;  %s5879_s3 = int_to_ptr.vmem [resolvable:$true] %s2846_s3 }
 0x6b9   : > { %s6121_s18 = sld [smem:[#allocation58_spill]]  ;;  %s2883_s26 = sshll.u32 %s4995_s21, 4  ;;  %s5890_s26 = int_to_ptr.vmem [resolvable:$true] %s2883_s26 }
 0x6ba   : > { %s2812_s1 = scalar_lea.sflag [#allocation7], %s4966_s6 }
 0x6bb   : > { %s2840_s0 = sadd.s32 %s6118_s4, %s2839_s17 }
 0x6bc   : > { %s3881_s2 = sshll.u32 %s2840_s0, 5 }
 0x6be   : > { %s2845_s12 = scalar_lea.hbm %s6120_s8, %s3881_s2  ;;  %s4478_s17 = scalar_lea.hbm %s6120_s8, 384 }
 0x6bf   : > { %s2882_s24 = scalar_lea.hbm %s6121_s18, %s5852_s29  ;;  %s2848_s27 = sshll.u32 %s2845_s12, 4  ;;  %s2849_s27 = int_to_ptr.hbm [resolvable:$true] %s2848_s27 }
 0x6c0   : > { %s4472_s16 = sshra.s32 %s2849_s27, 4  ;;  %s4473_s16 = int_to_ptr.hbm [resolvable:$true] %s4472_s16 }
 0x6c1   : > { %s4474_s15 = scalar_lea.hbm %s4473_s16, 64  ;;  %p4479_p5 = scmp.lt.s32.totalorder %s4473_s16, %s6120_s8 }
 0x6c2   : > { %p4475_p12 = scmp.ne.s32.totalorder %s4473_s16, %s4474_s15  ;;  %p4480_p1 = scmp.lt.s32.totalorder %s4478_s17, %s4474_s15 }
 0x6c4   : > { %p4476_p4 = pnand %p4475_p12, %p4876_p11  ;;  %p4481_p0 = por %p4480_p1, %p4479_p5 }
 0x6c6   : > { %p4477_p2 = pneg %p4476_p4 }
 0x6c8   : > { %p4482_p7 = pnand %p4481_p0, %p4477_p2 }
 0x6ca   : > { %4485 = shalt.err (!%p4482_p7)
}
 0x6cb   : > { %s4674_s6 = smov 512   ;;  %s4675_s22 = smov 3072  }
 0x6cc   : > { %s4676_s21 = smov 32   ;;  %s2885_s2 = sshll.u32 %s2882_s24, 4  ;;  %s2886_s2 = int_to_ptr.hbm [resolvable:$true] %s2885_s2 }
 0x6cd   : > { %3914 = dma.vmem_to_hbm [thread:$0]  (%p4876_p11), %s5879_s3, 1024, %s2849_s27, %s2812_s1, %s4674_s6, %s4675_s22, %s4676_s21  }
 0x6ce   : > { %s6122_s12 = sld [smem:[#allocation59_spill]]  ;;  %s4500_s16 = sshra.s32 %s2886_s2, 4  ;;  %s4501_s16 = int_to_ptr.hbm [resolvable:$true] %s4500_s16 }
 0x6cf   : > { %s4502_s15 = scalar_lea.hbm %s4501_s16, 16  ;;  %s4506_s0 = scalar_lea.hbm %s6121_s18, 32 }
 0x6d0   : > { %p4503_p9 = scmp.ne.s32.totalorder %s4501_s16, %s4502_s15  ;;  %p4507_p11 = scmp.lt.s32.totalorder %s4501_s16, %s6121_s18 }
 0x6d1   : > { %p4508_p12 = scmp.lt.s32.totalorder %s4506_s0, %s4502_s15 }
 0x6d2   : > { %p4504_p13 = pnand %p4503_p9, %p4823_p8 }
 0x6d3   : > { %p4509_p4 = por %p4508_p12, %p4507_p11 }
 0x6d4   : > { %s2899_s10 = scalar_lea.hbm %s6122_s12, %s5852_s29  ;;  %p4505_p3 = pneg %p4504_p13 }
 0x6d6   : > { %p4510_p2 = pnand %p4509_p4, %p4505_p3 }
 0x6d8   : > { %4513 = shalt.err (!%p4510_p2)
}
 0x6d9   : > { %s6123_s27 = sld [smem:[#allocation31_spill]]  ;;  %s2900_s24 = sshll.u32 %s4997_s9, 4  ;;  %s2901_s24 = int_to_ptr.vmem [resolvable:$true] %s2900_s24 }
 0x6da   : > { %3916 = dma.vmem_to_hbm [thread:$0]  (%p4823_p8), %s5890_s26, 256, %s2886_s2, %s5861_s30, %s4672_s14, %s4672_s14, %s4673_s25  }
 0x6db   : > { %s2902_s29 = sshll.u32 %s2899_s10, 4  ;;  %s4534_s20 = scalar_lea.hbm %s6122_s12, 32  ;;  %s2903_s29 = int_to_ptr.hbm [resolvable:$true] %s2902_s29 }
 0x6dc   : > { %s4528_s6 = sshra.s32 %s2903_s29, 4  ;;  %s4529_s6 = int_to_ptr.hbm [resolvable:$true] %s4528_s6 }
 0x6dd   : > { %s4530_s22 = scalar_lea.hbm %s4529_s6, 16  ;;  %p4535_p7 = scmp.lt.s32.totalorder %s4529_s6, %s6122_s12 }
 0x6de   : > { %p4531_p5 = scmp.ne.s32.totalorder %s4529_s6, %s4530_s22  ;;  %p4536_p9 = scmp.lt.s32.totalorder %s4534_s20, %s4530_s22 }
 0x6df   : > { %s6124_s3 = sand.u32 1, %s6123_s27  }
 0x6e0   : > { %s2832_s1 = scalar_lea.sflag [#allocation22], %s6124_s3  ;;  %p4532_p1 = pnand %p4531_p5, %p4823_p8 }
 0x6e1   : > { %p4537_p13 = por %p4536_p9, %p4535_p7 }
 0x6e2   : > { %p4533_p0 = pneg %p4532_p1 }
 0x6e4   : > { %p4538_p3 = pnand %p4537_p13, %p4533_p0 }
 0x6e6   : > { %4541 = shalt.err (!%p4538_p3)
}
 0x6e7   : > { %3917 = dma.vmem_to_hbm [thread:$0]  (%p4823_p8), %s2901_s24, 256, %s2903_s29, %s2832_s1, %s4672_s14, %s4672_s14, %s4673_s25  }
 0x6e8 PF: > { %s6125_s26 = sld [smem:[#allocation32_spill]]  ;;  %p3969_p11 = scmp.ge.s32.totalorder %s4656_s13, 2 }
 0x6ea   : > { %p3946_p12 = pnand %p3969_p11, %p4815_p6 }
 0x6ec   : > { %p3947_p4 = pneg %p3946_p12 }
 0x6ee   : > { %s2917_s30 = sand.u32 1, %s6125_s26  }
 0x6ef   : > { %s2918_s2 = scalar_lea.sflag [#allocation7], %s2917_s30 }
 0x6f0   : > { %4603 = dma.done.wait (%p3947_p4), %s2918_s2, 1024  }
 0x6f1   : > { %4605 = vsyncadd (%p3947_p4), %s2918_s2, 4294966272  ;;  %s6127_s10 = sadd.s32 4294967294, %s4656_s13   ;;  %p3949_p2 = pnand %p3969_p11, %p4828_p10 }
 0x6f2   : > { %s2935_s11 = sand.u32 1, %s6127_s10  }
 0x6f3   : > { %p3950_p5 = pneg %p3949_p2  ;;  %s2936_s14 = scalar_lea.sflag [#allocation19], %s2935_s11 }
 0x6f5   : > { %4607 = dma.done.wait (%p3950_p5), %s2936_s14, 512  }
 0x6f6   : > { %4609 = vsyncadd (%p3950_p5), %s2936_s14, 4294966784  ;;  %s6129_s25 = sld [smem:[#allocation30_spill]] }
 0x6fc   : > { %s2955_s17 = sand.u32 1, %s6129_s25  }
 0x6fd   : > { %s2956_s0 = scalar_lea.sflag [#allocation22], %s2955_s17 }
 0x6fe   : > { %4611 = dma.done.wait (%p3950_p5), %s2956_s0, 256  }
 0x6ff   : > { %4613 = vsyncadd (%p3950_p5), %s2956_s0, 4294967040  ;;  %s38_s13 = sadd.s32 1, %s4656_s13   ;;  %s6130_s21 = sld [smem:[#allocation31_spill]] }
 0x700   : > { %p35_p6 = scmp.ge.s32.totalorder %s38_s13, 8   ;;  %s6131_s24 = sld [smem:[#allocation33_spill]] }
 0x701   : > { %s6132_s25 = sld [smem:[#allocation34_spill]]  ;;  %s6138_s22 = smov %s4624_s23 }
 0x702   : > { %s6133_s26 = sld [smem:[#allocation46_spill]]  ;;  %s6139_s23 = smov %s4896_s5 }
 0x703   : > { %s6134_s27 = sld [smem:[#allocation37_spill]]  ;;  %37 = sbr.rel (!%p35_p6) target bundleno = 30 (0x1e), region = 198 }
 0x704   : > { %s6135_s28 = sld [smem:[#allocation38_spill]] }
 0x705   : > { %s6136_s29 = sld [smem:[#allocation43_spill]] }
 0x706   : > { %s6137_s30 = sld [smem:[#allocation45_spill]] }
 0x708   :  { %2962 = vsyncpa [#allocation6], 1 }
 0x709   :  { %2964 = vsyncpa [#allocation6 + $0x1], 1 }
 0x70a   :  { %2965 = vsyncpa [#allocation9], 1 }
 0x70b   :  { %2966 = vsyncpa [#allocation12], 1 }
 0x70c   :  { %2967 = vsyncpa [#allocation15], 1 }
 0x70d   :  { %2969 = vsyncpa [#allocation15 + $0x1], 1 }
 0x70e   :  { %2970 = vsyncpa [#allocation7], 1 }
 0x70f   :  { %2972 = vsyncpa [#allocation7 + $0x1], 1 }
 0x710   :  { %2973 = vsyncpa [#allocation19], 1 }
 0x711   :  { %2975 = vsyncpa [#allocation19 + $0x1], 1 }
 0x712   :  { %2976 = vsyncpa [#allocation22], 1 }
 0x713   :  { %2978 = vsyncpa [#allocation22 + $0x1], 1 }

</bundles_post_ra>
